<compile_context>
chip_gen: v5e
topology: v5e:2x2
jax: 0.10.0
libtpu: 0.0.40
codegen_flags: <defaults>
</compile_context>

<pallas_src>
import functools
import math

import jax
import jax.numpy as jnp
from jax.experimental import pallas as pl
from jax.experimental.pallas import tpu as pltpu


# ----------------------------------------------------------------------------
# Fused forward kernel (single pallas_call, no grid, no scratch)
# ----------------------------------------------------------------------------
def _stgcn_fused_kernel(x_ref, a1_ref, a2_ref, w11_ref, wstk_ref, bstk_ref,
                        th_ref, fw_ref, fb_ref, o_ref, *, n, ks, cout):
    bf = jnp.bfloat16

    def mm(a, b):
        # bf16 MXU operands, f32 accumulation.
        return jax.lax.dot_general(a.astype(bf), b.astype(bf),
                                   (((1,), (0,)), ((), ())),
                                   preferred_element_type=jnp.float32)

    def gate(y):
        # conv1 + sigmoid(conv2) + conv3, then ReLU (gates fused along columns).
        return jnp.maximum(
            y[:, 0:cout] + jax.nn.sigmoid(y[:, cout:2 * cout]) + y[:, 2 * cout:3 * cout],
            0.0)

    def timeblock(x, cin_off, cin, b_row):
        # Per-tap accumulating matmuls on the stacked (T*n, Cin) layout
        # (row = t*n + node); no im2col scratch, no masked stores.
        t = x.shape[0] // n
        t_out = t - ks + 1
        y = bstk_ref[b_row:b_row + 1, :]                     # (1, 3*cout) f32
        for k in range(ks):
            w_k = wstk_ref[k, cin_off:cin_off + cin, :]      # (cin, 3*cout) bf16
            y = y + mm(x[k * n:(k + t_out) * n, :], w_k)
        return gate(y)                                       # (t_out*n, cout)

    def node_bn(x, eps=1e-5):
        # BatchNorm2d(num_nodes): per-node mean/var over (T, C), biased var,
        # gamma=1, beta=0 (training-mode batch stats).
        tn, c = x.shape
        t = tn // n
        x3 = x.reshape(t, n, c)
        s = jnp.sum(jnp.sum(x3, axis=2, keepdims=True), axis=0, keepdims=True)
        mean = s / float(t * c)
        d = x3 - mean
        v = jnp.sum(jnp.sum(d * d, axis=2, keepdims=True), axis=0, keepdims=True) / float(t * c)
        return (d * jax.lax.rsqrt(v + eps)).reshape(tn, c)

    # ---- STGCN block 1 ----
    t1 = gate(mm(x_ref[...], w11_ref[...]) + bstk_ref[0:1, :])            # (T1*n, 64)
    # Reassociated graph mix: relu(A_blk @ (t1 @ theta1)).
    t2 = jnp.maximum(mm(a1_ref[...], mm(t1, th_ref[0:cout, :])), 0.0)     # (T1*n, 16)
    o1 = node_bn(timeblock(t2, 0, 16, 1))                                 # (T2*n, 64)

    # ---- STGCN block 2 ----
    t1b = timeblock(o1, 16, 64, 2)                                        # (T3*n, 64)
    t2b = jnp.maximum(mm(a2_ref[...], mm(t1b, th_ref[cout:2 * cout, :])), 0.0)
    o2 = node_bn(timeblock(t2b, 80, 16, 3))                               # (T4*n, 64)

    # ---- last temporal conv + fully connected ----
    o3 = timeblock(o2, 96, 64, 4)                                         # (Tf*n, 64)
    tf = o3.shape[0] // n
    out = fb_ref[...]                                                     # (1, t_out)
    for t in range(tf):
        out = out + mm(o3[t * n:(t + 1) * n, :], fw_ref[t * cout:(t + 1) * cout, :])
    o_ref[...] = out


# ----------------------------------------------------------------------------
# Host-side packing + wrapper
# ----------------------------------------------------------------------------
def _pack_timeblock_gates_3d(tb_params):
    """Fuse the three gate convs into one (ks, cin, 3*cout) weight / (1, 3*cout) bias."""
    (w1, b1), (w2, b2), (w3, b3) = tb_params
    w = jnp.concatenate([w1, w2, w3], axis=2)
    b = jnp.concatenate([b1, b2, b3], axis=1)
    return w, b


def stgcn_forward(x_idx, a_hat, params):
    """x_idx: (N, T) int32 token indices; a_hat: (N, N). Returns (1, N, T_out)."""
    n, t_in = x_idx.shape
    ks, cout = 3, 64
    bf = jnp.bfloat16

    # Embedding lookup (data-dependent gather) + ReLU kept as plain-JAX glue.
    x = jnp.maximum(jnp.take(params["embedding"], x_idx, axis=0), 0.0)    # (n, t, e)
    e = x.shape[-1]
    # Stacked layout: row = t * n + node (nodes folded into the matmul M dim).
    x_stk = jnp.transpose(x, (1, 0, 2)).reshape(t_in * n, e)

    # Host-side im2col for the first (cin = e, tiny) timeblock -> one K=ks*e matmul.
    t1_steps = t_in - (ks - 1)
    x_im = jnp.concatenate(
        [x_stk[k * n:(k + t1_steps) * n, :] for k in range(ks)], axis=1).astype(bf)

    # Block-diagonal adjacency so graph mixing is one 2-D matmul in-kernel.
    # TODO(synk): switch to per-timestep (n,n) mixes when T*N grows (v7x VMEM).
    a1 = jnp.kron(jnp.eye(t_in - 2, dtype=jnp.float32), a_hat).astype(bf)
    a2 = jnp.kron(jnp.eye(t_in - 6, dtype=jnp.float32), a_hat).astype(bf)

    # Gate-fused weights. First timeblock uses the 2-D im2col layout; the four
    # remaining timeblocks are concatenated along cin into one (ks, 160, 192)
    # slab (row offsets: b1.temporal2 @ 0, b2.temporal1 @ 16, b2.temporal2 @ 80,
    # last_temporal @ 96) to cut the number of input DMAs.
    w11_3d, b11 = _pack_timeblock_gates_3d(params["block1"]["temporal1"])
    w12, b12 = _pack_timeblock_gates_3d(params["block1"]["temporal2"])
    w21, b21 = _pack_timeblock_gates_3d(params["block2"]["temporal1"])
    w22, b22 = _pack_timeblock_gates_3d(params["block2"]["temporal2"])
    wl, bl = _pack_timeblock_gates_3d(params["last_temporal"])

    cin0 = w11_3d.shape[1]
    w11 = w11_3d.reshape(ks * cin0, 3 * cout).astype(bf)                  # (ks*e, 192)
    wstk = jnp.concatenate([w12, w21, w22, wl], axis=1).astype(bf)        # (3, 160, 192)
    bstk = jnp.concatenate([b11, b12, b21, b22, bl], axis=0)              # (5, 192) f32
    thstk = jnp.concatenate([params["block1"]["theta"],
                             params["block2"]["theta"]], axis=0).astype(bf)  # (128, 16)
    fw = params["fully_w"].astype(bf)
    fb = params["fully_b"]
    t_out_steps = fw.shape[1]

    kernel = functools.partial(_stgcn_fused_kernel, n=n, ks=ks, cout=cout)
    out = pl.pallas_call(
        kernel,
        out_shape=jax.ShapeDtypeStruct((n, t_out_steps), jnp.float32),
        # Footprint is ~1 MiB; 8 MiB keeps ample headroom on v7x's 64 MiB VMEM.
        compiler_params=pltpu.CompilerParams(vmem_limit_bytes=8 * 1024 * 1024),
    )(x_im, a1, a2, w11, wstk, bstk, thstk, fw, fb)
    # TODO(synk): add a leading "parallel" batch grid axis to use both v7x
    # TensorCores when batch_size > 1 (this module fixes batch = 1).
    return out[None]                                                      # add batch dim


# ----------------------------------------------------------------------------
# Pure-JAX reference (mirrors the PyTorch forward exactly, f32)
# ----------------------------------------------------------------------------
def _ref_timeblock(x, params):
    (w1, b1), (w2, b2), (w3, b3) = params
    ks = w1.shape[0]
    tout = x.shape[1] - ks + 1

    def conv(w, b):
        acc = sum(jnp.einsum("ntc,co->nto", x[:, k:k + tout, :], w[k]) for k in range(ks))
        return acc + b[None]

    return jnp.maximum(conv(w1, b1) + jax.nn.sigmoid(conv(w2, b2)) + conv(w3, b3), 0.0)


def _ref_block(x, a, p):
    t1 = _ref_timeblock(x, p["temporal1"])
    lfs = jnp.einsum("ij,jtc->itc", a, t1)
    t2 = jnp.maximum(jnp.einsum("itc,cs->its", lfs, p["theta"]), 0.0)
    t3 = _ref_timeblock(t2, p["temporal2"])
    mean = t3.mean(axis=(1, 2), keepdims=True)
    var = ((t3 - mean) ** 2).mean(axis=(1, 2), keepdims=True)
    return (t3 - mean) / jnp.sqrt(var + 1e-5)


def _ref_forward(x_idx, a, p):
    x = jnp.maximum(p["embedding"][x_idx], 0.0)
    o1 = _ref_block(x, a, p["block1"])
    o2 = _ref_block(o1, a, p["block2"])
    o3 = _ref_timeblock(o2, p["last_temporal"])
    flat = o3.reshape(o3.shape[0], -1)
    return (flat @ p["fully_w"] + p["fully_b"])[None]


# ----------------------------------------------------------------------------
# Deterministic parameter initialization
# ----------------------------------------------------------------------------
def _init_timeblock(key, cin, cout, ks=3):
    keys = jax.random.split(key, 6)
    bound = 1.0 / math.sqrt(cin * ks)
    out = []
    for i in range(3):
        w = jax.random.uniform(keys[2 * i], (ks, cin, cout), jnp.float32, -bound, bound)
        b = jax.random.uniform(keys[2 * i + 1], (1, cout), jnp.float32, -bound, bound)
        out.append((w, b))
    return tuple(out)


def _init_block(key, cin, spatial, cout):
    k1, k2, k3 = jax.random.split(key, 3)
    stdv = 1.0 / math.sqrt(spatial)
    return {
        "temporal1": _init_timeblock(k1, cin, cout),
        "theta": jax.random.uniform(k2, (cout, spatial), jnp.float32, -stdv, stdv),
        "temporal2": _init_timeblock(k3, spatial, cout),
    }


def init_params(key, num_features, t_in, t_out, emb_dim, emb_num):
    k_emb, k_b1, k_b2, k_last, k_fw, k_fb = jax.random.split(key, 6)
    emb = jax.random.normal(k_emb, (emb_num + 1, emb_dim), jnp.float32)
    emb = emb.at[0].set(0.0)  # padding_idx = 0
    in_f = (t_in - 2 * 5) * 64
    bound = 1.0 / math.sqrt(in_f)
    return {
        "embedding": emb,
        "block1": _init_block(k_b1, num_features, 16, 64),
        "block2": _init_block(k_b2, 64, 16, 64),
        "last_temporal": _init_timeblock(k_last, 64, 64),
        "fully_w": jax.random.uniform(k_fw, (in_f, t_out), jnp.float32, -bound, bound),
        "fully_b": jax.random.uniform(k_fb, (1, t_out), jnp.float32, -bound, bound),
    }


# ----------------------------------------------------------------------------
if __name__ == "__main__":
    num_nodes = 8
    emb_dim = 4            # == num_features
    emb_num = 10
    t_in = 12              # must be > 2*5 for the final Linear
    t_out = 3

    key = jax.random.PRNGKey(0)
    k_p, k_x, k_a = jax.random.split(key, 3)

    params = init_params(k_p, emb_dim, t_in, t_out, emb_dim, emb_num)

    # Integer token input (N, T) and a row-normalized adjacency (N, N).
    x_idx = jax.random.randint(k_x, (num_nodes, t_in), 0, emb_num + 1, dtype=jnp.int32)
    a_raw = jax.random.uniform(k_a, (num_nodes, num_nodes), jnp.float32)
    a_hat = a_raw / jnp.sum(a_raw, axis=1, keepdims=True)

    out = jax.jit(stgcn_forward)(x_idx, a_hat, params)
    out = jax.block_until_ready(out)
    assert out.shape == (1, num_nodes, t_out), out.shape

    with jax.default_matmul_precision("highest"):
        ref = jax.block_until_ready(_ref_forward(x_idx, a_hat, params))

    # bf16 MXU operands + reassociated graph mix add ~1e-2-level rounding vs
    # the all-f32 reference.
    err = float(jnp.max(jnp.abs(out - ref)))
    assert err < 1e-1, f"mismatch vs reference, max abs err = {err}"

    print("KERNEL_OK")
</pallas_src>

<mosaic_0001>
module attributes {stable_mosaic.version = 11 : i64} {
  func.func @_stgcn_fused_kernel(%arg0: memref<80x12xbf16, #tpu.memory_space<vmem>>, %arg1: memref<80x80xbf16, #tpu.memory_space<vmem>>, %arg2: memref<48x48xbf16, #tpu.memory_space<vmem>>, %arg3: memref<12x192xbf16, #tpu.memory_space<vmem>>, %arg4: memref<3x160x192xbf16, #tpu.memory_space<vmem>>, %arg5: memref<5x192xf32, #tpu.memory_space<vmem>>, %arg6: memref<128x16xbf16, #tpu.memory_space<vmem>>, %arg7: memref<128x3xbf16, #tpu.memory_space<vmem>>, %arg8: memref<1x3xf32, #tpu.memory_space<vmem>>, %arg9: memref<8x3xf32, #tpu.memory_space<vmem>>) attributes {dimension_semantics = [], scalar_prefetch = 0 : i64, scratch_operands = 0 : i64, tpu.core_type = #tpu.core_type<tc>} {
    %c0 = arith.constant 0 : index
    %c0_0 = arith.constant 0 : index
    %0 = vector.load %arg0[%c0, %c0_0] : memref<80x12xbf16, #tpu.memory_space<vmem>>, vector<80x12xbf16>
    %c0_1 = arith.constant 0 : index
    %c0_2 = arith.constant 0 : index
    %1 = vector.load %arg3[%c0_1, %c0_2] : memref<12x192xbf16, #tpu.memory_space<vmem>>, vector<12x192xbf16>
    %cst = arith.constant dense<0.000000e+00> : vector<80x192xf32>
    %2 = tpu.matmul %0, %1, %cst {dimension_numbers = #tpu.dot_dimension_numbers<[1], [0], [0], [1], [0, 0, 1, 1], [], []>} : vector<80x12xbf16>, vector<12x192xbf16>, vector<80x192xf32> -> vector<80x192xf32>
    %c0_3 = arith.constant 0 : index
    %c0_4 = arith.constant 0 : index
    %3 = vector.load %arg5[%c0_3, %c0_4] : memref<5x192xf32, #tpu.memory_space<vmem>>, vector<1x192xf32>
    %4 = vector.broadcast %3 : vector<1x192xf32> to vector<80x192xf32>
    %5 = arith.addf %2, %4 : vector<80x192xf32>
    %6 = vector.extract_strided_slice %5 {offsets = [0, 0], sizes = [80, 64], strides = [1, 1]} : vector<80x192xf32> to vector<80x64xf32>
    %7 = vector.extract_strided_slice %5 {offsets = [0, 64], sizes = [80, 64], strides = [1, 1]} : vector<80x192xf32> to vector<80x64xf32>
    %8 = arith.negf %7 : vector<80x64xf32>
    %9 = math.exp %8 : vector<80x64xf32>
    %cst_5 = arith.constant 1.000000e+00 : f32
    %10 = vector.broadcast %cst_5 : f32 to vector<80x64xf32>
    %11 = arith.addf %10, %9 : vector<80x64xf32>
    %12 = arith.divf %10, %11 : vector<80x64xf32>
    %13 = arith.addf %6, %12 : vector<80x64xf32>
    %14 = vector.extract_strided_slice %5 {offsets = [0, 128], sizes = [80, 64], strides = [1, 1]} : vector<80x192xf32> to vector<80x64xf32>
    %15 = arith.addf %13, %14 : vector<80x64xf32>
    %cst_6 = arith.constant 0.000000e+00 : f32
    %16 = vector.broadcast %cst_6 : f32 to vector<80x64xf32>
    %17 = arith.maximumf %15, %16 : vector<80x64xf32>
    %c0_7 = arith.constant 0 : index
    %c0_8 = arith.constant 0 : index
    %18 = vector.load %arg1[%c0_7, %c0_8] : memref<80x80xbf16, #tpu.memory_space<vmem>>, vector<80x80xbf16>
    %c0_9 = arith.constant 0 : index
    %c0_10 = arith.constant 0 : index
    %19 = vector.load %arg6[%c0_9, %c0_10] : memref<128x16xbf16, #tpu.memory_space<vmem>>, vector<64x16xbf16>
    %20 = arith.truncf %17 : vector<80x64xf32> to vector<80x64xbf16>
    %cst_11 = arith.constant dense<0.000000e+00> : vector<80x16xf32>
    %21 = tpu.matmul %20, %19, %cst_11 {dimension_numbers = #tpu.dot_dimension_numbers<[1], [0], [0], [1], [0, 0, 1, 1], [], []>} : vector<80x64xbf16>, vector<64x16xbf16>, vector<80x16xf32> -> vector<80x16xf32>
    %22 = arith.truncf %21 : vector<80x16xf32> to vector<80x16xbf16>
    %cst_12 = arith.constant dense<0.000000e+00> : vector<80x16xf32>
    %23 = tpu.matmul %18, %22, %cst_12 {dimension_numbers = #tpu.dot_dimension_numbers<[1], [0], [0], [1], [0, 0, 1, 1], [], []>} : vector<80x80xbf16>, vector<80x16xbf16>, vector<80x16xf32> -> vector<80x16xf32>
    %cst_13 = arith.constant 0.000000e+00 : f32
    %24 = vector.broadcast %cst_13 : f32 to vector<80x16xf32>
    %25 = arith.maximumf %23, %24 : vector<80x16xf32>
    %c1 = arith.constant 1 : index
    %c0_14 = arith.constant 0 : index
    %26 = vector.load %arg5[%c1, %c0_14] : memref<5x192xf32, #tpu.memory_space<vmem>>, vector<1x192xf32>
    %c0_15 = arith.constant 0 : index
    %c0_16 = arith.constant 0 : index
    %c0_17 = arith.constant 0 : index
    %27 = vector.load %arg4[%c0_15, %c0_16, %c0_17] : memref<3x160x192xbf16, #tpu.memory_space<vmem>>, vector<1x16x192xbf16>
    %28 = vector.shape_cast %27 : vector<1x16x192xbf16> to vector<16x192xbf16>
    %29 = vector.extract_strided_slice %25 {offsets = [0, 0], sizes = [64, 16], strides = [1, 1]} : vector<80x16xf32> to vector<64x16xf32>
    %30 = arith.truncf %29 : vector<64x16xf32> to vector<64x16xbf16>
    %cst_18 = arith.constant dense<0.000000e+00> : vector<64x192xf32>
    %31 = tpu.matmul %30, %28, %cst_18 {dimension_numbers = #tpu.dot_dimension_numbers<[1], [0], [0], [1], [0, 0, 1, 1], [], []>} : vector<64x16xbf16>, vector<16x192xbf16>, vector<64x192xf32> -> vector<64x192xf32>
    %32 = vector.broadcast %26 : vector<1x192xf32> to vector<64x192xf32>
    %33 = arith.addf %32, %31 : vector<64x192xf32>
    %c1_19 = arith.constant 1 : index
    %c0_20 = arith.constant 0 : index
    %c0_21 = arith.constant 0 : index
    %34 = vector.load %arg4[%c1_19, %c0_20, %c0_21] : memref<3x160x192xbf16, #tpu.memory_space<vmem>>, vector<1x16x192xbf16>
    %35 = vector.shape_cast %34 : vector<1x16x192xbf16> to vector<16x192xbf16>
    %36 = vector.extract_strided_slice %25 {offsets = [8, 0], sizes = [64, 16], strides = [1, 1]} : vector<80x16xf32> to vector<64x16xf32>
    %37 = arith.truncf %36 : vector<64x16xf32> to vector<64x16xbf16>
    %cst_22 = arith.constant dense<0.000000e+00> : vector<64x192xf32>
    %38 = tpu.matmul %37, %35, %cst_22 {dimension_numbers = #tpu.dot_dimension_numbers<[1], [0], [0], [1], [0, 0, 1, 1], [], []>} : vector<64x16xbf16>, vector<16x192xbf16>, vector<64x192xf32> -> vector<64x192xf32>
    %39 = arith.addf %33, %38 : vector<64x192xf32>
    %c2 = arith.constant 2 : index
    %c0_23 = arith.constant 0 : index
    %c0_24 = arith.constant 0 : index
    %40 = vector.load %arg4[%c2, %c0_23, %c0_24] : memref<3x160x192xbf16, #tpu.memory_space<vmem>>, vector<1x16x192xbf16>
    %41 = vector.shape_cast %40 : vector<1x16x192xbf16> to vector<16x192xbf16>
    %42 = vector.extract_strided_slice %25 {offsets = [16, 0], sizes = [64, 16], strides = [1, 1]} : vector<80x16xf32> to vector<64x16xf32>
    %43 = arith.truncf %42 : vector<64x16xf32> to vector<64x16xbf16>
    %cst_25 = arith.constant dense<0.000000e+00> : vector<64x192xf32>
    %44 = tpu.matmul %43, %41, %cst_25 {dimension_numbers = #tpu.dot_dimension_numbers<[1], [0], [0], [1], [0, 0, 1, 1], [], []>} : vector<64x16xbf16>, vector<16x192xbf16>, vector<64x192xf32> -> vector<64x192xf32>
    %45 = arith.addf %39, %44 : vector<64x192xf32>
    %46 = vector.extract_strided_slice %45 {offsets = [0, 0], sizes = [64, 64], strides = [1, 1]} : vector<64x192xf32> to vector<64x64xf32>
    %47 = vector.extract_strided_slice %45 {offsets = [0, 64], sizes = [64, 64], strides = [1, 1]} : vector<64x192xf32> to vector<64x64xf32>
    %48 = arith.negf %47 : vector<64x64xf32>
    %49 = math.exp %48 : vector<64x64xf32>
    %cst_26 = arith.constant 1.000000e+00 : f32
    %50 = vector.broadcast %cst_26 : f32 to vector<64x64xf32>
    %51 = arith.addf %50, %49 : vector<64x64xf32>
    %52 = arith.divf %50, %51 : vector<64x64xf32>
    %53 = arith.addf %46, %52 : vector<64x64xf32>
    %54 = vector.extract_strided_slice %45 {offsets = [0, 128], sizes = [64, 64], strides = [1, 1]} : vector<64x192xf32> to vector<64x64xf32>
    %55 = arith.addf %53, %54 : vector<64x64xf32>
    %cst_27 = arith.constant 0.000000e+00 : f32
    %56 = vector.broadcast %cst_27 : f32 to vector<64x64xf32>
    %57 = arith.maximumf %55, %56 : vector<64x64xf32>
    %58 = vector.shape_cast %57 : vector<64x64xf32> to vector<8x8x64xf32>
    %cst_28 = arith.constant dense<0.000000e+00> : vector<8x8xf32>
    %59 = vector.multi_reduction <add>, %58, %cst_28 [2] : vector<8x8x64xf32> to vector<8x8xf32>
    %60 = vector.shape_cast %59 : vector<8x8xf32> to vector<8x8x1xf32>
    %cst_29 = arith.constant dense<0.000000e+00> : vector<8x1xf32>
    %61 = vector.multi_reduction <add>, %60, %cst_29 [0] : vector<8x8x1xf32> to vector<8x1xf32>
    %62 = vector.shape_cast %61 : vector<8x1xf32> to vector<1x8x1xf32>
    %cst_30 = arith.constant 5.120000e+02 : f32
    %63 = vector.broadcast %cst_30 : f32 to vector<1x8x1xf32>
    %64 = arith.divf %62, %63 : vector<1x8x1xf32>
    %65 = vector.broadcast %64 : vector<1x8x1xf32> to vector<8x8x64xf32>
    %66 = arith.subf %58, %65 : vector<8x8x64xf32>
    %67 = arith.mulf %66, %66 : vector<8x8x64xf32>
    %cst_31 = arith.constant dense<0.000000e+00> : vector<8x8xf32>
    %68 = vector.multi_reduction <add>, %67, %cst_31 [2] : vector<8x8x64xf32> to vector<8x8xf32>
    %69 = vector.shape_cast %68 : vector<8x8xf32> to vector<8x8x1xf32>
    %cst_32 = arith.constant dense<0.000000e+00> : vector<8x1xf32>
    %70 = vector.multi_reduction <add>, %69, %cst_32 [0] : vector<8x8x1xf32> to vector<8x1xf32>
    %71 = vector.shape_cast %70 : vector<8x1xf32> to vector<1x8x1xf32>
    %cst_33 = arith.constant 5.120000e+02 : f32
    %72 = vector.broadcast %cst_33 : f32 to vector<1x8x1xf32>
    %73 = arith.divf %71, %72 : vector<1x8x1xf32>
    %cst_34 = arith.constant 9.99999974E-6 : f32
    %74 = vector.broadcast %cst_34 : f32 to vector<1x8x1xf32>
    %75 = arith.addf %73, %74 : vector<1x8x1xf32>
    %76 = math.rsqrt %75 : vector<1x8x1xf32>
    %77 = vector.broadcast %76 : vector<1x8x1xf32> to vector<8x8x64xf32>
    %78 = arith.mulf %66, %77 : vector<8x8x64xf32>
    %79 = vector.shape_cast %78 : vector<8x8x64xf32> to vector<64x64xf32>
    %c2_35 = arith.constant 2 : index
    %c0_36 = arith.constant 0 : index
    %80 = vector.load %arg5[%c2_35, %c0_36] : memref<5x192xf32, #tpu.memory_space<vmem>>, vector<1x192xf32>
    %c0_37 = arith.constant 0 : index
    %c16 = arith.constant 16 : index
    %c0_38 = arith.constant 0 : index
    %81 = vector.load %arg4[%c0_37, %c16, %c0_38] : memref<3x160x192xbf16, #tpu.memory_space<vmem>>, vector<1x64x192xbf16>
    %82 = vector.shape_cast %81 : vector<1x64x192xbf16> to vector<64x192xbf16>
    %83 = vector.extract_strided_slice %79 {offsets = [0, 0], sizes = [48, 64], strides = [1, 1]} : vector<64x64xf32> to vector<48x64xf32>
    %84 = arith.truncf %83 : vector<48x64xf32> to vector<48x64xbf16>
    %cst_39 = arith.constant dense<0.000000e+00> : vector<48x192xf32>
    %85 = tpu.matmul %84, %82, %cst_39 {dimension_numbers = #tpu.dot_dimension_numbers<[1], [0], [0], [1], [0, 0, 1, 1], [], []>} : vector<48x64xbf16>, vector<64x192xbf16>, vector<48x192xf32> -> vector<48x192xf32>
    %86 = vector.broadcast %80 : vector<1x192xf32> to vector<48x192xf32>
    %87 = arith.addf %86, %85 : vector<48x192xf32>
    %c1_40 = arith.constant 1 : index
    %c16_41 = arith.constant 16 : index
    %c0_42 = arith.constant 0 : index
    %88 = vector.load %arg4[%c1_40, %c16_41, %c0_42] : memref<3x160x192xbf16, #tpu.memory_space<vmem>>, vector<1x64x192xbf16>
    %89 = vector.shape_cast %88 : vector<1x64x192xbf16> to vector<64x192xbf16>
    %90 = vector.extract_strided_slice %79 {offsets = [8, 0], sizes = [48, 64], strides = [1, 1]} : vector<64x64xf32> to vector<48x64xf32>
    %91 = arith.truncf %90 : vector<48x64xf32> to vector<48x64xbf16>
    %cst_43 = arith.constant dense<0.000000e+00> : vector<48x192xf32>
    %92 = tpu.matmul %91, %89, %cst_43 {dimension_numbers = #tpu.dot_dimension_numbers<[1], [0], [0], [1], [0, 0, 1, 1], [], []>} : vector<48x64xbf16>, vector<64x192xbf16>, vector<48x192xf32> -> vector<48x192xf32>
    %93 = arith.addf %87, %92 : vector<48x192xf32>
    %c2_44 = arith.constant 2 : index
    %c16_45 = arith.constant 16 : index
    %c0_46 = arith.constant 0 : index
    %94 = vector.load %arg4[%c2_44, %c16_45, %c0_46] : memref<3x160x192xbf16, #tpu.memory_space<vmem>>, vector<1x64x192xbf16>
    %95 = vector.shape_cast %94 : vector<1x64x192xbf16> to vector<64x192xbf16>
    %96 = vector.extract_strided_slice %79 {offsets = [16, 0], sizes = [48, 64], strides = [1, 1]} : vector<64x64xf32> to vector<48x64xf32>
    %97 = arith.truncf %96 : vector<48x64xf32> to vector<48x64xbf16>
    %cst_47 = arith.constant dense<0.000000e+00> : vector<48x192xf32>
    %98 = tpu.matmul %97, %95, %cst_47 {dimension_numbers = #tpu.dot_dimension_numbers<[1], [0], [0], [1], [0, 0, 1, 1], [], []>} : vector<48x64xbf16>, vector<64x192xbf16>, vector<48x192xf32> -> vector<48x192xf32>
    %99 = arith.addf %93, %98 : vector<48x192xf32>
    %100 = vector.extract_strided_slice %99 {offsets = [0, 0], sizes = [48, 64], strides = [1, 1]} : vector<48x192xf32> to vector<48x64xf32>
    %101 = vector.extract_strided_slice %99 {offsets = [0, 64], sizes = [48, 64], strides = [1, 1]} : vector<48x192xf32> to vector<48x64xf32>
    %102 = arith.negf %101 : vector<48x64xf32>
    %103 = math.exp %102 : vector<48x64xf32>
    %cst_48 = arith.constant 1.000000e+00 : f32
    %104 = vector.broadcast %cst_48 : f32 to vector<48x64xf32>
    %105 = arith.addf %104, %103 : vector<48x64xf32>
    %106 = arith.divf %104, %105 : vector<48x64xf32>
    %107 = arith.addf %100, %106 : vector<48x64xf32>
    %108 = vector.extract_strided_slice %99 {offsets = [0, 128], sizes = [48, 64], strides = [1, 1]} : vector<48x192xf32> to vector<48x64xf32>
    %109 = arith.addf %107, %108 : vector<48x64xf32>
    %cst_49 = arith.constant 0.000000e+00 : f32
    %110 = vector.broadcast %cst_49 : f32 to vector<48x64xf32>
    %111 = arith.maximumf %109, %110 : vector<48x64xf32>
    %c0_50 = arith.constant 0 : index
    %c0_51 = arith.constant 0 : index
    %112 = vector.load %arg2[%c0_50, %c0_51] : memref<48x48xbf16, #tpu.memory_space<vmem>>, vector<48x48xbf16>
    %c64 = arith.constant 64 : index
    %c0_52 = arith.constant 0 : index
    %113 = vector.load %arg6[%c64, %c0_52] : memref<128x16xbf16, #tpu.memory_space<vmem>>, vector<64x16xbf16>
    %114 = arith.truncf %111 : vector<48x64xf32> to vector<48x64xbf16>
    %cst_53 = arith.constant dense<0.000000e+00> : vector<48x16xf32>
    %115 = tpu.matmul %114, %113, %cst_53 {dimension_numbers = #tpu.dot_dimension_numbers<[1], [0], [0], [1], [0, 0, 1, 1], [], []>} : vector<48x64xbf16>, vector<64x16xbf16>, vector<48x16xf32> -> vector<48x16xf32>
    %116 = arith.truncf %115 : vector<48x16xf32> to vector<48x16xbf16>
    %cst_54 = arith.constant dense<0.000000e+00> : vector<48x16xf32>
    %117 = tpu.matmul %112, %116, %cst_54 {dimension_numbers = #tpu.dot_dimension_numbers<[1], [0], [0], [1], [0, 0, 1, 1], [], []>} : vector<48x48xbf16>, vector<48x16xbf16>, vector<48x16xf32> -> vector<48x16xf32>
    %cst_55 = arith.constant 0.000000e+00 : f32
    %118 = vector.broadcast %cst_55 : f32 to vector<48x16xf32>
    %119 = arith.maximumf %117, %118 : vector<48x16xf32>
    %c3 = arith.constant 3 : index
    %c0_56 = arith.constant 0 : index
    %120 = vector.load %arg5[%c3, %c0_56] : memref<5x192xf32, #tpu.memory_space<vmem>>, vector<1x192xf32>
    %c0_57 = arith.constant 0 : index
    %c80 = arith.constant 80 : index
    %c0_58 = arith.constant 0 : index
    %121 = vector.load %arg4[%c0_57, %c80, %c0_58] : memref<3x160x192xbf16, #tpu.memory_space<vmem>>, vector<1x16x192xbf16>
    %122 = vector.shape_cast %121 : vector<1x16x192xbf16> to vector<16x192xbf16>
    %123 = vector.extract_strided_slice %119 {offsets = [0, 0], sizes = [32, 16], strides = [1, 1]} : vector<48x16xf32> to vector<32x16xf32>
    %124 = arith.truncf %123 : vector<32x16xf32> to vector<32x16xbf16>
    %cst_59 = arith.constant dense<0.000000e+00> : vector<32x192xf32>
    %125 = tpu.matmul %124, %122, %cst_59 {dimension_numbers = #tpu.dot_dimension_numbers<[1], [0], [0], [1], [0, 0, 1, 1], [], []>} : vector<32x16xbf16>, vector<16x192xbf16>, vector<32x192xf32> -> vector<32x192xf32>
    %126 = vector.broadcast %120 : vector<1x192xf32> to vector<32x192xf32>
    %127 = arith.addf %126, %125 : vector<32x192xf32>
    %c1_60 = arith.constant 1 : index
    %c80_61 = arith.constant 80 : index
    %c0_62 = arith.constant 0 : index
    %128 = vector.load %arg4[%c1_60, %c80_61, %c0_62] : memref<3x160x192xbf16, #tpu.memory_space<vmem>>, vector<1x16x192xbf16>
    %129 = vector.shape_cast %128 : vector<1x16x192xbf16> to vector<16x192xbf16>
    %130 = vector.extract_strided_slice %119 {offsets = [8, 0], sizes = [32, 16], strides = [1, 1]} : vector<48x16xf32> to vector<32x16xf32>
    %131 = arith.truncf %130 : vector<32x16xf32> to vector<32x16xbf16>
    %cst_63 = arith.constant dense<0.000000e+00> : vector<32x192xf32>
    %132 = tpu.matmul %131, %129, %cst_63 {dimension_numbers = #tpu.dot_dimension_numbers<[1], [0], [0], [1], [0, 0, 1, 1], [], []>} : vector<32x16xbf16>, vector<16x192xbf16>, vector<32x192xf32> -> vector<32x192xf32>
    %133 = arith.addf %127, %132 : vector<32x192xf32>
    %c2_64 = arith.constant 2 : index
    %c80_65 = arith.constant 80 : index
    %c0_66 = arith.constant 0 : index
    %134 = vector.load %arg4[%c2_64, %c80_65, %c0_66] : memref<3x160x192xbf16, #tpu.memory_space<vmem>>, vector<1x16x192xbf16>
    %135 = vector.shape_cast %134 : vector<1x16x192xbf16> to vector<16x192xbf16>
    %136 = vector.extract_strided_slice %119 {offsets = [16, 0], sizes = [32, 16], strides = [1, 1]} : vector<48x16xf32> to vector<32x16xf32>
    %137 = arith.truncf %136 : vector<32x16xf32> to vector<32x16xbf16>
    %cst_67 = arith.constant dense<0.000000e+00> : vector<32x192xf32>
    %138 = tpu.matmul %137, %135, %cst_67 {dimension_numbers = #tpu.dot_dimension_numbers<[1], [0], [0], [1], [0, 0, 1, 1], [], []>} : vector<32x16xbf16>, vector<16x192xbf16>, vector<32x192xf32> -> vector<32x192xf32>
    %139 = arith.addf %133, %138 : vector<32x192xf32>
    %140 = vector.extract_strided_slice %139 {offsets = [0, 0], sizes = [32, 64], strides = [1, 1]} : vector<32x192xf32> to vector<32x64xf32>
    %141 = vector.extract_strided_slice %139 {offsets = [0, 64], sizes = [32, 64], strides = [1, 1]} : vector<32x192xf32> to vector<32x64xf32>
    %142 = arith.negf %141 : vector<32x64xf32>
    %143 = math.exp %142 : vector<32x64xf32>
    %cst_68 = arith.constant 1.000000e+00 : f32
    %144 = vector.broadcast %cst_68 : f32 to vector<32x64xf32>
    %145 = arith.addf %144, %143 : vector<32x64xf32>
    %146 = arith.divf %144, %145 : vector<32x64xf32>
    %147 = arith.addf %140, %146 : vector<32x64xf32>
    %148 = vector.extract_strided_slice %139 {offsets = [0, 128], sizes = [32, 64], strides = [1, 1]} : vector<32x192xf32> to vector<32x64xf32>
    %149 = arith.addf %147, %148 : vector<32x64xf32>
    %cst_69 = arith.constant 0.000000e+00 : f32
    %150 = vector.broadcast %cst_69 : f32 to vector<32x64xf32>
    %151 = arith.maximumf %149, %150 : vector<32x64xf32>
    %152 = vector.shape_cast %151 : vector<32x64xf32> to vector<4x8x64xf32>
    %cst_70 = arith.constant dense<0.000000e+00> : vector<4x8xf32>
    %153 = vector.multi_reduction <add>, %152, %cst_70 [2] : vector<4x8x64xf32> to vector<4x8xf32>
    %154 = vector.shape_cast %153 : vector<4x8xf32> to vector<4x8x1xf32>
    %cst_71 = arith.constant dense<0.000000e+00> : vector<8x1xf32>
    %155 = vector.multi_reduction <add>, %154, %cst_71 [0] : vector<4x8x1xf32> to vector<8x1xf32>
    %156 = vector.shape_cast %155 : vector<8x1xf32> to vector<1x8x1xf32>
    %cst_72 = arith.constant 2.560000e+02 : f32
    %157 = vector.broadcast %cst_72 : f32 to vector<1x8x1xf32>
    %158 = arith.divf %156, %157 : vector<1x8x1xf32>
    %159 = vector.broadcast %158 : vector<1x8x1xf32> to vector<4x8x64xf32>
    %160 = arith.subf %152, %159 : vector<4x8x64xf32>
    %161 = arith.mulf %160, %160 : vector<4x8x64xf32>
    %cst_73 = arith.constant dense<0.000000e+00> : vector<4x8xf32>
    %162 = vector.multi_reduction <add>, %161, %cst_73 [2] : vector<4x8x64xf32> to vector<4x8xf32>
    %163 = vector.shape_cast %162 : vector<4x8xf32> to vector<4x8x1xf32>
    %cst_74 = arith.constant dense<0.000000e+00> : vector<8x1xf32>
    %164 = vector.multi_reduction <add>, %163, %cst_74 [0] : vector<4x8x1xf32> to vector<8x1xf32>
    %165 = vector.shape_cast %164 : vector<8x1xf32> to vector<1x8x1xf32>
    %cst_75 = arith.constant 2.560000e+02 : f32
    %166 = vector.broadcast %cst_75 : f32 to vector<1x8x1xf32>
    %167 = arith.divf %165, %166 : vector<1x8x1xf32>
    %cst_76 = arith.constant 9.99999974E-6 : f32
    %168 = vector.broadcast %cst_76 : f32 to vector<1x8x1xf32>
    %169 = arith.addf %167, %168 : vector<1x8x1xf32>
    %170 = math.rsqrt %169 : vector<1x8x1xf32>
    %171 = vector.broadcast %170 : vector<1x8x1xf32> to vector<4x8x64xf32>
    %172 = arith.mulf %160, %171 : vector<4x8x64xf32>
    %173 = vector.shape_cast %172 : vector<4x8x64xf32> to vector<32x64xf32>
    %c4 = arith.constant 4 : index
    %c0_77 = arith.constant 0 : index
    %174 = vector.load %arg5[%c4, %c0_77] : memref<5x192xf32, #tpu.memory_space<vmem>>, vector<1x192xf32>
    %c0_78 = arith.constant 0 : index
    %c96 = arith.constant 96 : index
    %c0_79 = arith.constant 0 : index
    %175 = vector.load %arg4[%c0_78, %c96, %c0_79] : memref<3x160x192xbf16, #tpu.memory_space<vmem>>, vector<1x64x192xbf16>
    %176 = vector.shape_cast %175 : vector<1x64x192xbf16> to vector<64x192xbf16>
    %177 = vector.extract_strided_slice %173 {offsets = [0, 0], sizes = [16, 64], strides = [1, 1]} : vector<32x64xf32> to vector<16x64xf32>
    %178 = arith.truncf %177 : vector<16x64xf32> to vector<16x64xbf16>
    %cst_80 = arith.constant dense<0.000000e+00> : vector<16x192xf32>
    %179 = tpu.matmul %178, %176, %cst_80 {dimension_numbers = #tpu.dot_dimension_numbers<[1], [0], [0], [1], [0, 0, 1, 1], [], []>} : vector<16x64xbf16>, vector<64x192xbf16>, vector<16x192xf32> -> vector<16x192xf32>
    %180 = vector.broadcast %174 : vector<1x192xf32> to vector<16x192xf32>
    %181 = arith.addf %180, %179 : vector<16x192xf32>
    %c1_81 = arith.constant 1 : index
    %c96_82 = arith.constant 96 : index
    %c0_83 = arith.constant 0 : index
    %182 = vector.load %arg4[%c1_81, %c96_82, %c0_83] : memref<3x160x192xbf16, #tpu.memory_space<vmem>>, vector<1x64x192xbf16>
    %183 = vector.shape_cast %182 : vector<1x64x192xbf16> to vector<64x192xbf16>
    %184 = vector.extract_strided_slice %173 {offsets = [8, 0], sizes = [16, 64], strides = [1, 1]} : vector<32x64xf32> to vector<16x64xf32>
    %185 = arith.truncf %184 : vector<16x64xf32> to vector<16x64xbf16>
    %cst_84 = arith.constant dense<0.000000e+00> : vector<16x192xf32>
    %186 = tpu.matmul %185, %183, %cst_84 {dimension_numbers = #tpu.dot_dimension_numbers<[1], [0], [0], [1], [0, 0, 1, 1], [], []>} : vector<16x64xbf16>, vector<64x192xbf16>, vector<16x192xf32> -> vector<16x192xf32>
    %187 = arith.addf %181, %186 : vector<16x192xf32>
    %c2_85 = arith.constant 2 : index
    %c96_86 = arith.constant 96 : index
    %c0_87 = arith.constant 0 : index
    %188 = vector.load %arg4[%c2_85, %c96_86, %c0_87] : memref<3x160x192xbf16, #tpu.memory_space<vmem>>, vector<1x64x192xbf16>
    %189 = vector.shape_cast %188 : vector<1x64x192xbf16> to vector<64x192xbf16>
    %190 = vector.extract_strided_slice %173 {offsets = [16, 0], sizes = [16, 64], strides = [1, 1]} : vector<32x64xf32> to vector<16x64xf32>
    %191 = arith.truncf %190 : vector<16x64xf32> to vector<16x64xbf16>
    %cst_88 = arith.constant dense<0.000000e+00> : vector<16x192xf32>
    %192 = tpu.matmul %191, %189, %cst_88 {dimension_numbers = #tpu.dot_dimension_numbers<[1], [0], [0], [1], [0, 0, 1, 1], [], []>} : vector<16x64xbf16>, vector<64x192xbf16>, vector<16x192xf32> -> vector<16x192xf32>
    %193 = arith.addf %187, %192 : vector<16x192xf32>
    %194 = vector.extract_strided_slice %193 {offsets = [0, 0], sizes = [16, 64], strides = [1, 1]} : vector<16x192xf32> to vector<16x64xf32>
    %195 = vector.extract_strided_slice %193 {offsets = [0, 64], sizes = [16, 64], strides = [1, 1]} : vector<16x192xf32> to vector<16x64xf32>
    %196 = arith.negf %195 : vector<16x64xf32>
    %197 = math.exp %196 : vector<16x64xf32>
    %cst_89 = arith.constant 1.000000e+00 : f32
    %198 = vector.broadcast %cst_89 : f32 to vector<16x64xf32>
    %199 = arith.addf %198, %197 : vector<16x64xf32>
    %200 = arith.divf %198, %199 : vector<16x64xf32>
    %201 = arith.addf %194, %200 : vector<16x64xf32>
    %202 = vector.extract_strided_slice %193 {offsets = [0, 128], sizes = [16, 64], strides = [1, 1]} : vector<16x192xf32> to vector<16x64xf32>
    %203 = arith.addf %201, %202 : vector<16x64xf32>
    %cst_90 = arith.constant 0.000000e+00 : f32
    %204 = vector.broadcast %cst_90 : f32 to vector<16x64xf32>
    %205 = arith.maximumf %203, %204 : vector<16x64xf32>
    %c0_91 = arith.constant 0 : index
    %c0_92 = arith.constant 0 : index
    %206 = vector.load %arg8[%c0_91, %c0_92] : memref<1x3xf32, #tpu.memory_space<vmem>>, vector<1x3xf32>
    %207 = vector.extract_strided_slice %205 {offsets = [0, 0], sizes = [8, 64], strides = [1, 1]} : vector<16x64xf32> to vector<8x64xf32>
    %c0_93 = arith.constant 0 : index
    %c0_94 = arith.constant 0 : index
    %208 = vector.load %arg7[%c0_93, %c0_94] : memref<128x3xbf16, #tpu.memory_space<vmem>>, vector<64x3xbf16>
    %209 = arith.truncf %207 : vector<8x64xf32> to vector<8x64xbf16>
    %cst_95 = arith.constant dense<0.000000e+00> : vector<8x3xf32>
    %210 = tpu.matmul %209, %208, %cst_95 {dimension_numbers = #tpu.dot_dimension_numbers<[1], [0], [0], [1], [0, 0, 1, 1], [], []>} : vector<8x64xbf16>, vector<64x3xbf16>, vector<8x3xf32> -> vector<8x3xf32>
    %211 = vector.broadcast %206 : vector<1x3xf32> to vector<8x3xf32>
    %212 = arith.addf %211, %210 : vector<8x3xf32>
    %213 = vector.extract_strided_slice %205 {offsets = [8, 0], sizes = [8, 64], strides = [1, 1]} : vector<16x64xf32> to vector<8x64xf32>
    %c64_96 = arith.constant 64 : index
    %c0_97 = arith.constant 0 : index
    %214 = vector.load %arg7[%c64_96, %c0_97] : memref<128x3xbf16, #tpu.memory_space<vmem>>, vector<64x3xbf16>
    %215 = arith.truncf %213 : vector<8x64xf32> to vector<8x64xbf16>
    %cst_98 = arith.constant dense<0.000000e+00> : vector<8x3xf32>
    %216 = tpu.matmul %215, %214, %cst_98 {dimension_numbers = #tpu.dot_dimension_numbers<[1], [0], [0], [1], [0, 0, 1, 1], [], []>} : vector<8x64xbf16>, vector<64x3xbf16>, vector<8x3xf32> -> vector<8x3xf32>
    %217 = arith.addf %212, %216 : vector<8x3xf32>
    %c0_99 = arith.constant 0 : index
    %c0_100 = arith.constant 0 : index
    %218 = vector.load %arg9[%c0_99, %c0_100] : memref<8x3xf32, #tpu.memory_space<vmem>>, vector<8x3xf32>
    tpu.vector_store %arg9[%c0_99, %c0_100], %217 {strides = array<i32>} : memref<8x3xf32, #tpu.memory_space<vmem>>, vector<8x3xf32>,
    return
  }
}

</mosaic_0001>

<bundles_post_ra>
// kernel: stgcn_forward.1
= control target key start
LH: loop header
LB: loop body
LE: loop exit
PB: predicated region body
PF: predicated region fallthrough
CT: control target
= control target key end

     0   :  { %vm100_vm0 = vcmask 1045504   ;;  %vm84_vm1 = vcmask 97280   ;;  %s4410_s3 = inlined_call_operand.vmem [shape: bf16[12,192], index: 3, kind: input, shape index: {}]   ;;  %s4411_s0 = inlined_call_operand.vmem [shape: bf16[80,12], index: 0, kind: input, shape index: {}]   ;;  %s4412_s5 = inlined_call_operand.vmem [shape: f32[5,192], index: 5, kind: input, shape index: {}]   ;;  %s4413_s6 = inlined_call_operand.vmem [shape: bf16[128,16], index: 6, kind: input, shape index: {}]   ;;  %s4414_s1 = inlined_call_operand.vmem [shape: bf16[80,80], index: 1, kind: input, shape index: {}]   ;;  %s4415_s4 = inlined_call_operand.vmem [shape: bf16[3,160,192], index: 4, kind: input, shape index: {}]   ;;  %s4416_s2 = inlined_call_operand.vmem [shape: bf16[48,48], index: 2, kind: input, shape index: {}]   ;;  %s4417_s7 = inlined_call_operand.vmem [shape: bf16[128,3], index: 7, kind: input, shape index: {}]   ;;  %s4418_s8 = inlined_call_operand.vmem [shape: f32[1,3], index: 8, kind: input, shape index: {}]   ;;  %s4419_s9 = inlined_call_operand.vmem [shape: f32[8,3], index: 9, kind: output, shape index: {}]  }
   0x1   :  { %v2697_v0 = vld [vmem:[%s4410_s3] sm:$0xf]  ;;  %v3207_v1 = vld [vmem:[%s4410_s3 + $0x4] sm:$0x30]  ;;  %v3203_v6 = vld [vmem:[%s4411_s0 + $0x10] sm:$0xff] }
   0x2   :  { %v2698_v2 = vor.u32 %v3207_v1, %v2697_v0  ;;  %v3201_v4 = vld [vmem:[%s4411_s0] sm:$0xff]  ;;  %v3202_v5 = vld [vmem:[%s4411_s0 + $0x8] sm:$0xff]  ;;  %v3204_v11 = vld [vmem:[%s4411_s0 + $0x18] sm:$0xff] }
   0x3   :  { %v3206_v7 = vld [vmem:[%s4410_s3 + $0x4] sm:$0xf]  ;;  %v2699_v8 = vld [vmem:[%s4410_s3 + $0x8] sm:$0x30] }
   0x4   :  { %v102_v3 = vsel %vm100_vm0, %v2698_v2, 0  ;;  %v2702_v9 = vor.u32 %v3206_v7, %v2699_v8  ;;  %v3205_v12 = vld [vmem:[%s4411_s0 + $0x20] sm:$0xff]  ;;  %s3424_s0 = smov 64  }
   0x5   :  { %114 = vmatpush.bf16.msra.mxu0 %v102_v3  ;;  %v3517_v13 = vld [vmem:[%s4412_s5] ss:$8 sm:$0x3] }
   0x6   :  { %v105_v10 = vsel %vm100_vm0, %v2702_v9, 0  ;;  %v3520_v14 = vperm.slane %v3517_v13, 0 }
   0x7   :  { %148 = vmatpush.bf16.msra.mxu1 %v105_v10 }
   0x8   :  { %2703 = vmatmul.msk.bf16.vlgmr.msra.gmra.mxu0 %vm84_vm1, %v3201_v4 }
   0xa   :  { %2708 = vmatmul.msk.bf16.vlgmr.msra.gmra.mxu1 %vm84_vm1, %v3201_v4 }
  0x18   :  { %2704 = vmatmul.msk.bf16.gmra.mxu0 %vm84_vm1, %v3202_v5 }
  0x1a   :  { %2709 = vmatmul.msk.bf16.gmra.mxu1 %vm84_vm1, %v3202_v5 }
  0x28   :  { %2705 = vmatmul.msk.bf16.gmra.mxu0 %vm84_vm1, %v3203_v6 }
  0x2a   :  { %2710 = vmatmul.msk.bf16.gmra.mxu1 %vm84_vm1, %v3203_v6 }
  0x38   :  { %2706 = vmatmul.msk.bf16.gmra.mxu0 %vm84_vm1, %v3204_v11 }
  0x3a   :  { %2711 = vmatmul.msk.bf16.gmra.mxu1 %vm84_vm1, %v3204_v11 }
  0x48   :  { %2707 = vmatmul.msk.bf16.gmra.mxu0 %vm84_vm1, %v3205_v12 }
  0x4a   :  { %2712 = vmatmul.msk.bf16.gmra.mxu1 %vm84_vm1, %v3205_v12 }
  0x85   :  { %v116_v15 = vpop.f32.mrf.mxu0 }
  0x86   :  { %v3523_v16 = vadd.f32 %v116_v15, %v3520_v14 }
  0x88   :  { %v2713_v17 = vmul.f32 -1.442695, %v3523_v16 }
  0x8a   :  { %3296 = vpow2.f32 %v2713_v17 }
  0x8d   :  { %v118_v18 = vpop.f32.mrf.mxu0 }
  0x8e   :  { %v3527_v19 = vadd.f32 %v118_v18, %v3520_v14 }
  0x90   :  { %v3297_v20 = vpop.eup %3296  ;;  %v2714_v21 = vmul.f32 -1.442695, %v3527_v19 }
  0x91   :  { %v205_v22 = vadd.f32 1.0, %v3297_v20 }
  0x92   :  { %3298 = vpow2.f32 %v2714_v21 }
  0x93   :  { %3300 = vrcp.f32 %v205_v22  ;;  %v226_v32 = vand.u32 2147483648, %v205_v22  ;;  %v224_v35 = vand.u32 2147483647, %v205_v22  ;;  %vm220_vm3 = vweird.f32 %v205_v22 }
  0x95   :  { %v121_v23 = vpop.f32.mrf.mxu0  ;;  %v227_v41 = vor.u32 1.1754944e-38, %v226_v32  ;;  %vm225_vm5 = vcmp.eq.f32.partialorder %v224_v35, 8.507059e+37 }
  0x96   :  { %v3531_v24 = vadd.f32 %v121_v23, %v3520_v14 }
  0x98   :  { %v3299_v25 = vpop.eup %3298  ;;  %v2715_v26 = vmul.f32 -1.442695, %v3531_v24 }
  0x99   :  { %v3301_v27 = vpop.eup %3300  ;;  %v206_v28 = vadd.f32 1.0, %v3299_v25 }
  0x9a   :  { %3302 = vpow2.f32 %v2715_v26  ;;  %v216_v29 = vmul.f32 %v3301_v27, %v205_v22  ;;  %vm221_vm2 = vweird.f32 %v3301_v27 }
  0x9b   :  { %3304 = vrcp.f32 %v206_v28  ;;  %vm222_vm4 = vmor %vm220_vm3, %vm221_vm2  ;;  %v241_v47 = vand.u32 2147483648, %v206_v28  ;;  %v239_v50 = vand.u32 2147483647, %v206_v28  ;;  %vm235_vm7 = vweird.f32 %v206_v28 }
  0x9c   :  { %v217_v30 = vsub.f32 1.0, %v216_v29 }
  0x9d   :  { %v123_v31 = vpop.f32.mrf.mxu0  ;;  %v242_v56 = vor.u32 1.1754944e-38, %v241_v47  ;;  %vm240_vm9 = vcmp.eq.f32.partialorder %v239_v50, 8.507059e+37 }
  0x9e   :  { %v3535_v33 = vadd.f32 %v123_v31, %v3520_v14  ;;  %v218_v34 = vmul.f32 %v3301_v27, %v217_v30 }
  0xa0   :  { %v3303_v36 = vpop.eup %3302  ;;  %v2716_v37 = vmul.f32 -1.442695, %v3535_v33  ;;  %v219_v38 = vadd.f32 %v3301_v27, %v218_v34 }
  0xa1   :  { %v3305_v39 = vpop.eup %3304  ;;  %v207_v40 = vadd.f32 1.0, %v3303_v36 }
  0xa2   :  { %3306 = vpow2.f32 %v2716_v37  ;;  %v223_v42 = vsel %vm222_vm4, %v3301_v27, %v219_v38  ;;  %v231_v43 = vmul.f32 %v3305_v39, %v206_v28  ;;  %vm236_vm6 = vweird.f32 %v3305_v39 }
  0xa3   :  { %3308 = vrcp.f32 %v207_v40  ;;  %v228_v44 = vsel %vm225_vm5, %v227_v41, %v223_v42  ;;  %vm237_vm8 = vmor %vm235_vm7, %vm236_vm6  ;;  %v256_v62 = vand.u32 2147483648, %v207_v40  ;;  %v254_v1 = vand.u32 2147483647, %v207_v40 }
  0xa4   :  { %375 = vrot.lane.b32.xlu0 %v228_v44, %s3424_s0  ;;  %v232_v45 = vsub.f32 1.0, %v231_v43  ;;  %vm250_vm11 = vweird.f32 %v207_v40 }
  0xa5   :  { %v126_v46 = vpop.f32.mrf.mxu0  ;;  %v257_v7 = vor.u32 1.1754944e-38, %v256_v62  ;;  %vm255_vm13 = vcmp.eq.f32.partialorder %v254_v1, 8.507059e+37 }
  0xa6   :  { %v3540_v48 = vadd.f32 %v126_v46, %v3520_v14  ;;  %v233_v49 = vmul.f32 %v3305_v39, %v232_v45 }
  0xa8   :  { %v3307_v51 = vpop.eup %3306  ;;  %v2717_v52 = vmul.f32 -1.442695, %v3540_v48  ;;  %v234_v53 = vadd.f32 %v3305_v39, %v233_v49 }
  0xa9   :  { %v3309_v54 = vpop.eup %3308  ;;  %v208_v55 = vadd.f32 1.0, %v3307_v51 }
  0xaa   :  { %3310 = vpow2.f32 %v2717_v52  ;;  %v238_v57 = vsel %vm237_vm8, %v3305_v39, %v234_v53  ;;  %v246_v58 = vmul.f32 %v3309_v54, %v207_v40  ;;  %vm251_vm10 = vweird.f32 %v3309_v54 }
  0xab   :  { %3312 = vrcp.f32 %v208_v55  ;;  %v243_v59 = vsel %vm240_vm9, %v242_v56, %v238_v57  ;;  %vm252_vm12 = vmor %vm250_vm11, %vm251_vm10  ;;  %v271_v15 = vand.u32 2147483648, %v208_v55  ;;  %v269_v20 = vand.u32 2147483647, %v208_v55 }
  0xac   :  { %377 = vrot.lane.b32.xlu0 %v243_v59, %s3424_s0  ;;  %v247_v60 = vsub.f32 1.0, %v246_v58  ;;  %vm265_vm15 = vweird.f32 %v208_v55 }
  0xad   :  { %v128_v61 = vpop.f32.mrf.mxu0  ;;  %v272_v27 = vor.u32 1.1754944e-38, %v271_v15  ;;  %vm270_vm1 = vcmp.eq.f32.partialorder %v269_v20, 8.507059e+37 }
  0xae   :  { %v3545_v63 = vadd.f32 %v128_v61, %v3520_v14  ;;  %v248_v0 = vmul.f32 %v3309_v54, %v247_v60 }
  0xb0   :  { %v3311_v2 = vpop.eup %3310  ;;  %v2718_v3 = vmul.f32 -1.442695, %v3545_v63  ;;  %v249_v4 = vadd.f32 %v3309_v54, %v248_v0 }
  0xb1   :  { %v3313_v5 = vpop.eup %3312  ;;  %v209_v6 = vadd.f32 1.0, %v3311_v2 }
  0xb2   :  { %3314 = vpow2.f32 %v2718_v3  ;;  %v253_v8 = vsel %vm252_vm12, %v3309_v54, %v249_v4  ;;  %v261_v9 = vmul.f32 %v3313_v5, %v208_v55  ;;  %vm266_vm14 = vweird.f32 %v3313_v5 }
  0xb3   :  { %3316 = vrcp.f32 %v209_v6  ;;  %v258_v10 = vsel %vm255_vm13, %v257_v7, %v253_v8  ;;  %vm267_vm0 = vmor %vm265_vm15, %vm266_vm14  ;;  %v286_v34 = vand.u32 2147483648, %v209_v6  ;;  %v284_v37 = vand.u32 2147483647, %v209_v6 }
  0xb4   :  { %379 = vrot.lane.b32.xlu1 %v258_v10, %s3424_s0  ;;  %v262_v11 = vsub.f32 1.0, %v261_v9  ;;  %vm280_vm3 = vweird.f32 %v209_v6 }
  0xb5   :  { %v131_v12 = vpop.f32.mrf.mxu0  ;;  %v287_v43 = vor.u32 1.1754944e-38, %v286_v34  ;;  %vm285_vm5 = vcmp.eq.f32.partialorder %v284_v37, 8.507059e+37 }
  0xb6   :  { %v3550_v17 = vadd.f32 %v131_v12, %v3520_v14  ;;  %v263_v18 = vmul.f32 %v3313_v5, %v262_v11 }
  0xb8   :  { %v3315_v21 = vpop.eup %3314  ;;  %v2719_v22 = vmul.f32 -1.442695, %v3550_v17  ;;  %v264_v23 = vadd.f32 %v3313_v5, %v263_v18 }
  0xb9   :  { %v3317_v25 = vpop.eup %3316  ;;  %v210_v26 = vadd.f32 1.0, %v3315_v21 }
  0xba   :  { %3318 = vpow2.f32 %v2719_v22  ;;  %v268_v28 = vsel %vm267_vm0, %v3313_v5, %v264_v23  ;;  %v276_v29 = vmul.f32 %v3317_v25, %v209_v6  ;;  %vm281_vm2 = vweird.f32 %v3317_v25 }
  0xbb   :  { %3320 = vrcp.f32 %v210_v26  ;;  %v273_v30 = vsel %vm270_vm1, %v272_v27, %v268_v28  ;;  %vm282_vm4 = vmor %vm280_vm3, %vm281_vm2  ;;  %v301_v50 = vand.u32 2147483648, %v210_v26  ;;  %v299_v53 = vand.u32 2147483647, %v210_v26 }
  0xbc   :  { %381 = vrot.lane.b32.xlu1 %v273_v30, %s3424_s0  ;;  %v277_v31 = vsub.f32 1.0, %v276_v29  ;;  %vm295_vm7 = vweird.f32 %v210_v26 }
  0xbd   :  { %v133_v32 = vpop.f32.mrf.mxu0  ;;  %v302_v59 = vor.u32 1.1754944e-38, %v301_v50  ;;  %vm300_vm9 = vcmp.eq.f32.partialorder %v299_v53, 8.507059e+37 }
  0xbe   :  { %v3555_v35 = vadd.f32 %v133_v32, %v3520_v14  ;;  %v278_v36 = vmul.f32 %v3317_v25, %v277_v31 }
  0xc0   :  { %v3319_v38 = vpop.eup %3318  ;;  %v2720_v39 = vmul.f32 -1.442695, %v3555_v35  ;;  %v279_v40 = vadd.f32 %v3317_v25, %v278_v36 }
  0xc1   :  { %v3321_v41 = vpop.eup %3320  ;;  %v211_v42 = vadd.f32 1.0, %v3319_v38 }
  0xc2   :  { %3322 = vpow2.f32 %v2720_v39  ;;  %v283_v44 = vsel %vm282_vm4, %v3317_v25, %v279_v40  ;;  %v291_v45 = vmul.f32 %v3321_v41, %v210_v26  ;;  %vm296_vm6 = vweird.f32 %v3321_v41 }
  0xc3   :  { %3324 = vrcp.f32 %v211_v42  ;;  %v288_v46 = vsel %vm285_vm5, %v287_v43, %v283_v44  ;;  %vm297_vm8 = vmor %vm295_vm7, %vm296_vm6  ;;  %v316_v2 = vand.u32 2147483648, %v211_v42  ;;  %v314_v5 = vand.u32 2147483647, %v211_v42 }
  0xc4   :  { %383 = vrot.lane.b32.xlu2 %v288_v46, %s3424_s0  ;;  %v292_v47 = vsub.f32 1.0, %v291_v45  ;;  %vm310_vm11 = vweird.f32 %v211_v42 }
  0xc5   :  { %v136_v49 = vpop.f32.mrf.mxu0  ;;  %v317_v11 = vor.u32 1.1754944e-38, %v316_v2  ;;  %vm315_vm13 = vcmp.eq.f32.partialorder %v314_v5, 8.507059e+37 }
  0xc6   :  { %v3560_v51 = vadd.f32 %v136_v49, %v3520_v14  ;;  %v293_v52 = vmul.f32 %v3321_v41, %v292_v47 }
  0xc8   :  { %v3323_v54 = vpop.eup %3322  ;;  %v2721_v55 = vmul.f32 -1.442695, %v3560_v51  ;;  %v294_v56 = vadd.f32 %v3321_v41, %v293_v52 }
  0xc9   :  { %v3325_v57 = vpop.eup %3324  ;;  %v212_v58 = vadd.f32 1.0, %v3323_v54  ;;  %v3216_v54 = vld [vmem:[%s4413_s6 + $0x18] sm:$0xff] }
  0xca   :  { %3326 = vpow2.f32 %v2721_v55  ;;  %v298_v60 = vsel %vm297_vm8, %v3321_v41, %v294_v56  ;;  %v306_v61 = vmul.f32 %v3325_v57, %v211_v42  ;;  %vm311_vm10 = vweird.f32 %v3325_v57  ;;  %502 = vmatpush.bf16.msra.mxu2 %v3216_v54  ;;  %v3215_v55 = vld [vmem:[%s4413_s6 + $0x10] sm:$0xff]  ;;  %v3214_v56 = vld [vmem:[%s4413_s6 + $0x8] sm:$0xff] }
  0xcb   :  { %3328 = vrcp.f32 %v212_v58  ;;  %v303_v62 = vsel %vm300_vm9, %v302_v59, %v298_v60  ;;  %vm312_vm12 = vmor %vm310_vm11, %vm311_vm10  ;;  %v331_v20 = vand.u32 2147483648, %v212_v58  ;;  %v329_v22 = vand.u32 2147483647, %v212_v58 }
  0xcc   :  { %385 = vrot.lane.b32.xlu2 %v303_v62, %s3424_s0  ;;  %v307_v0 = vsub.f32 1.0, %v306_v61  ;;  %vm325_vm15 = vweird.f32 %v212_v58  ;;  %v48_v61 = vperm.slane %v3517_v13, 1  ;;  %vm482_vm10 = vcmask 523264  }
  0xcd   :  { %v138_v1 = vpop.f32.mrf.mxu0  ;;  %v332_v28 = vor.u32 1.1754944e-38, %v331_v20  ;;  %vm330_vm1 = vcmp.eq.f32.partialorder %v329_v22, 8.507059e+37  ;;  %vm562_vm11 = vcmask 654336  }
  0xce   :  { %v3565_v3 = vadd.f32 %v138_v1, %v3520_v14  ;;  %v308_v4 = vmul.f32 %v3325_v57, %v307_v0  ;;  %503 = vmatpush.bf16.msra.mxu2 %v3215_v55 }
  0xd0   :  { %v3327_v6 = vpop.eup %3326  ;;  %v2722_v7 = vmul.f32 -1.442695, %v3565_v3  ;;  %v309_v8 = vadd.f32 %v3325_v57, %v308_v4 }
  0xd1   :  { %v3329_v9 = vpop.eup %3328  ;;  %v213_v10 = vadd.f32 1.0, %v3327_v6 }
  0xd2   :  { %3330 = vpow2.f32 %v2722_v7  ;;  %v313_v12 = vsel %vm312_vm12, %v3325_v57, %v309_v8  ;;  %v321_v15 = vmul.f32 %v3329_v9, %v212_v58  ;;  %vm326_vm14 = vweird.f32 %v3329_v9  ;;  %504 = vmatpush.bf16.msra.mxu2 %v3214_v56  ;;  %v3213_v57 = vld [vmem:[%s4413_s6] sm:$0xff]  ;;  %v150_v58 = vpop.f32.mrf.mxu1 }
  0xd3   :  { %3332 = vrcp.f32 %v213_v10  ;;  %v318_v18 = vsel %vm315_vm13, %v317_v11, %v313_v12  ;;  %vm327_vm0 = vmor %vm325_vm15, %vm326_vm14  ;;  %v346_v34 = vand.u32 2147483648, %v213_v10  ;;  %v344_v37 = vand.u32 2147483647, %v213_v10 }
  0xd4   :  { %387 = vrot.lane.b32.xlu0 %v318_v18, %s3424_s0  ;;  %v322_v14 = vsub.f32 1.0, %v321_v15  ;;  %vm340_vm3 = vweird.f32 %v213_v10  ;;  %v151_v0 = vadd.f32 %v150_v58, %v48_v61  ;;  %vm640_vm12 = vcmask 130048  }
  0xd5   :  { %v347_v40 = vor.u32 1.1754944e-38, %v346_v34  ;;  %vm345_vm5 = vcmp.eq.f32.partialorder %v344_v37, 8.507059e+37 }
  0xd6   :  { %v323_v21 = vmul.f32 %v3329_v9, %v322_v14  ;;  %505 = vmatpush.bf16.msra.mxu2 %v3213_v57 }
  0xd8   :  { %v3331_v23 = vpop.eup %3330  ;;  %v324_v25 = vadd.f32 %v3329_v9, %v323_v21 }
  0xd9   :  { %v3333_v26 = vpop.eup %3332  ;;  %v214_v27 = vadd.f32 1.0, %v3331_v23 }
  0xda   :  { %v328_v29 = vsel %vm327_vm0, %v3329_v9, %v324_v25  ;;  %v336_v30 = vmul.f32 %v3333_v26, %v213_v10  ;;  %vm341_vm2 = vweird.f32 %v3333_v26  ;;  %v152_v59 = vpop.f32.mrf.mxu1 }
  0xdb   :  { %3334 = vrcp.f32 %v214_v27  ;;  %v333_v31 = vsel %vm330_vm1, %v332_v28, %v328_v29  ;;  %vm342_vm4 = vmor %vm340_vm3, %vm341_vm2  ;;  %v361_v45 = vand.u32 2147483648, %v214_v27  ;;  %v359_v47 = vand.u32 2147483647, %v214_v27 }
  0xdc   :  { %389 = vrot.lane.b32.xlu1 %v333_v31, %s3424_s0  ;;  %v337_v32 = vsub.f32 1.0, %v336_v30  ;;  %vm355_vm7 = vweird.f32 %v214_v27  ;;  %v153_v4 = vadd.f32 %v152_v59, %v48_v61 }
  0xdd   :  { %v362_v50 = vor.u32 1.1754944e-38, %v361_v45  ;;  %vm360_vm9 = vcmp.eq.f32.partialorder %v359_v47, 8.507059e+37 }
  0xde   :  { %v338_v36 = vmul.f32 %v3333_v26, %v337_v32 }
  0xe0   :  { %v339_v38 = vadd.f32 %v3333_v26, %v338_v36 }
  0xe1   :  { %v3335_v39 = vpop.eup %3334 }
  0xe2   :  { %v343_v41 = vsel %vm342_vm4, %v3333_v26, %v339_v38  ;;  %v351_v42 = vmul.f32 %v3335_v39, %v214_v27  ;;  %vm356_vm6 = vweird.f32 %v3335_v39  ;;  %v155_v62 = vpop.f32.mrf.mxu1 }
  0xe3   :  { %v348_v43 = vsel %vm345_vm5, %v347_v40, %v343_v41  ;;  %vm357_vm8 = vmor %vm355_vm7, %vm356_vm6  ;;  %v156_v15 = vadd.f32 %v155_v62, %v48_v61 }
  0xe4   :  { %391 = vrot.lane.b32.xlu2 %v348_v43, %s3424_s0  ;;  %v352_v44 = vsub.f32 1.0, %v351_v42 }
  0xe6   :  { %v353_v46 = vmul.f32 %v3335_v39, %v352_v44 }
  0xe8   :  { %v354_v49 = vadd.f32 %v3335_v39, %v353_v46 }
  0xea   :  { %v358_v52 = vsel %vm357_vm8, %v3335_v39, %v354_v49  ;;  %v157_v8 = vpop.f32.mrf.mxu1 }
  0xeb   :  { %v363_v53 = vsel %vm360_vm9, %v362_v50, %v358_v52  ;;  %v158_v20 = vadd.f32 %v157_v8, %v48_v61 }
  0xec   :  { %393 = vrot.lane.b32.xlu0 %v363_v53, %s3424_s0 }
  0xf2   :  { %v160_v18 = vpop.f32.mrf.mxu1 }
  0xf3   :  { %v161_v31 = vadd.f32 %v160_v18, %v48_v61  ;;  %v3210_v18 = vld [vmem:[%s4414_s1 + $0x10] sm:$0xff] }
  0xfa   :  { %v162_v27 = vpop.f32.mrf.mxu1 }
  0xfb   :  { %v163_v29 = vadd.f32 %v162_v27, %v48_v61  ;;  %v3220_v27 = vld [vmem:[%s4415_s4 + $0xa4] sm:$0xf0] }
 0x102   :  { %v165_v36 = vpop.f32.mrf.mxu1 }
 0x103   :  { %v166_v41 = vadd.f32 %v165_v36, %v48_v61 }
 0x10a   :  { %v167_v40 = vpop.f32.mrf.mxu1 }
 0x10b   :  { %v168_v44 = vadd.f32 %v167_v40, %v48_v61  ;;  %v2808_v40 = vld [vmem:[%s4415_s4 + $0x140] sm:$0xf] }
 0x112   :  { %v170_v49 = vpop.f32.mrf.mxu1 }
 0x113   :  { %v171_v53 = vadd.f32 %v170_v49, %v48_v61  ;;  %v2810_v49 = vld [vmem:[%s4415_s4 + $0x148] sm:$0xf0] }
 0x116   :  { %v376_v60 = vpop.permute.xlu0 %375 }
 0x117   :  { %v405_v1 = vadd.f32 %v376_v60, %v3523_v16 }
 0x119   :  { %v415_v5 = vadd.f32 %v405_v1, %v151_v0 }
 0x11a   :  { %v172_v55 = vpop.f32.mrf.mxu1 }
 0x11b   :  { %v425_v9 = vmax.f32 %v415_v5, 0.0 }
 0x11e   :  { %v378_v2 = vpop.permute.xlu0 %377  ;;  %v384_v14 = vpop.permute.xlu2 %383 }
 0x11f   :  { %v406_v6 = vadd.f32 %v378_v2, %v3527_v19 }
 0x121   :  { %v416_v7 = vadd.f32 %v406_v6, %v153_v4 }
 0x123   :  { %v426_v10 = vmax.f32 %v416_v7, 0.0 }
 0x125   :  { %v453_v11 = vpack.c.bf16 %v426_v10, %v425_v9 }
 0x126   :  { %v380_v12 = vpop.permute.xlu1 %379  ;;  %v386_v28 = vpop.permute.xlu2 %385 }
 0x127   :  { %2739 = vmatmul.msk.bf16.vlgmr.msra.gmra.mxu2 %vm482_vm10, %v453_v11  ;;  %v407_v13 = vadd.f32 %v380_v12, %v3531_v24  ;;  %v410_v30 = vadd.f32 %v386_v28, %v3545_v63  ;;  %v409_v24 = vadd.f32 %v384_v14, %v3540_v48  ;;  %v2772_v14 = vld [vmem:[%s4415_s4] sm:$0xf]  ;;  %v3219_v28 = vld [vmem:[%s4415_s4 + $0xa4] sm:$0xf] }
 0x129   :  { %v417_v21 = vadd.f32 %v407_v13, %v156_v15  ;;  %v420_v32 = vadd.f32 %v410_v30, %v163_v29  ;;  %v419_v34 = vadd.f32 %v409_v24, %v161_v31  ;;  %v3208_v15 = vld [vmem:[%s4414_s1] sm:$0xff]  ;;  %v3209_v13 = vld [vmem:[%s4414_s1 + $0x8] sm:$0xff] }
 0x12a   :  { %v2792_v30 = vld [vmem:[%s4415_s4 + $0xa8] sm:$0xf0] }
 0x12b   :  { %v427_v23 = vmax.f32 %v417_v21, 0.0  ;;  %v430_v37 = vmax.f32 %v420_v32, 0.0  ;;  %v429_v38 = vmax.f32 %v419_v34, 0.0  ;;  %v3211_v21 = vld [vmem:[%s4414_s1 + $0x18] sm:$0xff]  ;;  %v2795_v31 = vor.u32 %v3219_v28, %v2792_v30 }
 0x12e   :  { %v382_v16 = vpop.permute.xlu1 %381 }
 0x12f   :  { %v408_v22 = vadd.f32 %v382_v16, %v3535_v33  ;;  %v455_v33 = vpack.c.bf16 %v430_v37, %v429_v38  ;;  %v3218_v16 = vld [vmem:[%s4415_s4 + $0x4] sm:$0xf0] }
 0x131   :  { %v418_v19 = vadd.f32 %v408_v22, %v158_v20  ;;  %v2773_v20 = vor.u32 %v3218_v16, %v2772_v14  ;;  %v3212_v22 = vld [vmem:[%s4414_s1 + $0x20] sm:$0xff] }
 0x133   :  { %v428_v25 = vmax.f32 %v418_v19, 0.0  ;;  %660 = vmatpush.bf16.msrb.mxu0 %v2773_v20  ;;  %v3217_v19 = vld [vmem:[%s4415_s4 + $0x4] sm:$0xf] }
 0x135   :  { %v454_v26 = vpack.c.bf16 %v428_v25, %v427_v23  ;;  %v2774_v23 = vld [vmem:[%s4415_s4 + $0x8] sm:$0xf0] }
 0x136   :  { %v2777_v25 = vor.u32 %v3217_v19, %v2774_v23 }
 0x137   :  { %2740 = vmatmul.msk.bf16.gmra.mxu2 %vm482_vm10, %v454_v26  ;;  %v2790_v26 = vld [vmem:[%s4415_s4 + $0xa0] sm:$0xf] }
 0x138   :  { %689 = vmatpush.bf16.msrb.mxu1 %v2777_v25  ;;  %v2791_v29 = vor.u32 %v3220_v27, %v2790_v26 }
 0x13a   :  { %768 = vmatpush.bf16.msrb.mxu2 %v2791_v29 }
 0x13e   :  { %v392_v52 = vpop.permute.xlu2 %391 }
 0x13f   :  { %v413_v54 = vadd.f32 %v392_v52, %v3560_v51 }
 0x141   :  { %v423_v57 = vadd.f32 %v413_v54, %v171_v53 }
 0x143   :  { %v433_v60 = vmax.f32 %v423_v57, 0.0 }
 0x146   :  { %v388_v39 = vpop.permute.xlu0 %387 }
 0x147   :  { %2741 = vmatmul.msk.bf16.gmra.mxu2 %vm482_vm10, %v455_v33  ;;  %v411_v42 = vadd.f32 %v388_v39, %v3550_v17  ;;  %v173_v17 = vadd.f32 %v172_v55, %v48_v61 }
 0x149   :  { %v421_v45 = vadd.f32 %v411_v42, %v166_v41  ;;  %v3222_v41 = vld [vmem:[%s4415_s4 + $0x144] sm:$0xf0] }
 0x14a   :  { %v2809_v42 = vor.u32 %v3222_v41, %v2808_v40 }
 0x14b   :  { %v431_v48 = vmax.f32 %v421_v45, 0.0 }
 0x14c   :  { %859 = vmatpush.bf16.msra.mxu0 %v2809_v42 }
 0x14e   :  { %v390_v43 = vpop.permute.xlu1 %389 }
 0x14f   :  { %v412_v63 = vadd.f32 %v390_v43, %v3555_v35 }
 0x151   :  { %v422_v46 = vadd.f32 %v412_v63, %v168_v44 }
 0x153   :  { %v432_v47 = vmax.f32 %v422_v46, 0.0 }
 0x155   :  { %v456_v50 = vpack.c.bf16 %v432_v47, %v431_v48  ;;  %v3221_v47 = vld [vmem:[%s4415_s4 + $0x144] sm:$0xf] }
 0x157   :  { %2742 = vmatmul.msk.bf16.gmra.mxu2 %vm482_vm10, %v456_v50  ;;  %v2813_v50 = vor.u32 %v3221_v47, %v2810_v49 }
 0x159   :  { %888 = vmatpush.bf16.msra.mxu1 %v2813_v50 }
 0x15e   :  { %v394_v56 = vpop.permute.xlu0 %393 }
 0x15f   :  { %v414_v58 = vadd.f32 %v394_v56, %v3565_v3 }
 0x161   :  { %v424_v59 = vadd.f32 %v414_v58, %v173_v17 }
 0x163   :  { %v434_v35 = vmax.f32 %v424_v59, 0.0 }
 0x165   :  { %v457_v62 = vpack.c.bf16 %v434_v35, %v433_v60 }
 0x167   :  { %2743 = vmatmul.msk.bf16.gmra.mxu2 %vm482_vm10, %v457_v62 }
 0x1aa   :  { %v507_v0 = vpop.f32.mrf.mxu2 }
 0x1b2   :  { %v509_v1 = vpop.f32.mrf.mxu2 }
 0x1b3   :  { %v532_v12 = vpack.c.bf16 %v509_v1, %v507_v0 }
 0x1ba   :  { %v512_v2 = vpop.f32.mrf.mxu2 }
 0x1c2   :  { %v514_v4 = vpop.f32.mrf.mxu2 }
 0x1c3   :  { %v533_v11 = vpack.c.bf16 %v514_v4, %v512_v2  ;;  %v2769_v4 = vld [vmem:[%s4412_s5 + $0x1] ss:$8 sm:$0x3] }
 0x1c4   :  { %v3703_v25 = vperm.slane %v2769_v4, 0 }
 0x1ca   :  { %v517_v5 = vpop.f32.mrf.mxu2 }
 0x1d2   :  { %v519_v6 = vpop.f32.mrf.mxu2 }
 0x1d3   :  { %v534_v3 = vpack.c.bf16 %v519_v6, %v517_v5  ;;  %v3678_v5 = vperm.slane %v2769_v4, 1 }
 0x1da   :  { %v522_v7 = vpop.f32.mrf.mxu2 }
 0x1e2   :  { %v524_v51 = vpop.f32.mrf.mxu2 }
 0x1e3   :  { %v535_v61 = vpack.c.bf16 %v524_v51, %v522_v7 }
 0x1ea   :  { %v527_v8 = vpop.f32.mrf.mxu2 }
 0x1f2   :  { %v529_v9 = vpop.f32.mrf.mxu2 }
 0x1f3   :  { %v536_v10 = vpack.c.bf16 %v529_v9, %v527_v8 }
 0x1f5   :  { %581 = vmatpush.bf16.msra.mxu3 %v536_v10 }
 0x1f9   :  { %582 = vmatpush.bf16.msra.mxu3 %v535_v61 }
 0x1fd   :  { %583 = vmatpush.bf16.msra.mxu3 %v534_v3 }
 0x201   :  { %584 = vmatpush.bf16.msra.mxu3 %v533_v11 }
 0x205   :  { %585 = vmatpush.bf16.msra.mxu3 %v532_v12 }
 0x208   :  { %2764 = vmatmul.msk.bf16.vlgmr.msra.gmra.mxu3 %vm562_vm11, %v3208_v15 }
 0x209   :  { %797 = vmatpush.bf16.msrb.mxu3 %v2795_v31 }
 0x218   :  { %2765 = vmatmul.msk.bf16.gmra.mxu3 %vm562_vm11, %v3209_v13 }
 0x228   :  { %2766 = vmatmul.msk.bf16.gmra.mxu3 %vm562_vm11, %v3210_v18 }
 0x238   :  { %2767 = vmatmul.msk.bf16.gmra.mxu3 %vm562_vm11, %v3211_v21 }
 0x248   :  { %2768 = vmatmul.msk.bf16.gmra.mxu3 %vm562_vm11, %v3212_v22 }
 0x28b   :  { %v587_v24 = vpop.f32.mrf.mxu3 }
 0x28c   :  { %v612_v34 = vmax.f32 %v587_v24, 0.0 }
 0x293   :  { %v589_v32 = vpop.f32.mrf.mxu3 }
 0x294   :  { %v613_v36 = vmax.f32 %v589_v32, 0.0 }
 0x296   :  { %v626_v37 = vpack.c.bf16 %v613_v36, %v612_v34 }
 0x298   :  { %2778 = vmatmul.msk.bf16.vlgmr.msrb.gmra.mxu0 %vm640_vm12, %v626_v37  ;;  %2782 = vmatmul.msk.bf16.vlgmr.msrb.gmra.mxu1 %vm640_vm12, %v626_v37 }
 0x29b   :  { %v592_v38 = vpop.f32.mrf.mxu3 }
 0x29c   :  { %v614_v33 = vmax.f32 %v592_v38, 0.0 }
 0x29e   :  { %v735_v39 = vpack.c.bf16 %v614_v33, %v613_v36 }
 0x2a0   :  { %2796 = vmatmul.msk.bf16.vlgmr.msrb.gmra.mxu2 %vm640_vm12, %v735_v39  ;;  %2800 = vmatmul.msk.bf16.vlgmr.msrb.gmra.mxu3 %vm640_vm12, %v735_v39 }
 0x2a3   :  { %v594_v43 = vpop.f32.mrf.mxu3 }
 0x2a4   :  { %v615_v44 = vmax.f32 %v594_v43, 0.0 }
 0x2a6   :  { %v627_v45 = vpack.c.bf16 %v615_v44, %v614_v33 }
 0x2a8   :  { %2779 = vmatmul.msk.bf16.gmra.mxu0 %vm640_vm12, %v627_v45  ;;  %2783 = vmatmul.msk.bf16.gmra.mxu1 %vm640_vm12, %v627_v45 }
 0x2ab   :  { %v597_v63 = vpop.f32.mrf.mxu3 }
 0x2ac   :  { %v616_v46 = vmax.f32 %v597_v63, 0.0 }
 0x2ae   :  { %v736_v48 = vpack.c.bf16 %v616_v46, %v615_v44 }
 0x2b0   :  { %2797 = vmatmul.msk.bf16.gmra.mxu2 %vm640_vm12, %v736_v48  ;;  %2801 = vmatmul.msk.bf16.gmra.mxu3 %vm640_vm12, %v736_v48 }
 0x2b3   :  { %v599_v52 = vpop.f32.mrf.mxu3 }
 0x2b4   :  { %v617_v53 = vmax.f32 %v599_v52, 0.0 }
 0x2b6   :  { %v628_v54 = vpack.c.bf16 %v617_v53, %v616_v46 }
 0x2b8   :  { %2780 = vmatmul.msk.bf16.gmra.mxu0 %vm640_vm12, %v628_v54  ;;  %2784 = vmatmul.msk.bf16.gmra.mxu1 %vm640_vm12, %v628_v54 }
 0x2bb   :  { %v602_v55 = vpop.f32.mrf.mxu3 }
 0x2bc   :  { %v618_v56 = vmax.f32 %v602_v55, 0.0 }
 0x2be   :  { %v737_v57 = vpack.c.bf16 %v618_v56, %v617_v53 }
 0x2c0   :  { %2798 = vmatmul.msk.bf16.gmra.mxu2 %vm640_vm12, %v737_v57  ;;  %2802 = vmatmul.msk.bf16.gmra.mxu3 %vm640_vm12, %v737_v57 }
 0x2c3   :  { %v604_v17 = vpop.f32.mrf.mxu3 }
 0x2c4   :  { %v619_v58 = vmax.f32 %v604_v17, 0.0 }
 0x2c6   :  { %v629_v59 = vpack.c.bf16 %v619_v58, %v618_v56 }
 0x2c8   :  { %2781 = vmatmul.msk.bf16.gmra.mxu0 %vm640_vm12, %v629_v59  ;;  %2785 = vmatmul.msk.bf16.gmra.mxu1 %vm640_vm12, %v629_v59 }
 0x2cb   :  { %v607_v60 = vpop.f32.mrf.mxu3 }
 0x2cc   :  { %v620_v35 = vmax.f32 %v607_v60, 0.0 }
 0x2ce   :  { %v738_v62 = vpack.c.bf16 %v620_v35, %v619_v58 }
 0x2d0   :  { %2799 = vmatmul.msk.bf16.gmra.mxu2 %vm640_vm12, %v738_v62  ;;  %2803 = vmatmul.msk.bf16.gmra.mxu3 %vm640_vm12, %v738_v62 }
 0x2d3   :  { %v609_v0 = vpop.f32.mrf.mxu3 }
 0x2d4   :  { %v621_v1 = vmax.f32 %v609_v0, 0.0 }
 0x2d6   :  { %v838_v2 = vpack.c.bf16 %v621_v1, %v620_v35 }
 0x2d8   :  { %2814 = vmatmul.msk.bf16.vlgmr.msra.gmra.mxu0 %vm640_vm12, %v627_v45  ;;  %2818 = vmatmul.msk.bf16.vlgmr.msra.gmra.mxu1 %vm640_vm12, %v627_v45 }
 0x2e8   :  { %2815 = vmatmul.msk.bf16.gmra.mxu0 %vm640_vm12, %v628_v54  ;;  %2819 = vmatmul.msk.bf16.gmra.mxu1 %vm640_vm12, %v628_v54 }
 0x2f8   :  { %2816 = vmatmul.msk.bf16.gmra.mxu0 %vm640_vm12, %v629_v59  ;;  %2820 = vmatmul.msk.bf16.gmra.mxu1 %vm640_vm12, %v629_v59 }
 0x308   :  { %2817 = vmatmul.msk.bf16.gmra.mxu0 %vm640_vm12, %v838_v2  ;;  %2821 = vmatmul.msk.bf16.gmra.mxu1 %vm640_vm12, %v838_v2 }
 0x315   :  { %v662_v6 = vpop.f32.mrf.mxu0  ;;  %v691_v7 = vpop.f32.mrf.mxu1 }
 0x316   :  { %v3681_v51 = vadd.f32 %v3678_v5, %v691_v7  ;;  %v716_v26 = vadd.f32 %v3703_v25, %v662_v6 }
 0x31d   :  { %v664_v8 = vpop.f32.mrf.mxu0  ;;  %v3683_v9 = vpop.f32.mrf.mxu1 }
 0x31e   :  { %v718_v24 = vadd.f32 %v3703_v25, %v664_v8 }
 0x323   :  { %v770_v16 = vpop.f32.mrf.mxu2 }
 0x324   :  { %v819_v27 = vadd.f32 %v770_v16, %v716_v26 }
 0x325   :  { %v667_v10 = vpop.f32.mrf.mxu0  ;;  %v696_v61 = vpop.f32.mrf.mxu1 }
 0x326   :  { %v3686_v3 = vadd.f32 %v3678_v5, %v696_v61  ;;  %v720_v40 = vadd.f32 %v3703_v25, %v667_v10 }
 0x32b   :  { %v772_v19 = vpop.f32.mrf.mxu2 }
 0x32c   :  { %v821_v32 = vadd.f32 %v772_v19, %v718_v24 }
 0x32d   :  { %v669_v11 = vpop.f32.mrf.mxu0  ;;  %v3688_v12 = vpop.f32.mrf.mxu1 }
 0x32e   :  { %v722_v48 = vadd.f32 %v3703_v25, %v669_v11 }
 0x333   :  { %v775_v30 = vpop.f32.mrf.mxu2 }
 0x334   :  { %v823_v41 = vadd.f32 %v775_v30, %v720_v40 }
 0x335   :  { %v672_v15 = vpop.f32.mrf.mxu0  ;;  %v3690_v13 = vpop.f32.mrf.mxu1 }
 0x336   :  { %v724_v35 = vadd.f32 %v3703_v25, %v672_v15 }
 0x33b   :  { %v777_v33 = vpop.f32.mrf.mxu2 }
 0x33c   :  { %v825_v50 = vadd.f32 %v777_v33, %v722_v48 }
 0x33d   :  { %v3692_v18 = vpop.f32.mrf.mxu0  ;;  %v3694_v14 = vpop.f32.mrf.mxu1 }
 0x343   :  { %v780_v49 = vpop.f32.mrf.mxu2 }
 0x344   :  { %v827_v6 = vadd.f32 %v780_v49, %v724_v35 }
 0x345   :  { %v3696_v20 = vpop.f32.mrf.mxu0  ;;  %v706_v21 = vpop.f32.mrf.mxu1 }
 0x346   :  { %v3699_v22 = vadd.f32 %v3678_v5, %v706_v21  ;;  %v728_v48 = vadd.f32 %v3703_v25, %v3696_v20 }
 0x34b   :  { %v782_v8 = vpop.f32.mrf.mxu2 }
 0x34d   :  { %v3701_v23 = vpop.f32.mrf.mxu0 }
 0x355   :  { %v861_v28 = vpop.f32.mrf.mxu0 }
 0x356   :  { %v3706_v29 = vadd.f32 %v861_v28, %v819_v27  ;;  %v726_v28 = vadd.f32 %v3703_v25, %v3692_v18 }
 0x358   :  { %v2822_v31 = vmul.f32 -1.442695, %v3706_v29 }
 0x35a   :  { %3336 = vpow2.f32 %v2822_v31 }
 0x35d   :  { %v863_v34 = vpop.f32.mrf.mxu0 }
 0x35e   :  { %v3710_v36 = vadd.f32 %v863_v34, %v821_v32 }
 0x360   :  { %v3337_v37 = vpop.eup %3336  ;;  %v2823_v38 = vmul.f32 -1.442695, %v3710_v36 }
 0x361   :  { %v950_v39 = vadd.f32 1.0, %v3337_v37  ;;  %v829_v37 = vadd.f32 %v782_v8, %v726_v28 }
 0x362   :  { %3338 = vpow2.f32 %v2823_v38 }
 0x363   :  { %3340 = vrcp.f32 %v950_v39  ;;  %v969_v54 = vand.u32 2147483648, %v950_v39  ;;  %v967_v57 = vand.u32 2147483647, %v950_v39  ;;  %vm963_vm14 = vweird.f32 %v950_v39 }
 0x365   :  { %v866_v42 = vpop.f32.mrf.mxu0  ;;  %v970_v0 = vor.u32 1.1754944e-38, %v969_v54  ;;  %vm968_vm0 = vcmp.eq.f32.partialorder %v967_v57, 8.507059e+37 }
 0x366   :  { %v3714_v43 = vadd.f32 %v866_v42, %v823_v41  ;;  %v785_v42 = vpop.f32.mrf.mxu2 }
 0x367   :  { %v831_v54 = vadd.f32 %v785_v42, %v728_v48 }
 0x368   :  { %v3339_v44 = vpop.eup %3338  ;;  %v2824_v45 = vmul.f32 -1.442695, %v3714_v43 }
 0x369   :  { %v3341_v63 = vpop.eup %3340  ;;  %v951_v46 = vadd.f32 1.0, %v3339_v44 }
 0x36a   :  { %3342 = vpow2.f32 %v2824_v45  ;;  %v959_v47 = vmul.f32 %v3341_v63, %v950_v39  ;;  %vm964_vm13 = vweird.f32 %v3341_v63 }
 0x36b   :  { %3344 = vrcp.f32 %v951_v46  ;;  %vm965_vm15 = vmor %vm963_vm14, %vm964_vm13  ;;  %v984_v61 = vand.u32 2147483648, %v951_v46  ;;  %v982_v15 = vand.u32 2147483647, %v951_v46  ;;  %vm978_vm2 = vweird.f32 %v951_v46 }
 0x36c   :  { %v960_v52 = vsub.f32 1.0, %v959_v47 }
 0x36d   :  { %v868_v53 = vpop.f32.mrf.mxu0  ;;  %v985_v31 = vor.u32 1.1754944e-38, %v984_v61  ;;  %vm983_vm4 = vcmp.eq.f32.partialorder %v982_v15, 8.507059e+37 }
 0x36e   :  { %v3718_v55 = vadd.f32 %v868_v53, %v825_v50  ;;  %v961_v56 = vmul.f32 %v3341_v63, %v960_v52 }
 0x370   :  { %v3343_v17 = vpop.eup %3342  ;;  %v2825_v58 = vmul.f32 -1.442695, %v3718_v55  ;;  %v962_v59 = vadd.f32 %v3341_v63, %v961_v56 }
 0x371   :  { %v3345_v60 = vpop.eup %3344  ;;  %v952_v62 = vadd.f32 1.0, %v3343_v17 }
 0x372   :  { %3346 = vpow2.f32 %v2825_v58  ;;  %v966_v1 = vsel %vm965_vm15, %v3341_v63, %v962_v59  ;;  %v974_v2 = vmul.f32 %v3345_v60, %v951_v46  ;;  %vm979_vm1 = vweird.f32 %v3345_v60 }
 0x373   :  { %3348 = vrcp.f32 %v952_v62  ;;  %v971_v4 = vsel %vm968_vm0, %v970_v0, %v966_v1  ;;  %vm980_vm3 = vmor %vm978_vm2, %vm979_vm1  ;;  %v999_v39 = vand.u32 2147483648, %v952_v62  ;;  %v997_v18 = vand.u32 2147483647, %v952_v62 }
 0x374   :  { %1086 = vrot.lane.b32.xlu1 %v971_v4, %s3424_s0  ;;  %v975_v7 = vsub.f32 1.0, %v974_v2  ;;  %vm993_vm6 = vweird.f32 %v952_v62  ;;  %v730_v1 = vadd.f32 %v3703_v25, %v3701_v23  ;;  %v787_v2 = vpop.f32.mrf.mxu2 }
 0x375   :  { %v871_v10 = vpop.f32.mrf.mxu0  ;;  %v1000_v49 = vor.u32 1.1754944e-38, %v999_v39  ;;  %vm998_vm8 = vcmp.eq.f32.partialorder %v997_v18, 8.507059e+37 }
 0x376   :  { %v3723_v11 = vadd.f32 %v871_v10, %v827_v6  ;;  %v976_v16 = vmul.f32 %v3345_v60, %v975_v7  ;;  %v833_v61 = vadd.f32 %v787_v2, %v730_v1 }
 0x378   :  { %v3347_v21 = vpop.eup %3346  ;;  %v2826_v19 = vmul.f32 -1.442695, %v3723_v11  ;;  %v977_v26 = vadd.f32 %v3345_v60, %v976_v16 }
 0x379   :  { %v3349_v27 = vpop.eup %3348  ;;  %v953_v30 = vadd.f32 1.0, %v3347_v21 }
 0x37a   :  { %3350 = vpow2.f32 %v2826_v19  ;;  %v981_v24 = vsel %vm980_vm3, %v3345_v60, %v977_v26  ;;  %v989_v32 = vmul.f32 %v3349_v27, %v952_v62  ;;  %vm994_vm5 = vweird.f32 %v3349_v27 }
 0x37b   :  { %3352 = vrcp.f32 %v953_v30  ;;  %v986_v34 = vsel %vm983_vm4, %v985_v31, %v981_v24  ;;  %vm995_vm7 = vmor %vm993_vm6, %vm994_vm5  ;;  %v1014_v17 = vand.u32 2147483648, %v953_v30  ;;  %v1012_v20 = vand.u32 2147483647, %v953_v30 }
 0x37c   :  { %1088 = vrot.lane.b32.xlu2 %v986_v34, %s3424_s0  ;;  %v990_v38 = vsub.f32 1.0, %v989_v32  ;;  %vm1008_vm11 = vweird.f32 %v953_v30 }
 0x37d   :  { %v873_v33 = vpop.f32.mrf.mxu0  ;;  %v1015_v6 = vor.u32 1.1754944e-38, %v1014_v17  ;;  %vm1013_vm14 = vcmp.eq.f32.partialorder %v1012_v20, 8.507059e+37 }
 0x37e   :  { %v3729_v40 = vadd.f32 %v873_v33, %v829_v37  ;;  %v991_v41 = vmul.f32 %v3349_v27, %v990_v38 }
 0x380   :  { %v3351_v44 = vpop.eup %3350  ;;  %v2827_v45 = vmul.f32 -1.442695, %v3729_v40  ;;  %v992_v63 = vadd.f32 %v3349_v27, %v991_v41 }
 0x381   :  { %v3353_v46 = vpop.eup %3352  ;;  %v954_v47 = vadd.f32 1.0, %v3351_v44 }
 0x382   :  { %3354 = vpow2.f32 %v2827_v45  ;;  %v996_v50 = vsel %vm995_vm7, %v3349_v27, %v992_v63  ;;  %v1004_v52 = vmul.f32 %v3353_v46, %v953_v30  ;;  %vm1009_vm9 = vweird.f32 %v3353_v46 }
 0x383   :  { %3356 = vrcp.f32 %v954_v47  ;;  %v1001_v53 = vsel %vm998_vm8, %v1000_v49, %v996_v50  ;;  %vm1010_vm13 = vmor %vm1008_vm11, %vm1009_vm9  ;;  %v1029_v21 = vand.u32 2147483648, %v954_v47  ;;  %v1027_v23 = vand.u32 2147483647, %v954_v47 }
 0x384   :  { %1090 = vrot.lane.b32.xlu0 %v1001_v53, %s3424_s0  ;;  %v1005_v56 = vsub.f32 1.0, %v1004_v52  ;;  %vm1023_vm0 = vweird.f32 %v954_v47 }
 0x385   :  { %v876_v57 = vpop.f32.mrf.mxu0  ;;  %v1030_v24 = vor.u32 1.1754944e-38, %v1029_v21  ;;  %vm1028_vm2 = vcmp.eq.f32.partialorder %v1027_v23, 8.507059e+37 }
 0x386   :  { %v3735_v58 = vadd.f32 %v876_v57, %v831_v54  ;;  %v1006_v59 = vmul.f32 %v3353_v46, %v1005_v56 }
 0x388   :  { %v3355_v60 = vpop.eup %3354  ;;  %v2828_v35 = vmul.f32 -1.442695, %v3735_v58  ;;  %v1007_v62 = vadd.f32 %v3353_v46, %v1006_v59 }
 0x389   :  { %v3357_v0 = vpop.eup %3356  ;;  %v955_v4 = vadd.f32 1.0, %v3355_v60 }
 0x38a   :  { %3358 = vpow2.f32 %v2828_v35  ;;  %v1011_v7 = vsel %vm1010_vm13, %v3353_v46, %v1007_v62  ;;  %v1019_v8 = vmul.f32 %v3357_v0, %v954_v47  ;;  %vm1024_vm15 = vweird.f32 %v3357_v0 }
 0x38b   :  { %3360 = vrcp.f32 %v955_v4  ;;  %v1016_v10 = vsel %vm1013_vm14, %v1015_v6, %v1011_v7  ;;  %vm1025_vm1 = vmor %vm1023_vm0, %vm1024_vm15  ;;  %v1044_v33 = vand.u32 2147483648, %v955_v4  ;;  %v1042_v41 = vand.u32 2147483647, %v955_v4  ;;  %v708_v7 = vpop.f32.mrf.mxu1 }
 0x38c   :  { %1092 = vrot.lane.b32.xlu1 %v1016_v10, %s3424_s0  ;;  %v1020_v16 = vsub.f32 1.0, %v1019_v8  ;;  %vm1038_vm4 = vweird.f32 %v955_v4  ;;  %v799_v8 = vpop.f32.mrf.mxu3 }
 0x38d   :  { %v878_v15 = vpop.f32.mrf.mxu0  ;;  %v1045_v63 = vor.u32 1.1754944e-38, %v1044_v33  ;;  %vm1043_vm6 = vcmp.eq.f32.partialorder %v1042_v41, 8.507059e+37 }
 0x38e   :  { %v3741_v19 = vadd.f32 %v878_v15, %v833_v61  ;;  %v1021_v26 = vmul.f32 %v3357_v0, %v1020_v16 }
 0x390   :  { %v3359_v25 = vpop.eup %3358  ;;  %v2829_v27 = vmul.f32 -1.442695, %v3741_v19  ;;  %v1022_v28 = vadd.f32 %v3357_v0, %v1021_v26  ;;  %v719_v26 = vadd.f32 %v3678_v5, %v3683_v9 }
 0x391   :  { %v3361_v30 = vpop.eup %3360  ;;  %v956_v31 = vadd.f32 1.0, %v3359_v25 }
 0x392   :  { %3362 = vpow2.f32 %v2829_v27  ;;  %v1026_v32 = vsel %vm1025_vm1, %v3357_v0, %v1022_v28  ;;  %v1034_v34 = vmul.f32 %v3361_v30, %v955_v4  ;;  %vm1039_vm3 = vweird.f32 %v3361_v30 }
 0x393   :  { %3364 = vrcp.f32 %v956_v31  ;;  %v1031_v37 = vsel %vm1028_vm2, %v1030_v24, %v1026_v32  ;;  %vm1040_vm5 = vmor %vm1038_vm4, %vm1039_vm3  ;;  %v1059_v50 = vand.u32 2147483648, %v956_v31  ;;  %v1057_v53 = vand.u32 2147483647, %v956_v31  ;;  %v890_v10 = vpop.f32.mrf.mxu1 }
 0x394   :  { %1094 = vrot.lane.b32.xlu2 %v1031_v37, %s3424_s0  ;;  %v1035_v38 = vsub.f32 1.0, %v1034_v34  ;;  %vm1053_vm8 = vweird.f32 %v956_v31  ;;  %v801_v61 = vpop.f32.mrf.mxu3 }
 0x395   :  { %v1060_v57 = vor.u32 1.1754944e-38, %v1059_v50  ;;  %vm1058_vm11 = vcmp.eq.f32.partialorder %v1057_v53, 8.507059e+37  ;;  %v822_v23 = vadd.f32 %v801_v61, %v719_v26 }
 0x396   :  { %v1036_v39 = vmul.f32 %v3361_v30, %v1035_v38  ;;  %v820_v38 = vadd.f32 %v799_v8, %v3681_v51 }
 0x398   :  { %v3363_v18 = vpop.eup %3362  ;;  %v1037_v42 = vadd.f32 %v3361_v30, %v1036_v39  ;;  %v911_v39 = vadd.f32 %v890_v10, %v820_v38 }
 0x399   :  { %v3365_v44 = vpop.eup %3364  ;;  %v957_v45 = vadd.f32 1.0, %v3363_v18  ;;  %v725_v18 = vadd.f32 %v3678_v5, %v3690_v13 }
 0x39a   :  { %v1041_v46 = vsel %vm1040_vm5, %v3361_v30, %v1037_v42  ;;  %v1049_v48 = vmul.f32 %v3365_v44, %v956_v31  ;;  %vm1054_vm7 = vweird.f32 %v3365_v44 }
 0x39b   :  { %3366 = vrcp.f32 %v957_v45  ;;  %v1046_v47 = vsel %vm1043_vm6, %v1045_v63, %v1041_v46  ;;  %vm1055_vm9 = vmor %vm1053_vm8, %vm1054_vm7  ;;  %v1074_v35 = vand.u32 2147483648, %v957_v45  ;;  %v1072_v0 = vand.u32 2147483647, %v957_v45  ;;  %v892_v16 = vpop.f32.mrf.mxu1 }
 0x39c   :  { %1096 = vrot.lane.b32.xlu0 %v1046_v47, %s3424_s0  ;;  %v1050_v49 = vsub.f32 1.0, %v1049_v48  ;;  %vm1068_vm14 = vweird.f32 %v957_v45  ;;  %v804_v15 = vpop.f32.mrf.mxu3  ;;  %v913_v27 = vadd.f32 %v892_v16, %v822_v23 }
 0x39d   :  { %v1075_v2 = vor.u32 1.1754944e-38, %v1074_v35  ;;  %vm1073_vm0 = vcmp.eq.f32.partialorder %v1072_v0, 8.507059e+37  ;;  %v824_v13 = vadd.f32 %v804_v15, %v3686_v3 }
 0x39e   :  { %v1051_v52 = vmul.f32 %v3365_v44, %v1050_v49 }
 0x3a0   :  { %v1052_v54 = vadd.f32 %v3365_v44, %v1051_v52 }
 0x3a1   :  { %v3367_v56 = vpop.eup %3366 }
 0x3a2   :  { %v1056_v17 = vsel %vm1055_vm9, %v3365_v44, %v1052_v54  ;;  %v1064_v59 = vmul.f32 %v3367_v56, %v957_v45  ;;  %vm1069_vm13 = vweird.f32 %v3367_v56 }
 0x3a3   :  { %v1061_v20 = vsel %vm1058_vm11, %v1060_v57, %v1056_v17  ;;  %vm1070_vm15 = vmor %vm1068_vm14, %vm1069_vm13  ;;  %v895_v21 = vpop.f32.mrf.mxu1  ;;  %v723_v17 = vadd.f32 %v3678_v5, %v3688_v12 }
 0x3a4   :  { %1098 = vrot.lane.b32.xlu1 %v1061_v20, %s3424_s0  ;;  %v1065_v60 = vsub.f32 1.0, %v1064_v59  ;;  %v806_v31 = vpop.f32.mrf.mxu3  ;;  %v915_v53 = vadd.f32 %v895_v21, %v824_v13 }
 0x3a5   :  { %v826_v20 = vadd.f32 %v806_v31, %v723_v17 }
 0x3a6   :  { %v1066_v62 = vmul.f32 %v3367_v56, %v1065_v60 }
 0x3a8   :  { %v1067_v1 = vadd.f32 %v3367_v56, %v1066_v62 }
 0x3aa   :  { %v1071_v4 = vsel %vm1070_vm15, %v3367_v56, %v1067_v1  ;;  %v731_v1 = vadd.f32 %v3678_v5, %v708_v7 }
 0x3ab   :  { %v1076_v6 = vsel %vm1073_vm0, %v1075_v2, %v1071_v4  ;;  %v897_v32 = vpop.f32.mrf.mxu1 }
 0x3ac   :  { %1100 = vrot.lane.b32.xlu2 %v1076_v6, %s3424_s0  ;;  %v809_v37 = vpop.f32.mrf.mxu3  ;;  %v917_v35 = vadd.f32 %v897_v32, %v826_v20 }
 0x3ad   :  { %v828_v44 = vadd.f32 %v809_v37, %v725_v18 }
 0x3b3   :  { %v900_v9 = vpop.f32.mrf.mxu1 }
 0x3b4   :  { %v811_v63 = vpop.f32.mrf.mxu3  ;;  %v919_v51 = vadd.f32 %v900_v9, %v828_v44  ;;  %v3425_v9 = vmov 512.0  }
 0x3b5   :  { %3368 = vrcp.f32 %v3425_v9 }
 0x3bb   :  { %v902_v47 = vpop.f32.mrf.mxu1 }
 0x3bc   :  { %v814_v56 = vpop.f32.mrf.mxu3 }
 0x3c4   :  { %v816_v0 = vpop.f32.mrf.mxu3 }
 0x3c5   :  { %v834_v4 = vadd.f32 %v816_v0, %v731_v1 }
 0x3d6   :  { %v1089_v25 = vpop.permute.xlu2 %1088 }
 0x3d7   :  { %v1111_v28 = vadd.f32 %v1089_v25, %v3710_v36 }
 0x3d9   :  { %v3751_v30 = vadd.f32 %v1111_v28, %v913_v27 }
 0x3db   :  { %v1127_v24 = vmax.f32 %v3751_v30, 0.0 }
 0x3dd   :  { %v1137_v34 = vsel %vm482_vm10, %v1127_v24, 0.0 }
 0x3de   :  { %1138 = vadd.xlane.f32.xlu1 %v1137_v34 }
 0x3e6   :  { %v1087_v33 = vpop.permute.xlu1 %1086 }
 0x3e7   :  { %v1110_v41 = vadd.f32 %v1087_v33, %v3706_v29 }
 0x3e9   :  { %v3759_v36 = vadd.f32 %v1110_v41, %v911_v39 }
 0x3eb   :  { %v1126_v42 = vmax.f32 %v3759_v36, 0.0 }
 0x3ed   :  { %v1134_v45 = vsel %vm482_vm10, %v1126_v42, 0.0 }
 0x3ee   :  { %v1095_v46 = vpop.permute.xlu2 %1094  ;;  %1135 = vadd.xlane.f32.xlu0 %v1134_v45 }
 0x3ef   :  { %v1114_v48 = vadd.f32 %v1095_v46, %v3723_v11  ;;  %v905_v11 = vpop.f32.mrf.mxu1 }
 0x3f1   :  { %v3768_v29 = vadd.f32 %v1114_v48, %v919_v51 }
 0x3f3   :  { %v1130_v49 = vmax.f32 %v3768_v29, 0.0 }
 0x3f5   :  { %v1146_v50 = vsel %vm482_vm10, %v1130_v49, 0.0 }
 0x3f6   :  { %v1091_v52 = vpop.permute.xlu0 %1090  ;;  %1147 = vadd.xlane.f32.xlu0 %v1146_v50 }
 0x3f7   :  { %v1112_v54 = vadd.f32 %v1091_v52, %v3714_v43  ;;  %v907_v12 = vpop.f32.mrf.mxu1 }
 0x3f8   :  { %v925_v10 = vadd.f32 %v907_v12, %v834_v4 }
 0x3f9   :  { %v3776_v57 = vadd.f32 %v1112_v54, %v915_v53 }
 0x3fb   :  { %v1128_v59 = vmax.f32 %v3776_v57, 0.0 }
 0x3fd   :  { %v1140_v3 = vsel %vm482_vm10, %v1128_v59, 0.0 }
 0x3fe   :  { %v1093_v60 = vpop.permute.xlu1 %1092  ;;  %1141 = vadd.xlane.f32.xlu2 %v1140_v3 }
 0x3ff   :  { %v1113_v62 = vadd.f32 %v1093_v60, %v3718_v55  ;;  %v727_v55 = vadd.f32 %v3678_v5, %v3694_v14 }
 0x401   :  { %v3785_v43 = vadd.f32 %v1113_v62, %v917_v35  ;;  %v830_v15 = vadd.f32 %v811_v63, %v727_v55  ;;  %v2857_v55 = vld [vmem:[%s4415_s4 + $0x40] sm:$0xf] }
 0x403   :  { %v1129_v2 = vmax.f32 %v3785_v43, 0.0  ;;  %v921_v23 = vadd.f32 %v902_v47, %v830_v15  ;;  %v3229_v15 = vld [vmem:[%s4415_s4 + $0x44] sm:$0xf] }
 0x405   :  { %v1143_v6 = vsel %vm482_vm10, %v1129_v2, 0.0 }
 0x406   :  { %1144 = vadd.xlane.f32.xlu2 %v1143_v6  ;;  %v1101_v8 = vpop.permute.xlu2 %1100 }
 0x407   :  { %v1117_v61 = vadd.f32 %v1101_v8, %v3741_v19  ;;  %v832_v19 = vadd.f32 %v814_v56, %v3699_v22 }
 0x409   :  { %v3793_v16 = vadd.f32 %v1117_v61, %v925_v10  ;;  %v923_v14 = vadd.f32 %v905_v11, %v832_v19 }
 0x40b   :  { %v1133_v7 = vmax.f32 %v3793_v16, 0.0 }
 0x40d   :  { %v1155_v21 = vsel %vm482_vm10, %v1133_v7, 0.0 }
 0x40e   :  { %v1097_v26 = vpop.permute.xlu0 %1096  ;;  %1156 = vadd.xlane.f32.xlu0 %v1155_v21 }
 0x40f   :  { %v1115_v25 = vadd.f32 %v1097_v26, %v3729_v40  ;;  %v3369_v40 = vpop.eup %3368  ;;  %v2859_v26 = vld [vmem:[%s4415_s4 + $0x48] sm:$0xf0] }
 0x410   :  { %v1166_v41 = vmul.f32 512.0, %v3369_v40  ;;  %vm1170_vm1 = vweird.f32 %v3369_v40 }
 0x411   :  { %v1123_v27 = vadd.f32 %v1115_v25, %v921_v23  ;;  %v3237_v23 = vld [vmem:[%s4415_s4 + $0xe4] sm:$0xf]  ;;  %v2905_v25 = vld [vmem:[%s4415_s4 + $0xe8] sm:$0xf0] }
 0x412   :  { %v1167_v45 = vsub.f32 1.0, %v1166_v41  ;;  %v2908_v19 = vor.u32 %v3237_v23, %v2905_v25 }
 0x413   :  { %v1131_v28 = vmax.f32 %v1123_v27, 0.0 }
 0x414   :  { %v1168_v48 = vmul.f32 %v3369_v40, %v1167_v45  ;;  %1455 = vmatpush.bf16.msrb.mxu0 %v2908_v19  ;;  %v3244_v45 = vld [vmem:[%s4415_s4 + $0x174] sm:$0xf0] }
 0x415   :  { %v1149_v31 = vsel %vm482_vm10, %v1131_v28, 0.0 }
 0x416   :  { %1150 = vadd.xlane.f32.xlu1 %v1149_v31  ;;  %v1099_v5 = vpop.permute.xlu1 %1098  ;;  %v1169_v13 = vadd.f32 %v3369_v40, %v1168_v48  ;;  %v2949_v31 = vld [vmem:[%s4415_s4 + $0x180] sm:$0xf]  ;;  %v3226_v48 = vld [vmem:[%s4415_s4 + $0x24] sm:$0xf0] }
 0x417   :  { %v1116_v32 = vadd.f32 %v1099_v5, %v3735_v58  ;;  %v3246_v5 = vld [vmem:[%s4415_s4 + $0x184] sm:$0xf0] }
 0x418   :  { %v3806_v56 = vsel %vm1170_vm1, %v3369_v40, %v1169_v13  ;;  %v3235_v40 = vld [vmem:[%s4415_s4 + $0xd4] sm:$0xf]  ;;  %v2843_v13 = vld [vmem:[%s4415_s4 + $0x28] sm:$0xf0] }
 0x419   :  { %v1124_v34 = vadd.f32 %v1116_v32, %v923_v14  ;;  %v2950_v32 = vor.u32 %v3246_v5, %v2949_v31 }
 0x41b   :  { %v1132_v37 = vmax.f32 %v1124_v34, 0.0  ;;  %v2849_v34 = vld [vmem:[%s4415_s4 + $0x30] sm:$0xf]  ;;  %1543 = vmatpush.bf16.msrb.mxu1 %v2950_v32 }
 0x41d   :  { %v1152_v38 = vsel %vm482_vm10, %v1132_v37, 0.0 }
 0x41e   :  { %1153 = vadd.xlane.f32.xlu2 %v1152_v38  ;;  %v3227_v38 = vld [vmem:[%s4415_s4 + $0x34] sm:$0xf] }
 0x451   :  { %v1139_v18 = vpop.xlane.xlu1 %1138 }
 0x461   :  { %v1136_v39 = vpop.xlane.xlu0 %1135 }
 0x462   :  { %v1158_v22 = vadd.f32 %v1139_v18, %v1136_v39  ;;  %v2897_v39 = vld [vmem:[%s4415_s4 + $0xd8] sm:$0xf0] }
 0x469   :  { %v1148_v51 = vpop.xlane.xlu0 %1147 }
 0x471   :  { %v1142_v33 = vpop.xlane.xlu2 %1141 }
 0x472   :  { %v1159_v63 = vadd.f32 %v1158_v22, %v1142_v33  ;;  %v2851_v33 = vld [vmem:[%s4415_s4 + $0x38] sm:$0xf0]  ;;  %v2900_v22 = vor.u32 %v3235_v40, %v2897_v39 }
 0x473   :  { %v2854_v18 = vor.u32 %v3227_v38, %v2851_v33 }
 0x474   :  { %1456 = vmatpush.bf16.msrb.mxu0 %v2900_v22  ;;  %v2903_v22 = vld [vmem:[%s4415_s4 + $0xe0] sm:$0xf] }
 0x479   :  { %v1145_v44 = vpop.xlane.xlu2 %1144 }
 0x47a   :  { %v1160_v46 = vadd.f32 %v1159_v63, %v1145_v44  ;;  %v2941_v44 = vld [vmem:[%s4415_s4 + $0x170] sm:$0xf] }
 0x47c   :  { %v1161_v47 = vadd.f32 %v1160_v46, %v1148_v51  ;;  %v2942_v46 = vor.u32 %v3244_v45, %v2941_v44  ;;  %v2841_v51 = vld [vmem:[%s4415_s4 + $0x20] sm:$0xf]  ;;  %v3238_v44 = vld [vmem:[%s4415_s4 + $0xe4] sm:$0xf0]  ;;  %v2895_v45 = vld [vmem:[%s4415_s4 + $0xd0] sm:$0xf] }
 0x47e   :  { %1544 = vmatpush.bf16.msrb.mxu1 %v2942_v46  ;;  %v3243_v46 = vld [vmem:[%s4415_s4 + $0x174] sm:$0xf] }
 0x481   :  { %v1157_v54 = vpop.xlane.xlu0 %1156 }
 0x489   :  { %v1151_v58 = vpop.xlane.xlu1 %1150 }
 0x48a   :  { %v1162_v50 = vadd.f32 %v1161_v47, %v1151_v58  ;;  %v3225_v58 = vld [vmem:[%s4415_s4 + $0x24] sm:$0xf]  ;;  %v2842_v47 = vor.u32 %v3226_v48, %v2841_v51  ;;  %v2943_v48 = vld [vmem:[%s4415_s4 + $0x178] sm:$0xf0] }
 0x491   :  { %v1154_v52 = vpop.xlane.xlu2 %1153 }
 0x492   :  { %v1163_v53 = vadd.f32 %v1162_v50, %v1154_v52  ;;  %v3233_v50 = vld [vmem:[%s4415_s4 + $0xc4] sm:$0xf]  ;;  %v2889_v52 = vld [vmem:[%s4415_s4 + $0xc8] sm:$0xf0] }
 0x494   :  { %v1164_v11 = vadd.f32 %v1163_v53, %v1157_v54  ;;  %v2846_v54 = vor.u32 %v3225_v58, %v2843_v13  ;;  %v2946_v58 = vor.u32 %v3243_v46, %v2943_v48  ;;  %v3234_v13 = vld [vmem:[%s4415_s4 + $0xc4] sm:$0xf0] }
 0x496   :  { %v1172_v17 = vmul.f32 %v3806_v56, %v1164_v11  ;;  %v2892_v11 = vor.u32 %v3233_v50, %v2889_v52  ;;  %v3241_v50 = vld [vmem:[%s4415_s4 + $0x164] sm:$0xf]  ;;  %v2935_v52 = vld [vmem:[%s4415_s4 + $0x168] sm:$0xf0] }
 0x498   :  { %v3811_v20 = vsub.f32 %v1128_v59, %v1172_v17  ;;  %v3815_v3 = vsub.f32 %v1127_v24, %v1172_v17  ;;  %v3819_v60 = vsub.f32 %v1126_v42, %v1172_v17  ;;  %v3827_v57 = vsub.f32 %v1131_v28, %v1172_v17  ;;  %1457 = vmatpush.bf16.msrb.mxu0 %v2892_v11  ;;  %v2879_v11 = vld [vmem:[%s4415_s4 + $0xb0] sm:$0xf] }
 0x499   :  { %v3834_v36 = vsub.f32 %v1130_v49, %v1172_v17  ;;  %v3838_v42 = vsub.f32 %v1129_v2, %v1172_v17  ;;  %v3850_v6 = vsub.f32 %v1133_v7, %v1172_v17  ;;  %v3853_v2 = vsub.f32 %v1132_v37, %v1172_v17  ;;  %v3230_v7 = vld [vmem:[%s4415_s4 + $0x44] sm:$0xf0]  ;;  %v3228_v37 = vld [vmem:[%s4415_s4 + $0x34] sm:$0xf0]  ;;  %v2933_v17 = vld [vmem:[%s4415_s4 + $0x160] sm:$0xf] }
 0x49a   :  { %v1183_v35 = vmul.f32 %v3811_v20, %v3811_v20  ;;  %v1182_v62 = vmul.f32 %v3815_v3, %v3815_v3  ;;  %v1181_v0 = vmul.f32 %v3819_v60, %v3819_v60  ;;  %v1186_v1 = vmul.f32 %v3827_v57, %v3827_v57 }
 0x49b   :  { %v1185_v12 = vmul.f32 %v3834_v36, %v3834_v36  ;;  %v1184_v4 = vmul.f32 %v3838_v42, %v3838_v42  ;;  %v1188_v8 = vmul.f32 %v3850_v6, %v3850_v6  ;;  %v1187_v10 = vmul.f32 %v3853_v2, %v3853_v2 }
 0x49c   :  { %v1195_v59 = vsel %vm482_vm10, %v1183_v35, 0.0  ;;  %v1192_v30 = vsel %vm482_vm10, %v1182_v62, 0.0  ;;  %v1189_v24 = vsel %vm482_vm10, %v1181_v0, 0.0  ;;  %v1204_v29 = vsel %vm482_vm10, %v1186_v1, 0.0  ;;  %v3242_v35 = vld [vmem:[%s4415_s4 + $0x164] sm:$0xf0] }
 0x49d   :  { %1196 = vadd.xlane.f32.xlu0 %v1195_v59  ;;  %1193 = vadd.xlane.f32.xlu2 %v1192_v30  ;;  %v1201_v49 = vsel %vm482_vm10, %v1185_v12, 0.0  ;;  %v1198_v43 = vsel %vm482_vm10, %v1184_v4, 0.0  ;;  %v1210_v61 = vsel %vm482_vm10, %v1188_v8, 0.0  ;;  %v1207_v16 = vsel %vm482_vm10, %v1187_v10, 0.0  ;;  %v3224_v1 = vld [vmem:[%s4415_s4 + $0x14] sm:$0xf0] }
 0x49e   :  { %1190 = vadd.xlane.f32.xlu1 %v1189_v24  ;;  %v2858_v21 = vor.u32 %v3230_v7, %v2857_v55  ;;  %v2862_v28 = vor.u32 %v3229_v15, %v2859_v26  ;;  %v2850_v9 = vor.u32 %v3228_v37, %v2849_v34  ;;  %v2934_v59 = vor.u32 %v3242_v35, %v2933_v17  ;;  %v2833_v24 = vld [vmem:[%s4415_s4 + $0x10] sm:$0xf]  ;;  %v3223_v12 = vld [vmem:[%s4415_s4 + $0x14] sm:$0xf]  ;;  %v3240_v55 = vld [vmem:[%s4415_s4 + $0x154] sm:$0xf0] }
 0x49f   :  { %v2834_v4 = vor.u32 %v3224_v1, %v2833_v24  ;;  %v3232_v17 = vld [vmem:[%s4415_s4 + $0xb4] sm:$0xf0]  ;;  %v3239_v35 = vld [vmem:[%s4415_s4 + $0x154] sm:$0xf] }
 0x4a0   :  { %1306 = vmatpush.bf16.msra.mxu2 %v2858_v21  ;;  %1330 = vmatpush.bf16.msra.mxu3 %v2862_v28 }
 0x4a1   :  { %1545 = vmatpush.bf16.msrb.mxu1 %v2934_v59 }
 0x4a4   :  { %1307 = vmatpush.bf16.msra.mxu2 %v2850_v9  ;;  %1331 = vmatpush.bf16.msra.mxu3 %v2854_v18 }
 0x4a5   :  { %1205 = vadd.xlane.f32.xlu0 %v1204_v29  ;;  %1202 = vadd.xlane.f32.xlu2 %v1201_v49  ;;  %v2835_v29 = vld [vmem:[%s4415_s4 + $0x18] sm:$0xf0]  ;;  %v3231_v49 = vld [vmem:[%s4415_s4 + $0xb4] sm:$0xf] }
 0x4a6   :  { %1199 = vadd.xlane.f32.xlu1 %v1198_v43  ;;  %v2881_v43 = vld [vmem:[%s4415_s4 + $0xb8] sm:$0xf0]  ;;  %v2838_v10 = vor.u32 %v3223_v12, %v2835_v29 }
 0x4a8   :  { %1308 = vmatpush.bf16.msra.mxu2 %v2842_v47  ;;  %1332 = vmatpush.bf16.msra.mxu3 %v2846_v54  ;;  %v2887_v47 = vld [vmem:[%s4415_s4 + $0xc0] sm:$0xf]  ;;  %v2938_v54 = vor.u32 %v3241_v50, %v2935_v52 }
 0x4ac   :  { %1309 = vmatpush.bf16.msra.mxu2 %v2834_v4  ;;  %1333 = vmatpush.bf16.msra.mxu3 %v2838_v10 }
 0x4ad   :  { %1211 = vadd.xlane.f32.xlu2 %v1210_v61  ;;  %v2884_v61 = vor.u32 %v3231_v49, %v2881_v43 }
 0x4ae   :  { %1208 = vadd.xlane.f32.xlu1 %v1207_v16  ;;  %v2925_v16 = vld [vmem:[%s4415_s4 + $0x150] sm:$0xf] }
 0x4af   :  { %v2926_v7 = vor.u32 %v3240_v55, %v2925_v16  ;;  %1458 = vmatpush.bf16.msrb.mxu0 %v2884_v61  ;;  %v4035_v61 = vld [vmem:[%s4412_s5 + $0x2] ss:$8 sm:$0x3] }
 0x4b0   :  { %v4040_v55 = vperm.slane %v4035_v61, 0 }
 0x4b1   :  { %1546 = vmatpush.bf16.msrb.mxu1 %v2926_v7 }
 0x510   :  { %v1194_v27 = vpop.xlane.xlu2 %1193  ;;  %v1197_v63 = vpop.xlane.xlu0 %1196 }
 0x511   :  { %v1191_v14 = vpop.xlane.xlu1 %1190 }
 0x512   :  { %v1213_v41 = vadd.f32 %v1194_v27, %v1191_v14 }
 0x514   :  { %v1214_v53 = vadd.f32 %v1213_v41, %v1197_v63  ;;  %v3236_v63 = vld [vmem:[%s4415_s4 + $0xd4] sm:$0xf0] }
 0x515   :  { %v2896_v51 = vor.u32 %v3236_v63, %v2895_v45 }
 0x518   :  { %v1203_v62 = vpop.xlane.xlu2 %1202  ;;  %v1206_v15 = vpop.xlane.xlu0 %1205 }
 0x519   :  { %v1200_v0 = vpop.xlane.xlu1 %1199 }
 0x51a   :  { %v1215_v30 = vadd.f32 %v1214_v53, %v1200_v0  ;;  %v2888_v53 = vor.u32 %v3234_v13, %v2887_v47  ;;  %v2880_v0 = vor.u32 %v3232_v17, %v2879_v11 }
 0x51c   :  { %v1216_v8 = vadd.f32 %v1215_v30, %v1203_v62  ;;  %v2927_v62 = vld [vmem:[%s4415_s4 + $0x158] sm:$0xf0] }
 0x51d   :  { %v2930_v24 = vor.u32 %v3239_v35, %v2927_v62 }
 0x51e   :  { %v1217_v21 = vadd.f32 %v1216_v8, %v1206_v15 }
 0x520   :  { %v1212_v25 = vpop.xlane.xlu2 %1211 }
 0x521   :  { %v1209_v26 = vpop.xlane.xlu1 %1208 }
 0x522   :  { %v1218_v23 = vadd.f32 %v1217_v21, %v1209_v26 }
 0x524   :  { %v1219_v27 = vadd.f32 %v1218_v23, %v1212_v25 }
 0x526   :  { %v1220_v28 = vmul.f32 %v1219_v27, %v3806_v56 }
 0x528   :  { %v1221_v19 = vadd.f32 1e-05, %v1220_v28 }
 0x52a   :  { %3370 = vrsqrt.f32 %v1221_v19  ;;  %vm1228_vm3 = vweird.f32 %v1221_v19 }
 0x530   :  { %v3371_v31 = vpop.eup %3370 }
 0x531   :  { %v1223_v5 = vmul.f32 %v3371_v31, %v1221_v19  ;;  %vm1229_vm2 = vweird.f32 %v3371_v31 }
 0x532   :  { %vm1230_vm4 = vmor %vm1228_vm3, %vm1229_vm2 }
 0x533   :  { %v1224_v14 = vmul.f32 %v3371_v31, %v1223_v5 }
 0x535   :  { %v1225_v32 = vmul.f32 0.5, %v1224_v14 }
 0x537   :  { %v1226_v34 = vsub.f32 1.5, %v1225_v32 }
 0x539   :  { %v1227_v37 = vmul.f32 %v3371_v31, %v1226_v34 }
 0x53b   :  { %v1231_v38 = vsel %vm1230_vm4, %v3371_v31, %v1227_v37 }
 0x53c   :  { %v1232_v9 = vmul.f32 %v1231_v38, %v3819_v60  ;;  %v1233_v33 = vmul.f32 %v1231_v38, %v3815_v3  ;;  %v1234_v40 = vmul.f32 %v1231_v38, %v3811_v20  ;;  %v1235_v56 = vmul.f32 %v1231_v38, %v3838_v42  ;;  %v3245_v60 = vld [vmem:[%s4415_s4 + $0x184] sm:$0xf]  ;;  %v2951_v3 = vld [vmem:[%s4415_s4 + $0x188] sm:$0xf0] }
 0x53d   :  { %v2904_v20 = vor.u32 %v3238_v44, %v2903_v22  ;;  %v2954_v42 = vor.u32 %v3245_v60, %v2951_v3  ;;  %v1236_v59 = vmul.f32 %v1231_v38, %v3834_v36  ;;  %v1237_v30 = vmul.f32 %v1231_v38, %v3827_v57 }
 0x53e   :  { %v1250_v39 = vpack.c.bf16 %v1233_v33, %v1232_v9  ;;  %v1375_v41 = vpack.c.bf16 %v1234_v40, %v1233_v33  ;;  %v1251_v18 = vpack.c.bf16 %v1235_v56, %v1234_v40  ;;  %v1238_v4 = vmul.f32 %v1231_v38, %v3853_v2 }
 0x53f   :  { %1431 = vmatpush.bf16.msrb.mxu2 %v2904_v20  ;;  %1567 = vmatpush.bf16.msrb.mxu3 %v2954_v42  ;;  %v1376_v1 = vpack.c.bf16 %v1236_v59, %v1235_v56  ;;  %v1252_v12 = vpack.c.bf16 %v1237_v30, %v1236_v59  ;;  %v1239_v36 = vmul.f32 %v1231_v38, %v3850_v6 }
 0x540   :  { %2863 = vmatmul.msk.bf16.vlgmr.msra.gmra.mxu2 %vm482_vm10, %v1250_v39  ;;  %2866 = vmatmul.msk.bf16.vlgmr.msra.gmra.mxu3 %vm482_vm10, %v1250_v39  ;;  %v1377_v29 = vpack.c.bf16 %v1238_v4, %v1237_v30 }
 0x541   :  { %2912 = vmatmul.msk.bf16.vlgmr.msrb.gmra.mxu0 %vm482_vm10, %v1375_v41  ;;  %2955 = vmatmul.msk.bf16.vlgmr.msrb.gmra.mxu1 %vm482_vm10, %v1251_v18  ;;  %v1495_v57 = vpack.c.bf16 %v1239_v36, %v1238_v4 }
 0x543   :  { %1432 = vmatpush.bf16.msrb.mxu2 %v2896_v51  ;;  %1568 = vmatpush.bf16.msrb.mxu3 %v2946_v58 }
 0x547   :  { %1433 = vmatpush.bf16.msrb.mxu2 %v2888_v53  ;;  %1569 = vmatpush.bf16.msrb.mxu3 %v2938_v54 }
 0x54b   :  { %1434 = vmatpush.bf16.msrb.mxu2 %v2880_v0  ;;  %1570 = vmatpush.bf16.msrb.mxu3 %v2930_v24 }
 0x550   :  { %2864 = vmatmul.msk.bf16.gmra.mxu2 %vm482_vm10, %v1251_v18  ;;  %2867 = vmatmul.msk.bf16.gmra.mxu3 %vm482_vm10, %v1251_v18 }
 0x551   :  { %2913 = vmatmul.msk.bf16.gmra.mxu0 %vm482_vm10, %v1376_v1  ;;  %2956 = vmatmul.msk.bf16.gmra.mxu1 %vm482_vm10, %v1252_v12 }
 0x560   :  { %2865 = vmatmul.msk.bf16.gmra.mxu2 %vm482_vm10, %v1252_v12  ;;  %2868 = vmatmul.msk.bf16.gmra.mxu3 %vm482_vm10, %v1252_v12 }
 0x561   :  { %2914 = vmatmul.msk.bf16.gmra.mxu0 %vm482_vm10, %v1377_v29  ;;  %2957 = vmatmul.msk.bf16.gmra.mxu1 %vm482_vm10, %v1495_v57 }
 0x570   :  { %2909 = vmatmul.msk.bf16.vlgmr.msrb.gmra.mxu2 %vm482_vm10, %v1375_v41  ;;  %2958 = vmatmul.msk.bf16.vlgmr.msrb.gmra.mxu3 %vm482_vm10, %v1251_v18 }
 0x580   :  { %2910 = vmatmul.msk.bf16.gmra.mxu2 %vm482_vm10, %v1376_v1  ;;  %2959 = vmatmul.msk.bf16.gmra.mxu3 %vm482_vm10, %v1252_v12 }
 0x590   :  { %2911 = vmatmul.msk.bf16.gmra.mxu2 %vm482_vm10, %v1377_v29  ;;  %2960 = vmatmul.msk.bf16.gmra.mxu3 %vm482_vm10, %v1495_v57 }
 0x5be   :  { %v1548_v10 = vpop.f32.mrf.mxu1 }
 0x5c3   :  { %v1311_v6 = vpop.f32.mrf.mxu2 }
 0x5c4   :  { %v1355_v7 = vadd.f32 %v4040_v55, %v1311_v6 }
 0x5c6   :  { %v1550_v26 = vpop.f32.mrf.mxu1 }
 0x5cb   :  { %v1313_v2 = vpop.f32.mrf.mxu2 }
 0x5cc   :  { %v1357_v27 = vadd.f32 %v4040_v55, %v1313_v2 }
 0x5ce   :  { %v1553_v5 = vpop.f32.mrf.mxu1 }
 0x5d3   :  { %v1316_v49 = vpop.f32.mrf.mxu2 }
 0x5d4   :  { %v1359_v37 = vadd.f32 %v4040_v55, %v1316_v49 }
 0x5d6   :  { %v1555_v41 = vpop.f32.mrf.mxu1 }
 0x5db   :  { %v1318_v43 = vpop.f32.mrf.mxu2 }
 0x5dc   :  { %v1361_v22 = vadd.f32 %v4040_v55, %v1318_v43 }
 0x5de   :  { %v1558_v11 = vpop.f32.mrf.mxu1 }
 0x5e3   :  { %v1321_v8 = vpop.f32.mrf.mxu2 }
 0x5e4   :  { %v1363_v13 = vadd.f32 %v4040_v55, %v1321_v8 }
 0x5eb   :  { %v4037_v16 = vpop.f32.mrf.mxu2 }
 0x5ec   :  { %v1365_v57 = vadd.f32 %v4040_v55, %v4037_v16 }
 0x5f3   :  { %v1436_v15 = vpop.f32.mrf.mxu2 }
 0x5f4   :  { %v1475_v21 = vadd.f32 %v1436_v15, %v1355_v7 }
 0x5f6   :  { %v4043_v23 = vadd.f32 %v1548_v10, %v1475_v21  ;;  %v1560_v21 = vpop.f32.mrf.mxu1 }
 0x5f8   :  { %v2961_v25 = vmul.f32 -1.442695, %v4043_v23 }
 0x5fa   :  { %3372 = vpow2.f32 %v2961_v25 }
 0x5fb   :  { %v1438_v28 = vpop.f32.mrf.mxu2 }
 0x5fc   :  { %v1477_v19 = vadd.f32 %v1438_v28, %v1357_v27 }
 0x5fe   :  { %v4047_v31 = vadd.f32 %v1550_v26, %v1477_v19 }
 0x600   :  { %v3373_v14 = vpop.eup %3372  ;;  %v2962_v32 = vmul.f32 -1.442695, %v4047_v31 }
 0x601   :  { %v1617_v34 = vadd.f32 1.0, %v3373_v14 }
 0x602   :  { %3374 = vpow2.f32 %v2962_v32 }
 0x603   :  { %3376 = vrcp.f32 %v1617_v34  ;;  %v1441_v38 = vpop.f32.mrf.mxu2  ;;  %v1634_v42 = vand.u32 2147483648, %v1617_v34  ;;  %v1632_v46 = vand.u32 2147483647, %v1617_v34  ;;  %vm1628_vm6 = vweird.f32 %v1617_v34 }
 0x604   :  { %v1479_v9 = vadd.f32 %v1441_v38, %v1359_v37 }
 0x605   :  { %v1635_v52 = vor.u32 1.1754944e-38, %v1634_v42  ;;  %vm1633_vm8 = vcmp.eq.f32.partialorder %v1632_v46, 8.507059e+37 }
 0x606   :  { %v4051_v33 = vadd.f32 %v1553_v5, %v1479_v9 }
 0x608   :  { %v3375_v40 = vpop.eup %3374  ;;  %v2963_v56 = vmul.f32 -1.442695, %v4051_v33 }
 0x609   :  { %v3377_v39 = vpop.eup %3376  ;;  %v1618_v18 = vadd.f32 1.0, %v3375_v40 }
 0x60a   :  { %3378 = vpow2.f32 %v2963_v56  ;;  %v1624_v44 = vmul.f32 %v3377_v39, %v1617_v34  ;;  %vm1629_vm5 = vweird.f32 %v3377_v39 }
 0x60b   :  { %3380 = vrcp.f32 %v1618_v18  ;;  %v1443_v60 = vpop.f32.mrf.mxu2  ;;  %vm1630_vm7 = vmor %vm1628_vm6, %vm1629_vm5  ;;  %v1649_v59 = vand.u32 2147483648, %v1618_v18  ;;  %v1647_v1 = vand.u32 2147483647, %v1618_v18  ;;  %vm1643_vm11 = vweird.f32 %v1618_v18 }
 0x60c   :  { %v1481_v20 = vadd.f32 %v1443_v60, %v1361_v22  ;;  %v1625_v3 = vsub.f32 1.0, %v1624_v44 }
 0x60d   :  { %v1650_v2 = vor.u32 1.1754944e-38, %v1649_v59  ;;  %vm1648_vm14 = vcmp.eq.f32.partialorder %v1647_v1, 8.507059e+37  ;;  %v1335_v1 = vpop.f32.mrf.mxu3 }
 0x60e   :  { %v4055_v45 = vadd.f32 %v1555_v41, %v1481_v20  ;;  %v1626_v63 = vmul.f32 %v3377_v39, %v1625_v3 }
 0x610   :  { %v3379_v51 = vpop.eup %3378  ;;  %v2964_v48 = vmul.f32 -1.442695, %v4055_v45  ;;  %v1627_v58 = vadd.f32 %v3377_v39, %v1626_v63 }
 0x611   :  { %v3381_v47 = vpop.eup %3380  ;;  %v1619_v50 = vadd.f32 1.0, %v3379_v51 }
 0x612   :  { %3382 = vpow2.f32 %v2964_v48  ;;  %v1631_v53 = vsel %vm1630_vm7, %v3377_v39, %v1627_v58  ;;  %v1639_v54 = vmul.f32 %v3381_v47, %v1618_v18  ;;  %vm1644_vm9 = vweird.f32 %v3381_v47 }
 0x613   :  { %3384 = vrcp.f32 %v1619_v50  ;;  %v1446_v17 = vpop.f32.mrf.mxu2  ;;  %v1636_v35 = vsel %vm1633_vm8, %v1635_v52, %v1631_v53  ;;  %vm1645_vm13 = vmor %vm1643_vm11, %vm1644_vm9  ;;  %v1664_v26 = vand.u32 2147483648, %v1619_v50  ;;  %v1662_v16 = vand.u32 2147483647, %v1619_v50 }
 0x614   :  { %v1483_v62 = vadd.f32 %v1446_v17, %v1363_v13  ;;  %1719 = vrot.lane.b32.xlu0 %v1636_v35, %s3424_s0  ;;  %v1640_v0 = vsub.f32 1.0, %v1639_v54  ;;  %vm1658_vm0 = vweird.f32 %v1619_v50 }
 0x615   :  { %v1665_v32 = vor.u32 1.1754944e-38, %v1664_v26  ;;  %vm1663_vm2 = vcmp.eq.f32.partialorder %v1662_v16, 8.507059e+37 }
 0x616   :  { %v4060_v30 = vadd.f32 %v1558_v11, %v1483_v62  ;;  %v1641_v24 = vmul.f32 %v3381_v47, %v1640_v0 }
 0x618   :  { %v3383_v12 = vpop.eup %3382  ;;  %v2965_v4 = vmul.f32 -1.442695, %v4060_v30  ;;  %v1642_v36 = vadd.f32 %v3381_v47, %v1641_v24 }
 0x619   :  { %v3385_v29 = vpop.eup %3384  ;;  %v1620_v6 = vadd.f32 1.0, %v3383_v12  ;;  %v1337_v12 = vpop.f32.mrf.mxu3 }
 0x61a   :  { %3386 = vpow2.f32 %v2965_v4  ;;  %v1646_v49 = vsel %vm1645_vm13, %v3381_v47, %v1642_v36  ;;  %v1654_v43 = vmul.f32 %v3385_v29, %v1619_v50  ;;  %vm1659_vm15 = vweird.f32 %v3385_v29 }
 0x61b   :  { %3388 = vrcp.f32 %v1620_v6  ;;  %v1448_v8 = vpop.f32.mrf.mxu2  ;;  %v1651_v10 = vsel %vm1648_vm14, %v1650_v2, %v1646_v49  ;;  %vm1660_vm1 = vmor %vm1658_vm0, %vm1659_vm15  ;;  %v1679_v40 = vand.u32 2147483648, %v1620_v6  ;;  %v1677_v39 = vand.u32 2147483647, %v1620_v6  ;;  %v3251_v2 = vld [vmem:[%s4413_s6 + $0x28] sm:$0xff] }
 0x61c   :  { %v1485_v7 = vadd.f32 %v1448_v8, %v1365_v57  ;;  %1721 = vrot.lane.b32.xlu1 %v1651_v10, %s3424_s0  ;;  %v1655_v15 = vsub.f32 1.0, %v1654_v43  ;;  %vm1673_vm4 = vweird.f32 %v1620_v6  ;;  %v3253_v57 = vld [vmem:[%s4413_s6 + $0x38] sm:$0xff]  ;;  %v3250_v43 = vld [vmem:[%s4413_s6 + $0x20] sm:$0xff]  ;;  %v1460_v8 = vpop.f32.mrf.mxu0 }
 0x61d   :  { %v1680_v60 = vor.u32 1.1754944e-38, %v1679_v40  ;;  %vm1678_vm6 = vcmp.eq.f32.partialorder %v1677_v39, 8.507059e+37  ;;  %1809 = vmatpush.bf16.msra.mxu2 %v3253_v57 }
 0x61e   :  { %v4066_v25 = vadd.f32 %v1560_v21, %v1485_v7  ;;  %v1656_v27 = vmul.f32 %v3385_v29, %v1655_v15  ;;  %v1352_v7 = vperm.slane %v4035_v61, 1 }
 0x620   :  { %v3387_v55 = vpop.eup %3386  ;;  %v2966_v28 = vmul.f32 -1.442695, %v4066_v25  ;;  %v1657_v19 = vadd.f32 %v3385_v29, %v1656_v27  ;;  %v1356_v26 = vadd.f32 %v1352_v7, %v1335_v1  ;;  %v1358_v16 = vadd.f32 %v1352_v7, %v1337_v12 }
 0x621   :  { %v3389_v5 = vpop.eup %3388  ;;  %v1621_v14 = vadd.f32 1.0, %v3387_v55  ;;  %v1340_v4 = vpop.f32.mrf.mxu3 }
 0x622   :  { %3390 = vpow2.f32 %v2966_v28  ;;  %v1661_v34 = vsel %vm1660_vm1, %v3385_v29, %v1657_v19  ;;  %v1669_v37 = vmul.f32 %v3389_v5, %v1620_v6  ;;  %vm1674_vm3 = vweird.f32 %v3389_v5  ;;  %v3252_v6 = vld [vmem:[%s4413_s6 + $0x30] sm:$0xff] }
 0x623   :  { %3392 = vrcp.f32 %v1621_v14  ;;  %v1666_v38 = vsel %vm1663_vm2, %v1665_v32, %v1661_v34  ;;  %vm1675_vm5 = vmor %vm1673_vm4, %vm1674_vm3  ;;  %v1694_v46 = vand.u32 2147483648, %v1621_v14  ;;  %v1692_v48 = vand.u32 2147483647, %v1621_v14  ;;  %1810 = vmatpush.bf16.msra.mxu2 %v3252_v6 }
 0x624   :  { %1723 = vrot.lane.b32.xlu2 %v1666_v38, %s3424_s0  ;;  %v1670_v9 = vsub.f32 1.0, %v1669_v37  ;;  %vm1688_vm8 = vweird.f32 %v1621_v14  ;;  %v1462_v15 = vpop.f32.mrf.mxu0  ;;  %v1476_v55 = vadd.f32 %v1460_v8, %v1356_v26  ;;  %vm1847_vm1 = vcmask 392192   ;;  %v3249_v26 = vld [vmem:[%s4416_s2 + $0x10] sm:$0xff] }
 0x625   :  { %v1695_v13 = vor.u32 1.1754944e-38, %v1694_v46  ;;  %vm1693_vm11 = vcmp.eq.f32.partialorder %v1692_v48, 8.507059e+37 }
 0x626   :  { %v1671_v56 = vmul.f32 %v3389_v5, %v1670_v9 }
 0x627   :  { %1811 = vmatpush.bf16.msra.mxu2 %v3251_v2 }
 0x628   :  { %v3391_v41 = vpop.eup %3390  ;;  %v1672_v18 = vadd.f32 %v3389_v5, %v1671_v56 }
 0x629   :  { %v3393_v22 = vpop.eup %3392  ;;  %v1622_v44 = vadd.f32 1.0, %v3391_v41  ;;  %v1342_v36 = vpop.f32.mrf.mxu3  ;;  %v1360_v41 = vadd.f32 %v1352_v7, %v1340_v4 }
 0x62a   :  { %v1676_v20 = vsel %vm1675_vm5, %v3389_v5, %v1672_v18  ;;  %v1684_v3 = vmul.f32 %v3393_v22, %v1621_v14  ;;  %vm1689_vm7 = vweird.f32 %v3393_v22  ;;  %v1478_v14 = vadd.f32 %v1462_v15, %v1358_v16  ;;  %v3255_v16 = vld [vmem:[%s4415_s4 + $0x54] sm:$0xf0] }
 0x62b   :  { %3394 = vrcp.f32 %v1622_v44  ;;  %v1681_v42 = vsel %vm1678_vm6, %v1680_v60, %v1676_v20  ;;  %vm1690_vm9 = vmor %vm1688_vm8, %vm1689_vm7  ;;  %v1709_v11 = vand.u32 2147483648, %v1622_v44  ;;  %v1707_v35 = vand.u32 2147483647, %v1622_v44  ;;  %1812 = vmatpush.bf16.msra.mxu2 %v3250_v43 }
 0x62c   :  { %1725 = vrot.lane.b32.xlu0 %v1681_v42, %s3424_s0  ;;  %v1685_v63 = vsub.f32 1.0, %v1684_v3  ;;  %vm1703_vm14 = vweird.f32 %v1622_v44  ;;  %v1465_v19 = vpop.f32.mrf.mxu0 }
 0x62d   :  { %v1710_v0 = vor.u32 1.1754944e-38, %v1709_v11  ;;  %vm1708_vm0 = vcmp.eq.f32.partialorder %v1707_v35, 8.507059e+37  ;;  %v1480_v60 = vadd.f32 %v1465_v19, %v1360_v41  ;;  %v3006_v19 = vld [vmem:[%s4415_s4 + $0x58] sm:$0xf0] }
 0x62e   :  { %v1686_v51 = vmul.f32 %v3393_v22, %v1685_v63  ;;  %v3020_v41 = vld [vmem:[%s4415_s4 + $0xf8] sm:$0xf0] }
 0x630   :  { %v1687_v58 = vadd.f32 %v3393_v22, %v1686_v51 }
 0x631   :  { %v3395_v47 = vpop.eup %3394  ;;  %v1345_v29 = vpop.f32.mrf.mxu3 }
 0x632   :  { %v1691_v50 = vsel %vm1690_vm9, %v3393_v22, %v1687_v58  ;;  %v1699_v52 = vmul.f32 %v3395_v47, %v1622_v44  ;;  %vm1704_vm13 = vweird.f32 %v3395_v47 }
 0x633   :  { %v1696_v53 = vsel %vm1693_vm11, %v1695_v13, %v1691_v50  ;;  %vm1705_vm15 = vmor %vm1703_vm14, %vm1704_vm13 }
 0x634   :  { %1727 = vrot.lane.b32.xlu1 %v1696_v53, %s3424_s0  ;;  %v1700_v54 = vsub.f32 1.0, %v1699_v52  ;;  %v1467_v18 = vpop.f32.mrf.mxu0  ;;  %v1364_v53 = vadd.f32 %v1352_v7, %v1345_v29 }
 0x636   :  { %v1701_v17 = vmul.f32 %v3395_v47, %v1700_v54 }
 0x638   :  { %v1702_v62 = vadd.f32 %v3395_v47, %v1701_v17 }
 0x639   :  { %v1347_v49 = vpop.f32.mrf.mxu3 }
 0x63a   :  { %v1706_v59 = vsel %vm1705_vm15, %v3395_v47, %v1702_v62  ;;  %v1366_v11 = vadd.f32 %v1352_v7, %v1347_v49 }
 0x63b   :  { %v1711_v24 = vsel %vm1708_vm0, %v1710_v0, %v1706_v59 }
 0x63c   :  { %1729 = vrot.lane.b32.xlu0 %v1711_v24, %s3424_s0  ;;  %v1470_v58 = vpop.f32.mrf.mxu0 }
 0x63d   :  { %v1484_v17 = vadd.f32 %v1470_v58, %v1364_v53 }
 0x641   :  { %v1572_v10 = vpop.f32.mrf.mxu3 }
 0x642   :  { %v1588_v5 = vadd.f32 %v1572_v10, %v1476_v55 }
 0x644   :  { %v1472_v35 = vpop.f32.mrf.mxu0 }
 0x645   :  { %v1486_v59 = vadd.f32 %v1472_v35, %v1366_v11 }
 0x649   :  { %v1574_v21 = vpop.f32.mrf.mxu3 }
 0x64a   :  { %v1590_v37 = vadd.f32 %v1574_v21, %v1478_v14  ;;  %v3248_v21 = vld [vmem:[%s4416_s2 + $0x8] sm:$0xff]  ;;  %v3032_v14 = vld [vmem:[%s4415_s4 + $0x190] sm:$0xf] }
 0x651   :  { %v1577_v32 = vpop.f32.mrf.mxu3 }
 0x652   :  { %v1592_v3 = vadd.f32 %v1577_v32, %v1480_v60  ;;  %v3259_v32 = vld [vmem:[%s4415_s4 + $0x194] sm:$0xf0] }
 0x659   :  { %v1579_v22 = vpop.f32.mrf.mxu3 }
 0x661   :  { %v1582_v47 = vpop.f32.mrf.mxu3 }
 0x662   :  { %v1596_v0 = vadd.f32 %v1582_v47, %v1484_v17  ;;  %v4155_v17 = vld [vmem:[%s4412_s5 + $0x3] ss:$8 sm:$0x3] }
 0x663   :  { %v1948_v35 = vperm.slane %v4155_v17, 0 }
 0x669   :  { %v1584_v62 = vpop.f32.mrf.mxu3 }
 0x67e   :  { %v1724_v44 = vpop.permute.xlu2 %1723 }
 0x67f   :  { %v1739_v20 = vadd.f32 %v1724_v44, %v4051_v33 }
 0x681   :  { %v1745_v51 = vadd.f32 %v1739_v20, %v1592_v3 }
 0x683   :  { %v1751_v13 = vmax.f32 %v1745_v51, 0.0 }
 0x686   :  { %v1720_v27 = vpop.permute.xlu0 %1719 }
 0x687   :  { %v1737_v28 = vadd.f32 %v1720_v27, %v4043_v23  ;;  %v1362_v23 = vadd.f32 %v1352_v7, %v1342_v36  ;;  %v3004_v27 = vld [vmem:[%s4415_s4 + $0x50] sm:$0xf] }
 0x688   :  { %v3005_v55 = vor.u32 %v3255_v16, %v3004_v27 }
 0x689   :  { %v1743_v38 = vadd.f32 %v1737_v28, %v1588_v5  ;;  %v1482_v42 = vadd.f32 %v1467_v18, %v1362_v23  ;;  %v3254_v28 = vld [vmem:[%s4415_s4 + $0x54] sm:$0xf] }
 0x68a   :  { %1916 = vmatpush.bf16.msra.mxu1 %v3005_v55  ;;  %v3009_v5 = vor.u32 %v3254_v28, %v3006_v19 }
 0x68b   :  { %v1749_v56 = vmax.f32 %v1743_v38, 0.0  ;;  %v1594_v46 = vadd.f32 %v1579_v22, %v1482_v42  ;;  %v3034_v38 = vld [vmem:[%s4415_s4 + $0x198] sm:$0xf0] }
 0x68c   :  { %1935 = vmatpush.bf16.msra.mxu3 %v3009_v5 }
 0x68e   :  { %v1722_v34 = vpop.permute.xlu1 %1721 }
 0x68f   :  { %v1738_v9 = vadd.f32 %v1722_v34, %v4047_v31  ;;  %v3258_v34 = vld [vmem:[%s4415_s4 + $0x194] sm:$0xf] }
 0x691   :  { %v1744_v40 = vadd.f32 %v1738_v9, %v1590_v37  ;;  %v3033_v37 = vor.u32 %v3259_v32, %v3032_v14  ;;  %v3037_v9 = vor.u32 %v3258_v34, %v3034_v38 }
 0x693   :  { %v1750_v61 = vmax.f32 %v1744_v40, 0.0  ;;  %2049 = vmatpush.bf16.msrb.mxu2 %v3033_v37  ;;  %v3018_v40 = vld [vmem:[%s4415_s4 + $0xf0] sm:$0xf] }
 0x695   :  { %v1769_v39 = vpack.c.bf16 %v1750_v61, %v1749_v56  ;;  %v3257_v56 = vld [vmem:[%s4415_s4 + $0xf4] sm:$0xf0]  ;;  %v3256_v61 = vld [vmem:[%s4415_s4 + $0xf4] sm:$0xf] }
 0x696   :  { %v3023_v22 = vor.u32 %v3256_v61, %v3020_v41 }
 0x697   :  { %2983 = vmatmul.msk.bf16.vlgmr.msra.gmra.mxu2 %vm482_vm10, %v1769_v39  ;;  %v3019_v39 = vor.u32 %v3257_v56, %v3018_v40 }
 0x698   :  { %2006 = vmatpush.bf16.msrb.mxu3 %v3023_v22 }
 0x699   :  { %1987 = vmatpush.bf16.msrb.mxu1 %v3019_v39 }
 0x69e   :  { %v1726_v63 = vpop.permute.xlu0 %1725 }
 0x69f   :  { %v1740_v31 = vadd.f32 %v1726_v63, %v4055_v45  ;;  %v1598_v45 = vadd.f32 %v1584_v62, %v1486_v59 }
 0x6a1   :  { %v1746_v48 = vadd.f32 %v1740_v31, %v1594_v46 }
 0x6a3   :  { %v1752_v50 = vmax.f32 %v1746_v48, 0.0 }
 0x6a5   :  { %v1770_v52 = vpack.c.bf16 %v1752_v50, %v1751_v13 }
 0x6a6   :  { %v1728_v54 = vpop.permute.xlu1 %1727 }
 0x6a7   :  { %2984 = vmatmul.msk.bf16.gmra.mxu2 %vm482_vm10, %v1770_v52  ;;  %v1741_v33 = vadd.f32 %v1728_v54, %v4060_v30 }
 0x6a9   :  { %v1747_v1 = vadd.f32 %v1741_v33, %v1596_v0 }
 0x6ab   :  { %v1753_v36 = vmax.f32 %v1747_v1, 0.0 }
 0x6ae   :  { %v1730_v24 = vpop.permute.xlu0 %1729 }
 0x6af   :  { %v1742_v12 = vadd.f32 %v1730_v24, %v4066_v25  ;;  %v3247_v25 = vld [vmem:[%s4416_s2] sm:$0xff] }
 0x6b1   :  { %v1748_v4 = vadd.f32 %v1742_v12, %v1598_v45 }
 0x6b3   :  { %v1754_v57 = vmax.f32 %v1748_v4, 0.0 }
 0x6b5   :  { %v1771_v29 = vpack.c.bf16 %v1754_v57, %v1753_v36 }
 0x6b7   :  { %2985 = vmatmul.msk.bf16.gmra.mxu2 %vm482_vm10, %v1771_v29 }
 0x71a   :  { %v1814_v6 = vpop.f32.mrf.mxu2 }
 0x722   :  { %v1816_v2 = vpop.f32.mrf.mxu2 }
 0x723   :  { %v1829_v15 = vpack.c.bf16 %v1816_v2, %v1814_v6 }
 0x72a   :  { %v1819_v49 = vpop.f32.mrf.mxu2 }
 0x732   :  { %v1821_v43 = vpop.f32.mrf.mxu2 }
 0x733   :  { %v1830_v7 = vpack.c.bf16 %v1821_v43, %v1819_v49 }
 0x73a   :  { %v1824_v30 = vpop.f32.mrf.mxu2 }
 0x742   :  { %v1826_v8 = vpop.f32.mrf.mxu2 }
 0x743   :  { %v1831_v10 = vpack.c.bf16 %v1826_v8, %v1824_v30 }
 0x745   :  { %1862 = vmatpush.bf16.msra.mxu0 %v1831_v10 }
 0x749   :  { %1863 = vmatpush.bf16.msra.mxu0 %v1830_v7 }
 0x74d   :  { %1864 = vmatpush.bf16.msra.mxu0 %v1829_v15 }
 0x750   :  { %2998 = vmatmul.msk.bf16.vlgmr.msra.gmra.mxu0 %vm1847_vm1, %v3247_v25 }
 0x751   :  { %2068 = vmatpush.bf16.msrb.mxu0 %v3037_v9 }
 0x760   :  { %2999 = vmatmul.msk.bf16.gmra.mxu0 %vm1847_vm1, %v3248_v21 }
 0x770   :  { %3000 = vmatmul.msk.bf16.gmra.mxu0 %vm1847_vm1, %v3249_v26 }
 0x7cd   :  { %v1866_v18 = vpop.f32.mrf.mxu0 }
 0x7ce   :  { %v1881_v23 = vmax.f32 %v1866_v18, 0.0 }
 0x7d5   :  { %v1868_v44 = vpop.f32.mrf.mxu0 }
 0x7d6   :  { %v1882_v60 = vmax.f32 %v1868_v44, 0.0 }
 0x7d8   :  { %v1891_v20 = vpack.c.bf16 %v1882_v60, %v1881_v23 }
 0x7da   :  { %3010 = vmatmul.msk.bf16.vlgmr.msra.gmra.mxu1 %vm640_vm12, %v1891_v20  ;;  %3012 = vmatmul.msk.bf16.vlgmr.msra.gmra.mxu3 %vm640_vm12, %v1891_v20 }
 0x7dd   :  { %v1871_v3 = vpop.f32.mrf.mxu0 }
 0x7de   :  { %v1883_v63 = vmax.f32 %v1871_v3, 0.0 }
 0x7e0   :  { %v1962_v13 = vpack.c.bf16 %v1883_v63, %v1882_v60 }
 0x7e5   :  { %v1873_v42 = vpop.f32.mrf.mxu0 }
 0x7e6   :  { %v1884_v46 = vmax.f32 %v1873_v42, 0.0 }
 0x7e8   :  { %v1892_v51 = vpack.c.bf16 %v1884_v46, %v1883_v63 }
 0x7ea   :  { %3011 = vmatmul.msk.bf16.gmra.mxu1 %vm640_vm12, %v1892_v51  ;;  %3013 = vmatmul.msk.bf16.gmra.mxu3 %vm640_vm12, %v1892_v51 }
 0x7eb   :  { %3038 = vmatmul.msk.bf16.vlgmr.msrb.gmra.mxu2 %vm640_vm12, %v1892_v51  ;;  %3040 = vmatmul.msk.bf16.vlgmr.msrb.gmra.mxu0 %vm640_vm12, %v1892_v51 }
 0x7ed   :  { %v1876_v31 = vpop.f32.mrf.mxu0 }
 0x7ee   :  { %v1885_v58 = vmax.f32 %v1876_v31, 0.0 }
 0x7f0   :  { %v1963_v52 = vpack.c.bf16 %v1885_v58, %v1884_v46 }
 0x7f5   :  { %v1878_v48 = vpop.f32.mrf.mxu0 }
 0x7f6   :  { %v1886_v47 = vmax.f32 %v1878_v48, 0.0 }
 0x7f8   :  { %v2028_v50 = vpack.c.bf16 %v1886_v47, %v1885_v58 }
 0x7fa   :  { %3024 = vmatmul.msk.bf16.vlgmr.msrb.gmra.mxu1 %vm640_vm12, %v1962_v13  ;;  %3026 = vmatmul.msk.bf16.vlgmr.msrb.gmra.mxu3 %vm640_vm12, %v1962_v13 }
 0x7fb   :  { %3039 = vmatmul.msk.bf16.gmra.mxu2 %vm640_vm12, %v2028_v50  ;;  %3041 = vmatmul.msk.bf16.gmra.mxu0 %vm640_vm12, %v2028_v50 }
 0x80a   :  { %3025 = vmatmul.msk.bf16.gmra.mxu1 %vm640_vm12, %v1963_v52  ;;  %3027 = vmatmul.msk.bf16.gmra.mxu3 %vm640_vm12, %v1963_v52 }
 0x857   :  { %v1918_v53 = vpop.f32.mrf.mxu1 }
 0x858   :  { %v1952_v0 = vadd.f32 %v1948_v35, %v1918_v53 }
 0x85f   :  { %v1920_v54 = vpop.f32.mrf.mxu1 }
 0x860   :  { %v1954_v4 = vadd.f32 %v1948_v35, %v1920_v54 }
 0x867   :  { %v1923_v11 = vpop.f32.mrf.mxu1 }
 0x868   :  { %v1956_v43 = vadd.f32 %v1948_v35, %v1923_v11 }
 0x86e   :  { %v2051_v62 = vpop.f32.mrf.mxu2 }
 0x86f   :  { %v1925_v33 = vpop.f32.mrf.mxu1 }
 0x870   :  { %v1958_v27 = vadd.f32 %v1948_v35, %v1925_v33 }
 0x876   :  { %v2053_v12 = vpop.f32.mrf.mxu2 }
 0x877   :  { %v1989_v59 = vpop.f32.mrf.mxu1 }
 0x878   :  { %v2018_v24 = vadd.f32 %v1989_v59, %v1952_v0 }
 0x87a   :  { %v4158_v45 = vadd.f32 %v2051_v62, %v2018_v24 }
 0x87c   :  { %v3042_v1 = vmul.f32 -1.442695, %v4158_v45 }
 0x87e   :  { %3396 = vpow2.f32 %v3042_v1  ;;  %v2056_v8 = vpop.f32.mrf.mxu2 }
 0x87f   :  { %v1991_v36 = vpop.f32.mrf.mxu1 }
 0x880   :  { %v2020_v57 = vadd.f32 %v1991_v36, %v1954_v4 }
 0x882   :  { %v4161_v29 = vadd.f32 %v2053_v12, %v2020_v57 }
 0x884   :  { %v3397_v6 = vpop.eup %3396  ;;  %v3043_v2 = vmul.f32 -1.442695, %v4161_v29 }
 0x885   :  { %v2100_v49 = vadd.f32 1.0, %v3397_v6  ;;  %v1937_v6 = vpop.f32.mrf.mxu3 }
 0x886   :  { %3398 = vpow2.f32 %v3043_v2  ;;  %v2058_v5 = vpop.f32.mrf.mxu2 }
 0x887   :  { %3400 = vrcp.f32 %v2100_v49  ;;  %v1994_v30 = vpop.f32.mrf.mxu1  ;;  %v2115_v14 = vand.u32 2147483648, %v2100_v49  ;;  %v2113_v37 = vand.u32 2147483647, %v2100_v49  ;;  %vm2109_vm2 = vweird.f32 %v2100_v49 }
 0x888   :  { %v2022_v10 = vadd.f32 %v1994_v30, %v1956_v43 }
 0x889   :  { %v2116_v39 = vor.u32 1.1754944e-38, %v2115_v14  ;;  %vm2114_vm4 = vcmp.eq.f32.partialorder %v2113_v37, 8.507059e+37 }
 0x88a   :  { %v4164_v7 = vadd.f32 %v2056_v8, %v2022_v10  ;;  %v1949_v8 = vperm.slane %v4155_v17, 1  ;;  %v2070_v10 = vpop.f32.mrf.mxu0 }
 0x88c   :  { %v3399_v15 = vpop.eup %3398  ;;  %v3044_v25 = vmul.f32 -1.442695, %v4164_v7 }
 0x88d   :  { %v3401_v21 = vpop.eup %3400  ;;  %v2101_v26 = vadd.f32 1.0, %v3399_v15  ;;  %v1939_v2 = vpop.f32.mrf.mxu3  ;;  %v1953_v15 = vadd.f32 %v1949_v8, %v1937_v6 }
 0x88e   :  { %3402 = vpow2.f32 %v3044_v25  ;;  %v2105_v16 = vmul.f32 %v3401_v21, %v2100_v49  ;;  %vm2110_vm12 = vweird.f32 %v3401_v21 }
 0x88f   :  { %3404 = vrcp.f32 %v2101_v26  ;;  %v1996_v55 = vpop.f32.mrf.mxu1  ;;  %vm2111_vm3 = vmor %vm2109_vm2, %vm2110_vm12  ;;  %v2130_v23 = vand.u32 2147483648, %v2101_v26  ;;  %v2128_v20 = vand.u32 2147483647, %v2101_v26  ;;  %vm2124_vm6 = vweird.f32 %v2101_v26 }
 0x890   :  { %v2024_v28 = vadd.f32 %v1996_v55, %v1958_v27  ;;  %v2106_v19 = vsub.f32 1.0, %v2105_v16 }
 0x891   :  { %v2131_v51 = vor.u32 1.1754944e-38, %v2130_v23  ;;  %vm2129_vm8 = vcmp.eq.f32.partialorder %v2128_v20, 8.507059e+37 }
 0x892   :  { %v4167_v32 = vadd.f32 %v2058_v5, %v2024_v28  ;;  %v2107_v34 = vmul.f32 %v3401_v21, %v2106_v19  ;;  %v2072_v28 = vpop.f32.mrf.mxu0 }
 0x894   :  { %v3403_v38 = vpop.eup %3402  ;;  %v3045_v9 = vmul.f32 -1.442695, %v4167_v32  ;;  %v2108_v40 = vadd.f32 %v3401_v21, %v2107_v34 }
 0x895   :  { %v3405_v56 = vpop.eup %3404  ;;  %v2102_v61 = vadd.f32 1.0, %v3403_v38  ;;  %v1942_v49 = vpop.f32.mrf.mxu3 }
 0x896   :  { %3406 = vpow2.f32 %v3045_v9  ;;  %v2112_v41 = vsel %vm2111_vm3, %v3401_v21, %v2108_v40  ;;  %v2120_v18 = vmul.f32 %v3405_v56, %v2101_v26  ;;  %vm2125_vm5 = vweird.f32 %v3405_v56 }
 0x897   :  { %3408 = vrcp.f32 %v2102_v61  ;;  %v2117_v22 = vsel %vm2114_vm4, %v2116_v39, %v2112_v41  ;;  %vm2126_vm7 = vmor %vm2124_vm6, %vm2125_vm5  ;;  %v2145_v13 = vand.u32 2147483648, %v2102_v61  ;;  %v2143_v52 = vand.u32 2147483647, %v2102_v61 }
 0x898   :  { %2168 = vrot.lane.b32.xlu2 %v2117_v22, %s3424_s0  ;;  %v2121_v44 = vsub.f32 1.0, %v2120_v18  ;;  %vm2139_vm11 = vweird.f32 %v2102_v61  ;;  %v1955_v39 = vadd.f32 %v1949_v8, %v1939_v2  ;;  %v1957_v20 = vadd.f32 %v1949_v8, %v1942_v49 }
 0x899   :  { %v2146_v11 = vor.u32 1.1754944e-38, %v2145_v13  ;;  %vm2144_vm14 = vcmp.eq.f32.partialorder %v2143_v52, 8.507059e+37  ;;  %v3426_v13 = vmov 256.0  }
 0x89a   :  { %v2122_v60 = vmul.f32 %v3405_v56, %v2121_v44  ;;  %v2075_v34 = vpop.f32.mrf.mxu0 }
 0x89c   :  { %v3407_v3 = vpop.eup %3406  ;;  %v2123_v42 = vadd.f32 %v3405_v56, %v2122_v60 }
 0x89d   :  { %v3409_v63 = vpop.eup %3408  ;;  %v2103_v46 = vadd.f32 1.0, %v3407_v3  ;;  %v1944_v43 = vpop.f32.mrf.mxu3 }
 0x89e   :  { %v2127_v31 = vsel %vm2126_vm7, %v3405_v56, %v2123_v42  ;;  %v2135_v48 = vmul.f32 %v3409_v63, %v2102_v61  ;;  %vm2140_vm9 = vweird.f32 %v3409_v63  ;;  %v1959_v38 = vadd.f32 %v1949_v8, %v1944_v43 }
 0x89f   :  { %3410 = vrcp.f32 %v2103_v46  ;;  %v2132_v58 = vsel %vm2129_vm8, %v2131_v51, %v2127_v31  ;;  %vm2141_vm13 = vmor %vm2139_vm11, %vm2140_vm9  ;;  %v2160_v59 = vand.u32 2147483648, %v2103_v46  ;;  %v2158_v1 = vand.u32 2147483647, %v2103_v46 }
 0x8a0   :  { %2170 = vrot.lane.b32.xlu1 %v2132_v58, %s3424_s0  ;;  %v2136_v47 = vsub.f32 1.0, %v2135_v48  ;;  %vm2154_vm0 = vweird.f32 %v2103_v46  ;;  %3412 = vrcp.f32 %v3426_v13  ;;  %v3261_v13 = vld [vmem:[%s4415_s4 + $0x64] sm:$0xf0] }
 0x8a1   :  { %v2161_v4 = vor.u32 1.1754944e-38, %v2160_v59  ;;  %vm2159_vm12 = vcmp.eq.f32.partialorder %v2158_v1, 8.507059e+37 }
 0x8a2   :  { %v2137_v50 = vmul.f32 %v3409_v63, %v2136_v47  ;;  %v2077_v17 = vpop.f32.mrf.mxu0 }
 0x8a4   :  { %v2138_v53 = vadd.f32 %v3409_v63, %v2137_v50 }
 0x8a5   :  { %v3411_v54 = vpop.eup %3410  ;;  %v2008_v30 = vpop.f32.mrf.mxu3 }
 0x8a6   :  { %v2142_v33 = vsel %vm2141_vm13, %v3409_v63, %v2138_v53  ;;  %v2150_v35 = vmul.f32 %v3411_v54, %v2103_v46  ;;  %vm2155_vm15 = vweird.f32 %v3411_v54  ;;  %v2019_v25 = vadd.f32 %v2008_v30, %v1953_v15  ;;  %v3413_v50 = vpop.eup %3412 }
 0x8a7   :  { %v2147_v62 = vsel %vm2144_vm14, %v2146_v11, %v2142_v33  ;;  %vm2156_vm1 = vmor %vm2154_vm0, %vm2155_vm15  ;;  %vm2212_vm2 = vweird.f32 %v3413_v50  ;;  %vm2669_vm0 = vcmask 23552  }
 0x8a8   :  { %2172 = vrot.lane.b32.xlu0 %v2147_v62, %s3424_s0  ;;  %v2151_v0 = vsub.f32 1.0, %v2150_v35  ;;  %v2081_v27 = vadd.f32 %v2070_v10, %v2019_v25  ;;  %v3073_v25 = vld [vmem:[%s4415_s4 + $0x90] sm:$0xf] }
 0x8aa   :  { %v2152_v24 = vmul.f32 %v3411_v54, %v2151_v0 }
 0x8ac   :  { %v2153_v12 = vadd.f32 %v3411_v54, %v2152_v24 }
 0x8ad   :  { %v2010_v21 = vpop.f32.mrf.mxu3 }
 0x8ae   :  { %v2157_v36 = vsel %vm2156_vm1, %v3411_v54, %v2153_v12  ;;  %v2021_v18 = vadd.f32 %v2010_v21, %v1955_v39  ;;  %v3267_v21 = vld [vmem:[%s4415_s4 + $0x94] sm:$0xf0]  ;;  %v3273_v39 = vld [vmem:[%s4415_s4 + $0x124] sm:$0xf0] }
 0x8af   :  { %v2162_v57 = vsel %vm2159_vm12, %v2161_v4, %v2157_v36 }
 0x8b0   :  { %2174 = vrot.lane.b32.xlu2 %v2162_v57, %s3424_s0  ;;  %v2083_v23 = vadd.f32 %v2072_v28, %v2021_v18  ;;  %v3275_v28 = vld [vmem:[%s4415_s4 + $0x134] sm:$0xf0] }
 0x8b5   :  { %v2013_v14 = vpop.f32.mrf.mxu3 }
 0x8b6   :  { %v2023_v42 = vadd.f32 %v2013_v14, %v1957_v20  ;;  %v3274_v14 = vld [vmem:[%s4415_s4 + $0x134] sm:$0xf] }
 0x8b7   :  { %v3262_v20 = vld [vmem:[%s4415_s4 + $0x74] sm:$0xf] }
 0x8bd   :  { %v2015_v37 = vpop.f32.mrf.mxu3 }
 0x8be   :  { %v2025_v9 = vadd.f32 %v2015_v37, %v1959_v38  ;;  %v3065_v38 = vld [vmem:[%s4415_s4 + $0x80] sm:$0xf] }
 0x8c0   :  { %v2087_v56 = vadd.f32 %v2077_v17, %v2025_v9  ;;  %v3265_v9 = vld [vmem:[%s4415_s4 + $0x84] sm:$0xf0]  ;;  %v3264_v17 = vld [vmem:[%s4415_s4 + $0x84] sm:$0xf] }
 0x8f2   :  { %v2169_v26 = vpop.permute.xlu2 %2168 }
 0x8f3   :  { %v2180_v16 = vadd.f32 %v2169_v26, %v4158_v45  ;;  %v3266_v26 = vld [vmem:[%s4415_s4 + $0x94] sm:$0xf] }
 0x8f5   :  { %v2184_v55 = vadd.f32 %v2180_v16, %v2081_v27  ;;  %v3074_v27 = vor.u32 %v3267_v21, %v3073_v25  ;;  %v3075_v16 = vld [vmem:[%s4415_s4 + $0x98] sm:$0xf0]  ;;  %v3281_v25 = vld [vmem:[%s4415_s4 + $0x1c4] sm:$0xf0]  ;;  %v3280_v21 = vld [vmem:[%s4415_s4 + $0x1c4] sm:$0xf] }
 0x8f7   :  { %v2188_v19 = vmax.f32 %v2184_v55, 0.0  ;;  %v3115_v55 = vld [vmem:[%s4415_s4 + $0x130] sm:$0xf]  ;;  %2312 = vmatpush.bf16.msra.mxu1 %v3074_v27 }
 0x8f9   :  { %v2192_v5 = vsel %vm482_vm10, %v2188_v19, 0.0 }
 0x8fa   :  { %2193 = vadd.xlane.f32.xlu1 %v2192_v5  ;;  %v3116_v5 = vor.u32 %v3275_v28, %v3115_v55 }
 0x8fc   :  { %2401 = vmatpush.bf16.msra.mxu2 %v3116_v5  ;;  %v3279_v5 = vld [vmem:[%s4415_s4 + $0x1b4] sm:$0xf0] }
 0x90a   :  { %v2175_v40 = vpop.permute.xlu2 %2174 }
 0x90b   :  { %v2183_v61 = vadd.f32 %v2175_v40, %v4167_v32  ;;  %v2085_v32 = vadd.f32 %v2075_v34, %v2023_v42  ;;  %v3117_v34 = vld [vmem:[%s4415_s4 + $0x138] sm:$0xf0]  ;;  %v3066_v40 = vor.u32 %v3265_v9, %v3065_v38 }
 0x90c   :  { %v3120_v37 = vor.u32 %v3274_v14, %v3117_v34  ;;  %v3059_v42 = vld [vmem:[%s4415_s4 + $0x78] sm:$0xf0]  ;;  %v3278_v34 = vld [vmem:[%s4415_s4 + $0x1b4] sm:$0xf] }
 0x90d   :  { %v2187_v41 = vadd.f32 %v2183_v61, %v2087_v56  ;;  %v3067_v56 = vld [vmem:[%s4415_s4 + $0x88] sm:$0xf0]  ;;  %v3107_v61 = vld [vmem:[%s4415_s4 + $0x120] sm:$0xf]  ;;  %2313 = vmatpush.bf16.msra.mxu1 %v3066_v40 }
 0x90e   :  { %2415 = vmatpush.bf16.msra.mxu0 %v3120_v37  ;;  %v3108_v18 = vor.u32 %v3273_v39, %v3107_v61  ;;  %v3143_v37 = vld [vmem:[%s4415_s4 + $0x1b8] sm:$0xf0]  ;;  %v3133_v40 = vld [vmem:[%s4415_s4 + $0x1a0] sm:$0xf]  ;;  %v3276_v39 = vld [vmem:[%s4415_s4 + $0x1a4] sm:$0xf] }
 0x90f   :  { %v2191_v45 = vmax.f32 %v2187_v41, 0.0  ;;  %v3070_v41 = vor.u32 %v3264_v17, %v3067_v56  ;;  %v3146_v17 = vor.u32 %v3278_v34, %v3143_v37  ;;  %v3277_v56 = vld [vmem:[%s4415_s4 + $0x1a4] sm:$0xf0] }
 0x910   :  { %2402 = vmatpush.bf16.msra.mxu2 %v3108_v18 }
 0x911   :  { %v2201_v22 = vsel %vm482_vm10, %v2191_v45, 0.0 }
 0x912   :  { %v2171_v44 = vpop.permute.xlu1 %2170  ;;  %2202 = vadd.xlane.f32.xlu1 %v2201_v22  ;;  %v3109_v22 = vld [vmem:[%s4415_s4 + $0x128] sm:$0xf0] }
 0x913   :  { %v2181_v60 = vadd.f32 %v2171_v44, %v4161_v29  ;;  %v2208_v29 = vmul.f32 256.0, %v3413_v50 }
 0x915   :  { %v2185_v3 = vadd.f32 %v2181_v60, %v2083_v23  ;;  %v2209_v52 = vsub.f32 1.0, %v2208_v29  ;;  %v3057_v23 = vld [vmem:[%s4415_s4 + $0x70] sm:$0xf]  ;;  %v3263_v60 = vld [vmem:[%s4415_s4 + $0x74] sm:$0xf0] }
 0x917   :  { %v2189_v63 = vmax.f32 %v2185_v3, 0.0  ;;  %v2210_v54 = vmul.f32 %v3413_v50, %v2209_v52  ;;  %v3058_v3 = vor.u32 %v3263_v60, %v3057_v23 }
 0x919   :  { %v2195_v46 = vsel %vm482_vm10, %v2189_v63, 0.0  ;;  %v2211_v33 = vadd.f32 %v3413_v50, %v2210_v54  ;;  %2314 = vmatpush.bf16.msra.mxu1 %v3058_v3  ;;  %v3051_v54 = vld [vmem:[%s4415_s4 + $0x68] sm:$0xf0] }
 0x91a   :  { %2196 = vadd.xlane.f32.xlu0 %v2195_v46  ;;  %v2173_v51 = vpop.permute.xlu0 %2172  ;;  %v3271_v46 = vld [vmem:[%s4415_s4 + $0x114] sm:$0xf0] }
 0x91b   :  { %v2182_v31 = vadd.f32 %v2173_v51, %v4164_v7  ;;  %v4183_v7 = vsel %vm2212_vm2, %v3413_v50, %v2211_v33  ;;  %v3062_v51 = vor.u32 %v3262_v20, %v3059_v42  ;;  %v3260_v50 = vld [vmem:[%s4415_s4 + $0x64] sm:$0xf]  ;;  %v3269_v33 = vld [vmem:[%s4415_s4 + $0x104] sm:$0xf0] }
 0x91d   :  { %v2186_v48 = vadd.f32 %v2182_v31, %v2085_v32  ;;  %v3270_v31 = vld [vmem:[%s4415_s4 + $0x114] sm:$0xf] }
 0x91f   :  { %v2190_v58 = vmax.f32 %v2186_v48, 0.0  ;;  %v3101_v48 = vld [vmem:[%s4415_s4 + $0x118] sm:$0xf0] }
 0x921   :  { %v2198_v47 = vsel %vm482_vm10, %v2190_v58, 0.0 }
 0x922   :  { %2199 = vadd.xlane.f32.xlu2 %v2198_v47  ;;  %v3049_v47 = vld [vmem:[%s4415_s4 + $0x60] sm:$0xf] }
 0x96d   :  { %v2194_v53 = vpop.xlane.xlu1 %2193 }
 0x985   :  { %v2203_v59 = vpop.xlane.xlu1 %2202 }
 0x98d   :  { %v2197_v11 = vpop.xlane.xlu0 %2196 }
 0x98e   :  { %v2204_v35 = vadd.f32 %v2197_v11, %v2194_v53  ;;  %v3050_v53 = vor.u32 %v3261_v13, %v3049_v47  ;;  %v3091_v11 = vld [vmem:[%s4415_s4 + $0x100] sm:$0xf] }
 0x990   :  { %2315 = vmatpush.bf16.msra.mxu1 %v3050_v53 }
 0x995   :  { %v2200_v62 = vpop.xlane.xlu2 %2199 }
 0x996   :  { %v2205_v0 = vadd.f32 %v2204_v35, %v2200_v62  ;;  %v3054_v35 = vor.u32 %v3260_v50, %v3051_v54  ;;  %v3092_v62 = vor.u32 %v3269_v33, %v3091_v11  ;;  %v3287_v33 = vld [vmem:[%s4417_s7 + $0x18] sm:$0xff] }
 0x998   :  { %v2206_v24 = vadd.f32 %v2205_v0, %v2203_v59  ;;  %v3268_v0 = vld [vmem:[%s4415_s4 + $0x104] sm:$0xf]  ;;  %v3093_v59 = vld [vmem:[%s4415_s4 + $0x108] sm:$0xf0] }
 0x99a   :  { %v2214_v1 = vmul.f32 %v4183_v7, %v2206_v24  ;;  %v3096_v24 = vor.u32 %v3268_v0, %v3093_v59  ;;  %v3286_v0 = vld [vmem:[%s4417_s7 + $0x10] sm:$0xff] }
 0x99c   :  { %v4186_v12 = vsub.f32 %v2190_v58, %v2214_v1  ;;  %v4188_v4 = vsub.f32 %v2189_v63, %v2214_v1  ;;  %v4190_v36 = vsub.f32 %v2188_v19, %v2214_v1  ;;  %v4201_v8 = vsub.f32 %v2191_v45, %v2214_v1  ;;  %v3272_v45 = vld [vmem:[%s4415_s4 + $0x124] sm:$0xf]  ;;  %v3099_v63 = vld [vmem:[%s4415_s4 + $0x110] sm:$0xf] }
 0x99d   :  { %v3078_v19 = vor.u32 %v3266_v26, %v3075_v16  ;;  %v3112_v44 = vor.u32 %v3272_v45, %v3109_v22  ;;  %v3100_v32 = vor.u32 %v3271_v46, %v3099_v63  ;;  %v3104_v58 = vor.u32 %v3270_v31, %v3101_v48  ;;  %v3151_v16 = vld [vmem:[%s4415_s4 + $0x1c8] sm:$0xf0] }
 0x99e   :  { %v2221_v57 = vmul.f32 %v4186_v12, %v4186_v12  ;;  %v2220_v6 = vmul.f32 %v4188_v4, %v4188_v4  ;;  %v2219_v2 = vmul.f32 %v4190_v36, %v4190_v36  ;;  %v2222_v10 = vmul.f32 %v4201_v8, %v4201_v8 }
 0x99f   :  { %2326 = vmatpush.bf16.msra.mxu3 %v3078_v19  ;;  %2416 = vmatpush.bf16.msra.mxu0 %v3112_v44  ;;  %v3154_v28 = vor.u32 %v3280_v21, %v3151_v16  ;;  %v3141_v19 = vld [vmem:[%s4415_s4 + $0x1b0] sm:$0xf] }
 0x9a0   :  { %v2229_v49 = vsel %vm482_vm10, %v2221_v57, 0.0  ;;  %v2226_v43 = vsel %vm482_vm10, %v2220_v6, 0.0  ;;  %v2223_v30 = vsel %vm482_vm10, %v2219_v2, 0.0  ;;  %v2232_v15 = vsel %vm482_vm10, %v2222_v10, 0.0  ;;  %2403 = vmatpush.bf16.msra.mxu2 %v3100_v32  ;;  %v3157_v57 = vld [vmem:[%s4415_s4 + $0x1d0] sm:$0xf] }
 0x9a1   :  { %2230 = vadd.xlane.f32.xlu1 %v2229_v49  ;;  %2227 = vadd.xlane.f32.xlu2 %v2226_v43  ;;  %v3283_v6 = vld [vmem:[%s4415_s4 + $0x1d4] sm:$0xf0]  ;;  %v3282_v2 = vld [vmem:[%s4415_s4 + $0x1d4] sm:$0xf]  ;;  %v3159_v43 = vld [vmem:[%s4415_s4 + $0x1d8] sm:$0xf0]  ;;  %v3142_v9 = vor.u32 %v3279_v5, %v3141_v19 }
 0x9a2   :  { %2224 = vadd.xlane.f32.xlu0 %v2223_v30  ;;  %v3158_v49 = vor.u32 %v3283_v6, %v3157_v57  ;;  %v3162_v10 = vor.u32 %v3282_v2, %v3159_v43 }
 0x9a3   :  { %2327 = vmatpush.bf16.msra.mxu3 %v3070_v41  ;;  %2417 = vmatpush.bf16.msra.mxu0 %v3104_v58  ;;  %v3134_v41 = vor.u32 %v3277_v56, %v3133_v40  ;;  %v3284_v40 = vld [vmem:[%s4417_s7] sm:$0xff]  ;;  %v3291_v56 = vld [vmem:[%s4417_s7 + $0x38] sm:$0xff] }
 0x9a4   :  { %2404 = vmatpush.bf16.msra.mxu2 %v3092_v62  ;;  %2485 = vmatpush.bf16.msrb.mxu1 %v3158_v49 }
 0x9a7   :  { %2328 = vmatpush.bf16.msra.mxu3 %v3062_v51  ;;  %2418 = vmatpush.bf16.msra.mxu0 %v3096_v24 }
 0x9a8   :  { %2606 = vmatpush.bf16.msrb.mxu2 %v3287_v33 }
 0x9aa   :  { %2233 = vadd.xlane.f32.xlu0 %v2232_v15  ;;  %v3149_v15 = vld [vmem:[%s4415_s4 + $0x1c0] sm:$0xf] }
 0x9ab   :  { %2329 = vmatpush.bf16.msra.mxu3 %v3054_v35  ;;  %v3150_v27 = vor.u32 %v3281_v25, %v3149_v15  ;;  %2659 = vmatpush.bf16.msrb.mxu0 %v3291_v56 }
 0x9ac   :  { %2607 = vmatpush.bf16.msrb.mxu2 %v3286_v0 }
 0x9ad   :  { %2486 = vmatpush.bf16.msrb.mxu1 %v3150_v27 }
 0x9af   :  { %2499 = vmatpush.bf16.msrb.mxu3 %v3162_v10 }
 0x9b1   :  { %2487 = vmatpush.bf16.msrb.mxu1 %v3142_v9 }
 0x9b3   :  { %2500 = vmatpush.bf16.msrb.mxu3 %v3154_v28 }
 0x9b5   :  { %2488 = vmatpush.bf16.msrb.mxu1 %v3134_v41 }
 0x9b7   :  { %2501 = vmatpush.bf16.msrb.mxu3 %v3146_v17  ;;  %v3285_v17 = vld [vmem:[%s4417_s7 + $0x8] sm:$0xff] }
 0x9b8   :  { %2608 = vmatpush.bf16.msrb.mxu2 %v3285_v17 }
 0x9bc   :  { %2609 = vmatpush.bf16.msrb.mxu2 %v3284_v40 }
 0xa14   :  { %v2228_v29 = vpop.xlane.xlu2 %2227  ;;  %v2231_v30 = vpop.xlane.xlu1 %2230 }
 0xa15   :  { %v2225_v52 = vpop.xlane.xlu0 %2224 }
 0xa16   :  { %v2235_v1 = vadd.f32 %v2228_v29, %v2225_v52 }
 0xa18   :  { %v2236_v26 = vadd.f32 %v2235_v1, %v2231_v30 }
 0xa1d   :  { %v2234_v55 = vpop.xlane.xlu0 %2233 }
 0xa1e   :  { %v2237_v14 = vadd.f32 %v2236_v26, %v2234_v55 }
 0xa20   :  { %v2238_v38 = vmul.f32 %v2237_v14, %v4183_v7  ;;  %v3135_v7 = vld [vmem:[%s4415_s4 + $0x1a8] sm:$0xf0] }
 0xa21   :  { %v3138_v18 = vor.u32 %v3276_v39, %v3135_v7  ;;  %v3290_v39 = vld [vmem:[%s4417_s7 + $0x30] sm:$0xff] }
 0xa22   :  { %v2239_v61 = vadd.f32 1e-05, %v2238_v38  ;;  %2660 = vmatpush.bf16.msrb.mxu0 %v3290_v39 }
 0xa23   :  { %2502 = vmatpush.bf16.msrb.mxu3 %v3138_v18 }
 0xa24   :  { %3414 = vrsqrt.f32 %v2239_v61  ;;  %vm2246_vm4 = vweird.f32 %v2239_v61 }
 0xa2a   :  { %v3415_v45 = vpop.eup %3414 }
 0xa2b   :  { %v2241_v22 = vmul.f32 %v3415_v45, %v2239_v61  ;;  %vm2247_vm3 = vweird.f32 %v3415_v45 }
 0xa2c   :  { %vm2248_vm5 = vmor %vm2246_vm4, %vm2247_vm3 }
 0xa2d   :  { %v2242_v44 = vmul.f32 %v3415_v45, %v2241_v22 }
 0xa2f   :  { %v2243_v23 = vmul.f32 0.5, %v2242_v44 }
 0xa31   :  { %v2244_v60 = vsub.f32 1.5, %v2243_v23 }
 0xa33   :  { %v2245_v20 = vmul.f32 %v3415_v45, %v2244_v60 }
 0xa35   :  { %v2249_v3 = vsel %vm2248_vm5, %v3415_v45, %v2245_v20 }
 0xa36   :  { %v2250_v42 = vmul.f32 %v2249_v3, %v4190_v36  ;;  %v2251_v63 = vmul.f32 %v2249_v3, %v4188_v4  ;;  %v2252_v46 = vmul.f32 %v2249_v3, %v4186_v12  ;;  %v2253_v31 = vmul.f32 %v2249_v3, %v4201_v8  ;;  %v4364_v12 = vld [vmem:[%s4412_s5 + $0x4] ss:$8 sm:$0x3] }
 0xa37   :  { %v2337_v58 = vperm.slane %v4364_v12, 0  ;;  %v2338_v41 = vperm.slane %v4364_v12, 1  ;;  %v3289_v3 = vld [vmem:[%s4417_s7 + $0x28] sm:$0xff] }
 0xa38   :  { %v2264_v51 = vpack.c.bf16 %v2251_v63, %v2250_v42  ;;  %v2353_v32 = vpack.c.bf16 %v2252_v46, %v2251_v63  ;;  %v2437_v48 = vpack.c.bf16 %v2253_v31, %v2252_v46  ;;  %2661 = vmatpush.bf16.msrb.mxu0 %v3289_v3  ;;  %v3288_v46 = vld [vmem:[%s4417_s7 + $0x20] sm:$0xff] }
 0xa3a   :  { %3079 = vmatmul.msk.bf16.vlgmr.msra.gmra.mxu1 %vm482_vm10, %v2264_v51  ;;  %3080 = vmatmul.msk.bf16.vlgmr.msra.gmra.mxu3 %vm482_vm10, %v2264_v51 }
 0xa3b   :  { %3121 = vmatmul.msk.bf16.vlgmr.msra.gmra.mxu2 %vm482_vm10, %v2353_v32  ;;  %3122 = vmatmul.msk.bf16.vlgmr.msra.gmra.mxu0 %vm482_vm10, %v2353_v32 }
 0xa3c   :  { %2662 = vmatpush.bf16.msrb.mxu0 %v3288_v46 }
 0xa4a   :  { %3163 = vmatmul.msk.bf16.vlgmr.msrb.gmra.mxu1 %vm482_vm10, %v2437_v48  ;;  %3164 = vmatmul.msk.bf16.vlgmr.msrb.gmra.mxu3 %vm482_vm10, %v2437_v48 }
 0xab7   :  { %v2317_v4 = vpop.f32.mrf.mxu1 }
 0xab8   :  { %v2341_v13 = vadd.f32 %v2337_v58, %v2317_v4  ;;  %v2420_v45 = vpop.f32.mrf.mxu0 }
 0xabd   :  { %v2331_v61 = vpop.f32.mrf.mxu3 }
 0xabe   :  { %v2406_v47 = vpop.f32.mrf.mxu2  ;;  %v2342_v18 = vadd.f32 %v2338_v41, %v2331_v61 }
 0xabf   :  { %v2319_v36 = vpop.f32.mrf.mxu1  ;;  %v2425_v50 = vadd.f32 %v2406_v47, %v2341_v13 }
 0xac0   :  { %v2343_v54 = vadd.f32 %v2337_v58, %v2319_v36  ;;  %v2426_v44 = vadd.f32 %v2420_v45, %v2342_v18  ;;  %v2422_v31 = vpop.f32.mrf.mxu0 }
 0xac5   :  { %v2333_v7 = vpop.f32.mrf.mxu3 }
 0xac6   :  { %v2408_v53 = vpop.f32.mrf.mxu2  ;;  %v2344_v32 = vadd.f32 %v2338_v41, %v2333_v7 }
 0xac7   :  { %v2490_v29 = vpop.f32.mrf.mxu1  ;;  %v2427_v11 = vadd.f32 %v2408_v53, %v2343_v54 }
 0xac8   :  { %v4367_v52 = vadd.f32 %v2490_v29, %v2425_v50  ;;  %v2428_v4 = vadd.f32 %v2422_v31, %v2344_v32 }
 0xaca   :  { %v3165_v8 = vmul.f32 -1.442695, %v4367_v52 }
 0xacc   :  { %3416 = vpow2.f32 %v3165_v8  ;;  %v3295_v8 = vld [vmem:[%s4418_s8] ss:$0 sm:$0xff] }
 0xacd   :  { %v2504_v22 = vpop.f32.mrf.mxu3 }
 0xace   :  { %v2510_v60 = vadd.f32 %v2504_v22, %v2426_v44 }
 0xacf   :  { %v2492_v35 = vpop.f32.mrf.mxu1 }
 0xad0   :  { %v4373_v62 = vadd.f32 %v2492_v35, %v2427_v11 }
 0xad2   :  { %v3417_v59 = vpop.eup %3416  ;;  %v3166_v24 = vmul.f32 -1.442695, %v4373_v62 }
 0xad3   :  { %v2519_v1 = vadd.f32 1.0, %v3417_v59 }
 0xad4   :  { %3418 = vpow2.f32 %v3166_v24 }
 0xad5   :  { %3420 = vrcp.f32 %v2519_v1  ;;  %v2532_v30 = vand.u32 2147483648, %v2519_v1  ;;  %v2530_v15 = vand.u32 2147483647, %v2519_v1  ;;  %vm2526_vm7 = vweird.f32 %v2519_v1  ;;  %v2506_v48 = vpop.f32.mrf.mxu3 }
 0xad6   :  { %v2512_v36 = vadd.f32 %v2506_v48, %v2428_v4 }
 0xad7   :  { %v2533_v26 = vor.u32 1.1754944e-38, %v2532_v30  ;;  %vm2531_vm9 = vcmp.eq.f32.partialorder %v2530_v15, 8.507059e+37 }
 0xada   :  { %v3419_v57 = vpop.eup %3418 }
 0xadb   :  { %v3421_v6 = vpop.eup %3420  ;;  %v2520_v2 = vadd.f32 1.0, %v3419_v57 }
 0xadc   :  { %v2522_v49 = vmul.f32 %v3421_v6, %v2519_v1  ;;  %vm2527_vm6 = vweird.f32 %v3421_v6 }
 0xadd   :  { %3422 = vrcp.f32 %v2520_v2  ;;  %vm2528_vm8 = vmor %vm2526_vm7, %vm2527_vm6  ;;  %v2547_v19 = vand.u32 2147483648, %v2520_v2  ;;  %v2545_v14 = vand.u32 2147483647, %v2520_v2  ;;  %vm2541_vm13 = vweird.f32 %v2520_v2 }
 0xade   :  { %v2523_v43 = vsub.f32 1.0, %v2522_v49 }
 0xadf   :  { %v2548_v37 = vor.u32 1.1754944e-38, %v2547_v19  ;;  %vm2546_vm15 = vcmp.eq.f32.partialorder %v2545_v14, 8.507059e+37 }
 0xae0   :  { %v2524_v10 = vmul.f32 %v3421_v6, %v2523_v43 }
 0xae2   :  { %v2525_v25 = vadd.f32 %v3421_v6, %v2524_v10 }
 0xae3   :  { %v3423_v21 = vpop.eup %3422 }
 0xae4   :  { %v2529_v27 = vsel %vm2528_vm8, %v3421_v6, %v2525_v25  ;;  %v2537_v16 = vmul.f32 %v3423_v21, %v2520_v2  ;;  %vm2542_vm11 = vweird.f32 %v3423_v21 }
 0xae5   :  { %v2534_v55 = vsel %vm2531_vm9, %v2533_v26, %v2529_v27  ;;  %vm2543_vm14 = vmor %vm2541_vm13, %vm2542_vm11 }
 0xae6   :  { %2553 = vrot.lane.b32.xlu2 %v2534_v55, %s3424_s0  ;;  %v2538_v28 = vsub.f32 1.0, %v2537_v16 }
 0xae8   :  { %v2539_v5 = vmul.f32 %v3423_v21, %v2538_v28 }
 0xaea   :  { %v2540_v34 = vadd.f32 %v3423_v21, %v2539_v5 }
 0xaec   :  { %v2544_v38 = vsel %vm2543_vm14, %v3423_v21, %v2540_v34 }
 0xaed   :  { %v2549_v9 = vsel %vm2546_vm15, %v2548_v37, %v2544_v38 }
 0xaee   :  { %2555 = vrot.lane.b32.xlu1 %v2549_v9, %s3424_s0 }
 0xb40   :  { %v2554_v23 = vpop.permute.xlu2 %2553 }
 0xb41   :  { %v2559_v20 = vadd.f32 %v2554_v23, %v4367_v52 }
 0xb43   :  { %v2561_v42 = vadd.f32 %v2559_v20, %v2510_v60 }
 0xb45   :  { %v2563_v63 = vmax.f32 %v2561_v42, 0.0 }
 0xb47   :  { %v2574_v51 = vpack.c.bf16 %v2563_v63, %v2563_v63 }
 0xb49   :  { %3183 = vmatmul.msk.bf16.vlgmr.msrb.gmra.mxu2 %vm482_vm10, %v2574_v51 }
 0xb60   :  { %v2556_v12 = vpop.permute.xlu1 %2555 }
 0xb61   :  { %v2560_v58 = vadd.f32 %v2556_v12, %v4373_v62 }
 0xb63   :  { %v2562_v47 = vadd.f32 %v2560_v58, %v2512_v36 }
 0xb65   :  { %v2564_v13 = vmax.f32 %v2562_v47, 0.0 }
 0xb67   :  { %v2627_v50 = vpack.c.bf16 %v2564_v13, %v2564_v13 }
 0xb69   :  { %3200 = vmatmul.msk.bf16.vlgmr.msrb.gmra.mxu0 %vm482_vm10, %v2627_v50 }
 0xbcc   :  { %v2611_v29 = vpop.f32.mrf.mxu2 }
 0xbcd   :  { %v2618_v53 = vadd.f32 %v3295_v8, %v2611_v29 }
 0xbd4   :  { %v2613_v52 = vpop.f32.mrf.mxu2 }
 0xbe6   :  { %v2664_v54 = vpop.f32.mrf.mxu0 }
 0xbe7   :  { %v2668_v11 = vadd.f32 %v2664_v54, %v2618_v53 }
 0xbe9   :  { %2670 = vst.msk [vmem:[%s4419_s9] sm:$0xff] %vm2669_vm0, %v2668_v11 }
 0xbee   :  { %v2666_v33 = vpop.f32.mrf.mxu0 }

</bundles_post_ra>
